<compile_context>
chip_gen: v6e
topology: v6e:2x2x1
jax: 0.10.0
libtpu: 0.0.40
codegen_flags: <defaults>
</compile_context>

<pallas_src>
import functools
import math

import numpy as np

import jax
import jax.numpy as jnp
from jax.experimental import pallas as pl
from jax.experimental.pallas import tpu as pltpu

# ----------------------------- small config ---------------------------------
NUM_CLASSES = 10
DEPTH = 2
C = 64                          # embed_dim == cond dim D
NUM_HEADS = 4
HEAD_DIM = C // NUM_HEADS
MLP_HIDDEN = int(round(C * 4.0))
CVAE = 8
VOCAB = 64
VOCAB_PAD = 128                 # lane-dense output; wrapper slices back to VOCAB
NORM_EPS = 1e-6
COND_DROP_RATE = 0.1
PATCH_NUMS = (1, 2, 3)          # infer_patch_nums used by forward()
L_TOTAL = sum(pn * pn for pn in PATCH_NUMS)       # 14
FIRST_L = PATCH_NUMS[0] ** 2                      # 1
LP = ((L_TOTAL + 7) // 8) * 8                     # 16: per-sample rows, sublane aligned
ATTN_SCALE = 1.0 / math.sqrt(HEAD_DIM)            # attn_l2_norm=False
NEG_INF = -1e30                 # finite "-inf": same softmax result, NaN-safe
ROWS_TARGET = 256               # target TB*LP rows per grid step (v6e/v7x sweet spot)


# ----------------------------- packed-weight layout ---------------------------
def _layout(segs):
    """Assign each named segment a 128-aligned lane offset inside one buffer."""
    offs, cur = {}, 0
    for name, w in segs:
        offs[name] = (cur, w)
        cur += ((w + 127) // 128) * 128
    return offs, cur


# weights whose contraction dim is C (=64 rows), packed along lanes
WC_SEGS = ([("we", C), ("ada", DEPTH * 6 * C)]
           + [(f"{n}_{d}", w) for d in range(DEPTH)
              for n, w in (("q", C), ("k", C), ("v", C), ("proj", C),
                           ("fc1", MLP_HIDDEN))]
           + [("hnm", 2 * C), ("head", VOCAB_PAD)])
WC_OFF, WC_COLS = _layout(WC_SEGS)

# weights whose contraction dim is MLP_HIDDEN
WH_SEGS = [(f"fc2_{d}", C) for d in range(DEPTH)]
WH_OFF, WH_COLS = _layout(WH_SEGS)

# all biases in one f32 buffer (word-embed bias is folded into the row table)
B_SEGS = ([("ada_b", DEPTH * 6 * C)]
          + [(f"{n}_{d}", w) for d in range(DEPTH)
             for n, w in (("qb", C), ("kb", C), ("vb", C), ("projb", C),
                          ("fc1b", MLP_HIDDEN), ("fc2b", C))]
          + [("hnm_b", 2 * C), ("head_b", VOCAB_PAD)])
B_OFF, B_COLS = _layout(B_SEGS)


# ----------------------------- fused Pallas kernel ----------------------------
def _ln_mod(x, scale, shift):
    """LayerNorm (no affine, single reduction pass) then x*(1+scale)+shift."""
    mu = jnp.mean(x, axis=-1, keepdims=True)
    ex2 = jnp.mean(x * x, axis=-1, keepdims=True)
    var = jnp.maximum(ex2 - mu * mu, 0.0)
    xn = (x - mu) * jax.lax.rsqrt(var + NORM_EPS)
    return xn * (1.0 + scale) + shift


def _flexvar_kernel(xin_ref, cond_ref, tab_ref, bias_ref, wc_ref, wh_ref, bp_ref,
                    out_ref):
    f32, bf16 = jnp.float32, jnp.bfloat16
    R = xin_ref.shape[0]                       # TB * LP rows per grid step

    def w_c(name):
        o, w = WC_OFF[name]
        return wc_ref[:, o:o + w]

    def w_h(name):
        o, w = WH_OFF[name]
        return wh_ref[:, o:o + w]

    def b_(name):
        o, w = B_OFF[name]
        return bp_ref[:, o:o + w]

    cond = cond_ref[...]                                             # (R, C) f32

    # word_embed (bias folded into tab); sos rows take cond + pos_start instead
    we = jnp.dot(xin_ref[...].astype(bf16), w_c("we"),
                 preferred_element_type=f32)                         # (R, C)
    row = jax.lax.broadcasted_iota(jnp.int32, (R, 1), 0)
    if (LP & (LP - 1)) == 0:
        pos_in_seq = jnp.bitwise_and(row, LP - 1)
    else:
        pos_in_seq = row % LP
    is_sos = pos_in_seq < FIRST_L
    x = jnp.where(is_sos, cond, we) + tab_ref[...]                   # (R, C)

    # AdaLN conditioning for ALL blocks in one matmul (rows carry per-sample cond)
    silu_c = cond * jax.nn.sigmoid(cond)
    silu_bf = silu_c.astype(bf16)
    ada = jnp.dot(silu_bf, w_c("ada"), preferred_element_type=f32) + b_("ada_b")

    bias = bias_ref[...]                                             # (R, R) block-diag mask

    for d in range(DEPTH):
        base = d * 6 * C
        gamma1 = ada[:, base + 0 * C: base + 1 * C]
        gamma2 = ada[:, base + 1 * C: base + 2 * C]
        scale1 = ada[:, base + 2 * C: base + 3 * C]
        scale2 = ada[:, base + 3 * C: base + 4 * C]
        shift1 = ada[:, base + 4 * C: base + 5 * C]
        shift2 = ada[:, base + 5 * C: base + 6 * C]

        # --- attention branch ---
        xm = _ln_mod(x, scale1, shift1).astype(bf16)
        q = jnp.dot(xm, w_c(f"q_{d}"), preferred_element_type=f32) + b_(f"qb_{d}")
        k = jnp.dot(xm, w_c(f"k_{d}"), preferred_element_type=f32) + b_(f"kb_{d}")
        v = jnp.dot(xm, w_c(f"v_{d}"), preferred_element_type=f32) + b_(f"vb_{d}")
        q_bf = q.astype(bf16)
        kT_bf = jnp.transpose(k).astype(bf16)    # one K transpose per depth, shared by heads
        v_bf = v.astype(bf16)

        heads = []
        for h in range(NUM_HEADS):
            lo = h * HEAD_DIM
            s = jnp.dot(q_bf[:, lo:lo + HEAD_DIM], kT_bf[lo:lo + HEAD_DIM, :],
                        preferred_element_type=f32) + bias           # (R, R)
            m = jnp.max(s, axis=-1, keepdims=True)
            p = jnp.exp(s - m)
            p = p * pl.reciprocal(jnp.sum(p, axis=-1, keepdims=True), approx=True)
            heads.append(jnp.dot(p.astype(bf16), v_bf[:, lo:lo + HEAD_DIM],
                                 preferred_element_type=f32))        # (R, dh)
        attn = jnp.concatenate(heads, axis=-1)                       # (R, C)
        proj = jnp.dot(attn.astype(bf16), w_c(f"proj_{d}"),
                       preferred_element_type=f32) + b_(f"projb_{d}")
        x = x + proj * gamma1

        # --- MLP branch ---
        xm2 = _ln_mod(x, scale2, shift2).astype(bf16)
        h1 = jnp.dot(xm2, w_c(f"fc1_{d}"), preferred_element_type=f32) + b_(f"fc1b_{d}")
        h1 = jax.nn.gelu(h1, approximate=True)   # GELU(approximate='tanh')
        f = jnp.dot(h1.astype(bf16), w_h(f"fc2_{d}"),
                    preferred_element_type=f32) + b_(f"fc2b_{d}")
        x = x + f * gamma2

    # --- get_logits: head(head_nm(x, cond_BD)), lane-dense 128-wide output ---
    ss = jnp.dot(silu_bf, w_c("hnm"), preferred_element_type=f32) + b_("hnm_b")
    hm = _ln_mod(x, ss[:, :C], ss[:, C:2 * C]).astype(bf16)
    out_ref[...] = jnp.dot(hm, w_c("head"), preferred_element_type=f32) + b_("head_b")


def _cost_estimate(G, R):
    rows = G * R
    per_row = (2 * C * C                                  # word embed
               + 2 * C * (DEPTH * 6 * C)                  # adaLN projections
               + DEPTH * (6 * C * C                       # q,k,v
                          + 4 * C * R                     # scores + pv
                          + 2 * C * C                     # out proj
                          + 4 * C * MLP_HIDDEN)           # fc1 + fc2
               + 4 * C * C                                # head_nm
               + 2 * C * VOCAB_PAD)                       # head
    flops = rows * per_row
    transc = rows * (C + DEPTH * (NUM_HEADS * R + MLP_HIDDEN))
    bytes_acc = (2 * rows * C * 4 + R * C * 4 + R * R * 4
                 + C * WC_COLS * 2 + MLP_HIDDEN * WH_COLS * 2 + B_COLS * 4
                 + rows * VOCAB_PAD * 4)
    return pl.CostEstimate(flops=int(flops), transcendentals=int(transc),
                           bytes_accessed=int(bytes_acc))


def flexvar_fused_call(params, xin_rows, cond_rows, tab_rows, attn_bias, TB):
    rows = xin_rows.shape[0]
    R = TB * LP
    G = rows // R
    return pl.pallas_call(
        _flexvar_kernel,
        out_shape=jax.ShapeDtypeStruct((rows, VOCAB_PAD), jnp.float32),
        grid=(G,),
        in_specs=[
            pl.BlockSpec((R, C), lambda g: (g, 0)),                  # teacher-forcing rows
            pl.BlockSpec((R, C), lambda g: (g, 0)),                  # per-row cond
            pl.BlockSpec((R, C), lambda g: (0, 0)),                  # row table (pos + biases)
            pl.BlockSpec((R, R), lambda g: (0, 0)),                  # block-diag attn bias
            pl.BlockSpec((C, WC_COLS), lambda g: (0, 0)),            # packed bf16 weights (C, *)
            pl.BlockSpec((MLP_HIDDEN, WH_COLS), lambda g: (0, 0)),   # packed bf16 fc2 weights
            pl.BlockSpec((1, B_COLS), lambda g: (0, 0)),             # packed f32 biases
        ],
        out_specs=pl.BlockSpec((R, VOCAB_PAD), lambda g: (g, 0)),
        compiler_params=pltpu.CompilerParams(dimension_semantics=("parallel",)),
        cost_estimate=_cost_estimate(G, R),
    )(xin_rows, cond_rows, tab_rows, attn_bias,
      params["wc"], params["wh"], params["bias_pack"])


# ----------------------------- one-time prep (numpy, hoisted to init) ---------
def generate_2d_rope_np(h, w, d):
    """generate_2d_rotary_position_embedding -> (1, d, h, w)."""
    div = np.exp(np.arange(0, d, 2, dtype=np.float32) * (-math.log(10000.0) / d))
    pe = np.zeros((h, w, d), np.float32)
    y = np.arange(h, dtype=np.float32)[:, None, None]
    x = np.arange(w, dtype=np.float32)[None, :, None]
    pe[..., 0::2] = np.sin(y * div)
    pe[..., 1::2] = np.cos(x * div)
    return pe[None].transpose(0, 3, 1, 2)


def adaptive_avg_pool2d_np(x, out_hw):
    """F.interpolate(mode='area') == adaptive_avg_pool2d. x: (1, C, H, W)."""
    _, Cc, H, W = x.shape
    out = np.zeros((1, Cc, out_hw, out_hw), np.float32)
    for oi in range(out_hw):
        h0 = (oi * H) // out_hw
        h1 = -(-((oi + 1) * H) // out_hw)
        for oj in range(out_hw):
            w0 = (oj * W) // out_hw
            w1 = -(-((oj + 1) * W) // out_hw)
            out[0, :, oi, oj] = x[0, :, h0:h1, w0:w1].mean(axis=(1, 2))
    return out


def build_pos_1lc_np(pos_chw, patch_nums):
    parts = []
    _, Cc, _, _ = pos_chw.shape
    for hw in patch_nums:
        pooled = adaptive_avg_pool2d_np(pos_chw, hw)                 # (1, C, hw, hw)
        parts.append(pooled.reshape(1, Cc, hw * hw).transpose(0, 2, 1))
    return np.concatenate(parts, axis=1)[0].astype(np.float32)       # (L, C)


@functools.lru_cache(maxsize=None)
def _block_bias_np(TB):
    """Block-diagonal (TB*LP, TB*LP) mask; cross-sample and pad keys are masked."""
    d = np.concatenate([np.full((pn * pn,), i, np.float32)
                        for i, pn in enumerate(PATCH_NUMS)])
    small = np.where(d[:, None] >= d[None, :], 0.0, NEG_INF).astype(np.float32)
    tile = np.full((LP, LP), NEG_INF, np.float32)
    tile[:L_TOTAL, :L_TOTAL] = small
    for i in range(L_TOTAL, LP):                 # pad rows attend to themselves
        tile[i, i] = 0.0
    big = np.full((TB * LP, TB * LP), NEG_INF, np.float32)
    for t in range(TB):
        big[t * LP:(t + 1) * LP, t * LP:(t + 1) * LP] = tile
    return big


def _pick_tb(B):
    tb = max(1, min(B, ROWS_TARGET // LP))
    if B >= 2 and -(-B // tb) < 2:
        tb = -(-B // 2)      # keep >= 2 grid steps (both TensorCores on v7x)
    return tb


# ----------------------------- params ----------------------------------------
def init_params(key):
    keys = list(jax.random.split(key, 8 + 5 * DEPTH))
    kit = iter(keys)
    emb_std = math.sqrt(1.0 / C / 3.0)
    std = 0.02

    def nrm(shape, s=std):
        # TODO(synk): trunc_normal_ replaced by plain scaled normal (synthetic weights).
        return np.asarray(jax.random.normal(next(kit), shape, jnp.float32)) * s

    class_emb = nrm((NUM_CLASSES + 1, C), emb_std)
    pos_start = nrm((FIRST_L, C), emb_std)
    we_w = nrm((CVAE, C))
    we_b = np.zeros((C,), np.float32)
    hnm_w = nrm((C, 2 * C))
    hnm_b = np.zeros((2 * C,), np.float32)
    head_w = nrm((C, VOCAB))
    head_b = np.zeros((VOCAB,), np.float32)

    wc = np.zeros((C, WC_COLS), np.float32)
    wh = np.zeros((MLP_HIDDEN, WH_COLS), np.float32)
    bp = np.zeros((1, B_COLS), np.float32)

    def put(dst, off_tbl, name, mat):
        o, w = off_tbl[name]
        assert mat.shape[1] <= w
        dst[: mat.shape[0], o: o + mat.shape[1]] = mat

    def putb(name, vec):
        o, w = B_OFF[name]
        assert vec.shape[0] <= w
        bp[0, o: o + vec.shape[0]] = vec

    put(wc, WC_OFF, "we", we_w)                                  # (Cvae, C) -> top-left
    ada_cols = [nrm((C, 6 * C)) for _ in range(DEPTH)]
    put(wc, WC_OFF, "ada", np.concatenate(ada_cols, axis=1))
    putb("ada_b", np.zeros((DEPTH * 6 * C,), np.float32))

    for d in range(DEPTH):
        qkv = nrm((C, 3 * C))
        put(wc, WC_OFF, f"q_{d}", qkv[:, :C] * ATTN_SCALE)       # fold 1/sqrt(dh) into Wq
        put(wc, WC_OFF, f"k_{d}", qkv[:, C:2 * C])
        put(wc, WC_OFF, f"v_{d}", qkv[:, 2 * C:])
        putb(f"qb_{d}", np.zeros((C,), np.float32) * ATTN_SCALE)  # scale folds into q bias too
        putb(f"kb_{d}", np.zeros((C,), np.float32))
        putb(f"vb_{d}", np.zeros((C,), np.float32))

        put(wc, WC_OFF, f"proj_{d}", nrm((C, C)) / math.sqrt(2 * DEPTH))
        putb(f"projb_{d}", np.zeros((C,), np.float32))
        put(wc, WC_OFF, f"fc1_{d}", nrm((C, MLP_HIDDEN)))
        putb(f"fc1b_{d}", np.zeros((MLP_HIDDEN,), np.float32))
        put(wh, WH_OFF, f"fc2_{d}", nrm((MLP_HIDDEN, C)) / math.sqrt(2 * DEPTH))
        putb(f"fc2b_{d}", np.zeros((C,), np.float32))

    put(wc, WC_OFF, "hnm", hnm_w)
    putb("hnm_b", hnm_b)
    head_w_pad = np.zeros((C, VOCAB_PAD), np.float32)
    head_w_pad[:, :VOCAB] = head_w
    put(wc, WC_OFF, "head", head_w_pad)
    head_b_pad = np.zeros((VOCAB_PAD,), np.float32)
    head_b_pad[:VOCAB] = head_b
    putb("head_b", head_b_pad)

    # per-row additive table: pos_1LC + word-embed bias; sos rows use pos_start + pos
    pos_1lc = build_pos_1lc_np(generate_2d_rope_np(32, 32, C), PATCH_NUMS)    # (L, C)
    tab = np.zeros((LP, C), np.float32)
    tab[:L_TOTAL] = pos_1lc + we_b[None, :]
    tab[:FIRST_L] = pos_start + pos_1lc[:FIRST_L]

    return {
        "class_emb": jnp.asarray(class_emb),
        "row_add": jnp.asarray(tab),                              # (LP, C)
        "wc": jnp.asarray(wc).astype(jnp.bfloat16),               # packed MXU weights
        "wh": jnp.asarray(wh).astype(jnp.bfloat16),
        "bias_pack": jnp.asarray(bp),                             # packed f32 biases
    }


# ----------------------------- model forward ---------------------------------
def flexvar_forward(params, label_B, x_BLCv_wo_first_l, drop_key):
    B = x_BLCv_wo_first_l.shape[0]

    # conditional label dropout (torch.rand(B) < cond_drop_rate)
    u = jax.random.uniform(drop_key, (B,))
    label_B = jnp.where(u < COND_DROP_RATE, NUM_CLASSES, label_B)
    cond_BD = params["class_emb"][label_B]                        # (B, C) gather (glue)

    TB = _pick_tb(B)
    G = -(-B // TB)
    Bp = G * TB

    # teacher-forcing input, zero-padded: sos row, rows L..LP, samples B..Bp, lanes Cvae..C
    x_in = jnp.zeros((Bp, LP, C), jnp.float32)
    x_in = x_in.at[:B, FIRST_L:L_TOTAL, :CVAE].set(x_BLCv_wo_first_l.astype(jnp.float32))
    xin_rows = x_in.reshape(Bp * LP, C)

    cond_pad = jnp.zeros((Bp, C), jnp.float32).at[:B].set(cond_BD)
    cond_rows = jnp.broadcast_to(cond_pad[:, None, :], (Bp, LP, C)).reshape(Bp * LP, C)

    tab_rows = jnp.tile(params["row_add"], (TB, 1))               # (TB*LP, C)
    attn_bias = jnp.asarray(_block_bias_np(TB))                   # baked constant

    out = flexvar_fused_call(params, xin_rows, cond_rows, tab_rows, attn_bias, TB)
    return out.reshape(Bp, LP, VOCAB_PAD)[:B, :L_TOTAL, :VOCAB]


# ----------------------------- main -------------------------------------------
if __name__ == "__main__":
    key = jax.random.PRNGKey(0)
    k_param, k_label, k_x, k_drop = jax.random.split(key, 4)

    params = init_params(k_param)
    B = 2
    label_B = jax.random.randint(k_label, (B,), 0, NUM_CLASSES, dtype=jnp.int32)
    x_BLCv_wo_first_l = jax.random.normal(
        k_x, (B, L_TOTAL - FIRST_L, CVAE), jnp.float32)

    fwd = jax.jit(flexvar_forward)
    logits = fwd(params, label_B, x_BLCv_wo_first_l, k_drop)
    jax.block_until_ready(logits)

    assert logits.shape == (B, L_TOTAL, VOCAB), logits.shape
    assert bool(jnp.all(jnp.isfinite(logits)))
    print("KERNEL_OK")
</pallas_src>

<mosaic_0001>
module attributes {stable_mosaic.version = 11 : i64} {
  func.func @_flexvar_kernel(%arg0: i32, %arg1: memref<16x64xf32, #tpu.memory_space<vmem>>, %arg2: memref<16x64xf32, #tpu.memory_space<vmem>>, %arg3: memref<16x64xf32, #tpu.memory_space<vmem>>, %arg4: memref<16x16xf32, #tpu.memory_space<vmem>>, %arg5: memref<64x2688xbf16, #tpu.memory_space<vmem>>, %arg6: memref<256x256xbf16, #tpu.memory_space<vmem>>, %arg7: memref<1x2816xf32, #tpu.memory_space<vmem>>, %arg8: memref<16x128xf32, #tpu.memory_space<vmem>>) attributes {dimension_semantics = [#tpu.dimension_semantics<parallel>], iteration_bounds = array<i64: 2>, scalar_prefetch = 0 : i64, scratch_operands = 0 : i64, tpu.core_type = #tpu.core_type<tc>, window_params = [{transform_indices = @transform_0, window_bounds = array<i64: 16, 64>}, {transform_indices = @transform_1, window_bounds = array<i64: 16, 64>}, {pipeline_mode = #tpu.pipeline_mode<synchronous>, transform_indices = @transform_2, window_bounds = array<i64: 16, 64>}, {pipeline_mode = #tpu.pipeline_mode<synchronous>, transform_indices = @transform_3, window_bounds = array<i64: 16, 16>}, {pipeline_mode = #tpu.pipeline_mode<synchronous>, transform_indices = @transform_4, window_bounds = array<i64: 64, 2688>}, {pipeline_mode = #tpu.pipeline_mode<synchronous>, transform_indices = @transform_5, window_bounds = array<i64: 256, 256>}, {pipeline_mode = #tpu.pipeline_mode<synchronous>, transform_indices = @transform_6, window_bounds = array<i64: 1, 2816>}, {transform_indices = @transform_7, window_bounds = array<i64: 16, 128>}]} {
    %c0 = arith.constant 0 : index
    %c0_0 = arith.constant 0 : index
    %0 = vector.load %arg2[%c0, %c0_0] : memref<16x64xf32, #tpu.memory_space<vmem>>, vector<16x64xf32>
    %c0_1 = arith.constant 0 : index
    %c0_2 = arith.constant 0 : index
    %1 = vector.load %arg1[%c0_1, %c0_2] : memref<16x64xf32, #tpu.memory_space<vmem>>, vector<16x64xf32>
    %2 = arith.truncf %1 : vector<16x64xf32> to vector<16x64xbf16>
    %c0_3 = arith.constant 0 : index
    %c0_4 = arith.constant 0 : index
    %3 = vector.load %arg5[%c0_3, %c0_4] : memref<64x2688xbf16, #tpu.memory_space<vmem>>, vector<64x64xbf16>
    %cst = arith.constant dense<0.000000e+00> : vector<16x64xf32>
    %4 = tpu.matmul %2, %3, %cst {dimension_numbers = #tpu.dot_dimension_numbers<[1], [0], [0], [1], [0, 0, 1, 1], [], []>} : vector<16x64xbf16>, vector<64x64xbf16>, vector<16x64xf32> -> vector<16x64xf32>
    %5 = tpu.iota {dimensions = array<i32: 0>} : vector<16x1xi32>
    %c15_i32 = arith.constant 15 : i32
    %6 = vector.broadcast %c15_i32 : i32 to vector<16x1xi32>
    %7 = arith.andi %5, %6 : vector<16x1xi32>
    %c1_i32 = arith.constant 1 : i32
    %8 = vector.broadcast %c1_i32 : i32 to vector<16x1xi32>
    %9 = arith.cmpi slt, %7, %8 : vector<16x1xi32>
    %10 = vector.shape_cast %9 : vector<16x1xi1> to vector<16x1xi1>
    %11 = vector.broadcast %10 : vector<16x1xi1> to vector<16x64xi1>
    %12 = arith.select %11, %0, %4 : vector<16x64xi1>, vector<16x64xf32>
    %c0_5 = arith.constant 0 : index
    %c0_6 = arith.constant 0 : index
    %13 = vector.load %arg3[%c0_5, %c0_6] : memref<16x64xf32, #tpu.memory_space<vmem>>, vector<16x64xf32>
    %14 = arith.addf %12, %13 : vector<16x64xf32>
    %15 = arith.negf %0 : vector<16x64xf32>
    %16 = math.exp %15 : vector<16x64xf32>
    %cst_7 = arith.constant 1.000000e+00 : f32
    %17 = vector.broadcast %cst_7 : f32 to vector<16x64xf32>
    %18 = arith.addf %17, %16 : vector<16x64xf32>
    %19 = arith.divf %17, %18 : vector<16x64xf32>
    %20 = arith.mulf %0, %19 : vector<16x64xf32>
    %21 = arith.truncf %20 : vector<16x64xf32> to vector<16x64xbf16>
    %c0_8 = arith.constant 0 : index
    %c128 = arith.constant 128 : index
    %22 = vector.load %arg5[%c0_8, %c128] : memref<64x2688xbf16, #tpu.memory_space<vmem>>, vector<64x768xbf16>
    %cst_9 = arith.constant dense<0.000000e+00> : vector<16x768xf32>
    %23 = tpu.matmul %21, %22, %cst_9 {dimension_numbers = #tpu.dot_dimension_numbers<[1], [0], [0], [1], [0, 0, 1, 1], [], []>} : vector<16x64xbf16>, vector<64x768xbf16>, vector<16x768xf32> -> vector<16x768xf32>
    %c0_10 = arith.constant 0 : index
    %c0_11 = arith.constant 0 : index
    %24 = vector.load %arg7[%c0_10, %c0_11] : memref<1x2816xf32, #tpu.memory_space<vmem>>, vector<1x768xf32>
    %25 = vector.broadcast %24 : vector<1x768xf32> to vector<16x768xf32>
    %26 = arith.addf %23, %25 : vector<16x768xf32>
    %c0_12 = arith.constant 0 : index
    %c0_13 = arith.constant 0 : index
    %27 = vector.load %arg4[%c0_12, %c0_13] : memref<16x16xf32, #tpu.memory_space<vmem>>, vector<16x16xf32>
    %28 = vector.extract_strided_slice %26 {offsets = [0, 0], sizes = [16, 64], strides = [1, 1]} : vector<16x768xf32> to vector<16x64xf32>
    %29 = vector.extract_strided_slice %26 {offsets = [0, 64], sizes = [16, 64], strides = [1, 1]} : vector<16x768xf32> to vector<16x64xf32>
    %30 = vector.extract_strided_slice %26 {offsets = [0, 128], sizes = [16, 64], strides = [1, 1]} : vector<16x768xf32> to vector<16x64xf32>
    %31 = vector.extract_strided_slice %26 {offsets = [0, 192], sizes = [16, 64], strides = [1, 1]} : vector<16x768xf32> to vector<16x64xf32>
    %32 = vector.extract_strided_slice %26 {offsets = [0, 256], sizes = [16, 64], strides = [1, 1]} : vector<16x768xf32> to vector<16x64xf32>
    %33 = vector.extract_strided_slice %26 {offsets = [0, 320], sizes = [16, 64], strides = [1, 1]} : vector<16x768xf32> to vector<16x64xf32>
    %cst_14 = arith.constant dense<0.000000e+00> : vector<16xf32>
    %34 = vector.multi_reduction <add>, %14, %cst_14 [1] : vector<16x64xf32> to vector<16xf32>
    %35 = vector.shape_cast %34 : vector<16xf32> to vector<16x1xf32>
    %cst_15 = arith.constant 6.400000e+01 : f32
    %36 = vector.broadcast %cst_15 : f32 to vector<16x1xf32>
    %37 = arith.divf %35, %36 : vector<16x1xf32>
    %38 = arith.mulf %14, %14 : vector<16x64xf32>
    %cst_16 = arith.constant dense<0.000000e+00> : vector<16xf32>
    %39 = vector.multi_reduction <add>, %38, %cst_16 [1] : vector<16x64xf32> to vector<16xf32>
    %40 = vector.shape_cast %39 : vector<16xf32> to vector<16x1xf32>
    %cst_17 = arith.constant 6.400000e+01 : f32
    %41 = vector.broadcast %cst_17 : f32 to vector<16x1xf32>
    %42 = arith.divf %40, %41 : vector<16x1xf32>
    %43 = arith.mulf %37, %37 : vector<16x1xf32>
    %44 = arith.subf %42, %43 : vector<16x1xf32>
    %cst_18 = arith.constant 0.000000e+00 : f32
    %45 = vector.broadcast %cst_18 : f32 to vector<16x1xf32>
    %46 = arith.maximumf %44, %45 : vector<16x1xf32>
    %47 = vector.broadcast %37 : vector<16x1xf32> to vector<16x64xf32>
    %48 = arith.subf %14, %47 : vector<16x64xf32>
    %cst_19 = arith.constant 9.99999997E-7 : f32
    %49 = vector.broadcast %cst_19 : f32 to vector<16x1xf32>
    %50 = arith.addf %46, %49 : vector<16x1xf32>
    %51 = math.rsqrt %50 : vector<16x1xf32>
    %52 = vector.broadcast %51 : vector<16x1xf32> to vector<16x64xf32>
    %53 = arith.mulf %48, %52 : vector<16x64xf32>
    %cst_20 = arith.constant 1.000000e+00 : f32
    %54 = vector.broadcast %cst_20 : f32 to vector<16x64xf32>
    %55 = arith.addf %54, %30 : vector<16x64xf32>
    %56 = arith.mulf %53, %55 : vector<16x64xf32>
    %57 = arith.addf %56, %32 : vector<16x64xf32>
    %58 = arith.truncf %57 : vector<16x64xf32> to vector<16x64xbf16>
    %c0_21 = arith.constant 0 : index
    %c896 = arith.constant 896 : index
    %59 = vector.load %arg5[%c0_21, %c896] : memref<64x2688xbf16, #tpu.memory_space<vmem>>, vector<64x64xbf16>
    %cst_22 = arith.constant dense<0.000000e+00> : vector<16x64xf32>
    %60 = tpu.matmul %58, %59, %cst_22 {dimension_numbers = #tpu.dot_dimension_numbers<[1], [0], [0], [1], [0, 0, 1, 1], [], []>} : vector<16x64xbf16>, vector<64x64xbf16>, vector<16x64xf32> -> vector<16x64xf32>
    %c0_23 = arith.constant 0 : index
    %c768 = arith.constant 768 : index
    %61 = vector.load %arg7[%c0_23, %c768] : memref<1x2816xf32, #tpu.memory_space<vmem>>, vector<1x64xf32>
    %62 = vector.broadcast %61 : vector<1x64xf32> to vector<16x64xf32>
    %63 = arith.addf %60, %62 : vector<16x64xf32>
    %c0_24 = arith.constant 0 : index
    %c1024 = arith.constant 1024 : index
    %64 = vector.load %arg5[%c0_24, %c1024] : memref<64x2688xbf16, #tpu.memory_space<vmem>>, vector<64x64xbf16>
    %cst_25 = arith.constant dense<0.000000e+00> : vector<16x64xf32>
    %65 = tpu.matmul %58, %64, %cst_25 {dimension_numbers = #tpu.dot_dimension_numbers<[1], [0], [0], [1], [0, 0, 1, 1], [], []>} : vector<16x64xbf16>, vector<64x64xbf16>, vector<16x64xf32> -> vector<16x64xf32>
    %c0_26 = arith.constant 0 : index
    %c896_27 = arith.constant 896 : index
    %66 = vector.load %arg7[%c0_26, %c896_27] : memref<1x2816xf32, #tpu.memory_space<vmem>>, vector<1x64xf32>
    %67 = vector.broadcast %66 : vector<1x64xf32> to vector<16x64xf32>
    %68 = arith.addf %65, %67 : vector<16x64xf32>
    %c0_28 = arith.constant 0 : index
    %c1152 = arith.constant 1152 : index
    %69 = vector.load %arg5[%c0_28, %c1152] : memref<64x2688xbf16, #tpu.memory_space<vmem>>, vector<64x64xbf16>
    %cst_29 = arith.constant dense<0.000000e+00> : vector<16x64xf32>
    %70 = tpu.matmul %58, %69, %cst_29 {dimension_numbers = #tpu.dot_dimension_numbers<[1], [0], [0], [1], [0, 0, 1, 1], [], []>} : vector<16x64xbf16>, vector<64x64xbf16>, vector<16x64xf32> -> vector<16x64xf32>
    %c0_30 = arith.constant 0 : index
    %c1024_31 = arith.constant 1024 : index
    %71 = vector.load %arg7[%c0_30, %c1024_31] : memref<1x2816xf32, #tpu.memory_space<vmem>>, vector<1x64xf32>
    %72 = vector.broadcast %71 : vector<1x64xf32> to vector<16x64xf32>
    %73 = arith.addf %70, %72 : vector<16x64xf32>
    %74 = arith.truncf %63 : vector<16x64xf32> to vector<16x64xbf16>
    %75 = tpu.transpose %68, [1, 0] : vector<16x64xf32> -> vector<64x16xf32>
    %76 = arith.truncf %75 : vector<64x16xf32> to vector<64x16xbf16>
    %77 = arith.truncf %73 : vector<16x64xf32> to vector<16x64xbf16>
    %78 = vector.extract_strided_slice %74 {offsets = [0, 0], sizes = [16, 16], strides = [1, 1]} : vector<16x64xbf16> to vector<16x16xbf16>
    %79 = vector.extract_strided_slice %76 {offsets = [0, 0], sizes = [16, 16], strides = [1, 1]} : vector<64x16xbf16> to vector<16x16xbf16>
    %cst_32 = arith.constant dense<0.000000e+00> : vector<16x16xf32>
    %80 = tpu.matmul %78, %79, %cst_32 {dimension_numbers = #tpu.dot_dimension_numbers<[1], [0], [0], [1], [0, 0, 1, 1], [], []>} : vector<16x16xbf16>, vector<16x16xbf16>, vector<16x16xf32> -> vector<16x16xf32>
    %81 = arith.addf %80, %27 : vector<16x16xf32>
    %cst_33 = arith.constant dense<0xFF800000> : vector<16xf32>
    %82 = vector.multi_reduction <maximumf>, %81, %cst_33 [1] : vector<16x16xf32> to vector<16xf32>
    %83 = vector.shape_cast %82 : vector<16xf32> to vector<16x1xf32>
    %84 = vector.broadcast %83 : vector<16x1xf32> to vector<16x16xf32>
    %85 = arith.subf %81, %84 : vector<16x16xf32>
    %86 = math.exp %85 : vector<16x16xf32>
    %cst_34 = arith.constant dense<0.000000e+00> : vector<16xf32>
    %87 = vector.multi_reduction <add>, %86, %cst_34 [1] : vector<16x16xf32> to vector<16xf32>
    %88 = vector.shape_cast %87 : vector<16xf32> to vector<16x1xf32>
    %89 = tpu.reciprocal %88 {approx = true} : vector<16x1xf32> -> vector<16x1xf32>
    %90 = vector.broadcast %89 : vector<16x1xf32> to vector<16x16xf32>
    %91 = arith.mulf %86, %90 : vector<16x16xf32>
    %92 = arith.truncf %91 : vector<16x16xf32> to vector<16x16xbf16>
    %93 = vector.extract_strided_slice %77 {offsets = [0, 0], sizes = [16, 16], strides = [1, 1]} : vector<16x64xbf16> to vector<16x16xbf16>
    %cst_35 = arith.constant dense<0.000000e+00> : vector<16x16xf32>
    %94 = tpu.matmul %92, %93, %cst_35 {dimension_numbers = #tpu.dot_dimension_numbers<[1], [0], [0], [1], [0, 0, 1, 1], [], []>} : vector<16x16xbf16>, vector<16x16xbf16>, vector<16x16xf32> -> vector<16x16xf32>
    %95 = vector.extract_strided_slice %74 {offsets = [0, 16], sizes = [16, 16], strides = [1, 1]} : vector<16x64xbf16> to vector<16x16xbf16>
    %96 = vector.extract_strided_slice %76 {offsets = [16, 0], sizes = [16, 16], strides = [1, 1]} : vector<64x16xbf16> to vector<16x16xbf16>
    %cst_36 = arith.constant dense<0.000000e+00> : vector<16x16xf32>
    %97 = tpu.matmul %95, %96, %cst_36 {dimension_numbers = #tpu.dot_dimension_numbers<[1], [0], [0], [1], [0, 0, 1, 1], [], []>} : vector<16x16xbf16>, vector<16x16xbf16>, vector<16x16xf32> -> vector<16x16xf32>
    %98 = arith.addf %97, %27 : vector<16x16xf32>
    %cst_37 = arith.constant dense<0xFF800000> : vector<16xf32>
    %99 = vector.multi_reduction <maximumf>, %98, %cst_37 [1] : vector<16x16xf32> to vector<16xf32>
    %100 = vector.shape_cast %99 : vector<16xf32> to vector<16x1xf32>
    %101 = vector.broadcast %100 : vector<16x1xf32> to vector<16x16xf32>
    %102 = arith.subf %98, %101 : vector<16x16xf32>
    %103 = math.exp %102 : vector<16x16xf32>
    %cst_38 = arith.constant dense<0.000000e+00> : vector<16xf32>
    %104 = vector.multi_reduction <add>, %103, %cst_38 [1] : vector<16x16xf32> to vector<16xf32>
    %105 = vector.shape_cast %104 : vector<16xf32> to vector<16x1xf32>
    %106 = tpu.reciprocal %105 {approx = true} : vector<16x1xf32> -> vector<16x1xf32>
    %107 = vector.broadcast %106 : vector<16x1xf32> to vector<16x16xf32>
    %108 = arith.mulf %103, %107 : vector<16x16xf32>
    %109 = arith.truncf %108 : vector<16x16xf32> to vector<16x16xbf16>
    %110 = vector.extract_strided_slice %77 {offsets = [0, 16], sizes = [16, 16], strides = [1, 1]} : vector<16x64xbf16> to vector<16x16xbf16>
    %cst_39 = arith.constant dense<0.000000e+00> : vector<16x16xf32>
    %111 = tpu.matmul %109, %110, %cst_39 {dimension_numbers = #tpu.dot_dimension_numbers<[1], [0], [0], [1], [0, 0, 1, 1], [], []>} : vector<16x16xbf16>, vector<16x16xbf16>, vector<16x16xf32> -> vector<16x16xf32>
    %112 = vector.extract_strided_slice %74 {offsets = [0, 32], sizes = [16, 16], strides = [1, 1]} : vector<16x64xbf16> to vector<16x16xbf16>
    %113 = vector.extract_strided_slice %76 {offsets = [32, 0], sizes = [16, 16], strides = [1, 1]} : vector<64x16xbf16> to vector<16x16xbf16>
    %cst_40 = arith.constant dense<0.000000e+00> : vector<16x16xf32>
    %114 = tpu.matmul %112, %113, %cst_40 {dimension_numbers = #tpu.dot_dimension_numbers<[1], [0], [0], [1], [0, 0, 1, 1], [], []>} : vector<16x16xbf16>, vector<16x16xbf16>, vector<16x16xf32> -> vector<16x16xf32>
    %115 = arith.addf %114, %27 : vector<16x16xf32>
    %cst_41 = arith.constant dense<0xFF800000> : vector<16xf32>
    %116 = vector.multi_reduction <maximumf>, %115, %cst_41 [1] : vector<16x16xf32> to vector<16xf32>
    %117 = vector.shape_cast %116 : vector<16xf32> to vector<16x1xf32>
    %118 = vector.broadcast %117 : vector<16x1xf32> to vector<16x16xf32>
    %119 = arith.subf %115, %118 : vector<16x16xf32>
    %120 = math.exp %119 : vector<16x16xf32>
    %cst_42 = arith.constant dense<0.000000e+00> : vector<16xf32>
    %121 = vector.multi_reduction <add>, %120, %cst_42 [1] : vector<16x16xf32> to vector<16xf32>
    %122 = vector.shape_cast %121 : vector<16xf32> to vector<16x1xf32>
    %123 = tpu.reciprocal %122 {approx = true} : vector<16x1xf32> -> vector<16x1xf32>
    %124 = vector.broadcast %123 : vector<16x1xf32> to vector<16x16xf32>
    %125 = arith.mulf %120, %124 : vector<16x16xf32>
    %126 = arith.truncf %125 : vector<16x16xf32> to vector<16x16xbf16>
    %127 = vector.extract_strided_slice %77 {offsets = [0, 32], sizes = [16, 16], strides = [1, 1]} : vector<16x64xbf16> to vector<16x16xbf16>
    %cst_43 = arith.constant dense<0.000000e+00> : vector<16x16xf32>
    %128 = tpu.matmul %126, %127, %cst_43 {dimension_numbers = #tpu.dot_dimension_numbers<[1], [0], [0], [1], [0, 0, 1, 1], [], []>} : vector<16x16xbf16>, vector<16x16xbf16>, vector<16x16xf32> -> vector<16x16xf32>
    %129 = vector.extract_strided_slice %74 {offsets = [0, 48], sizes = [16, 16], strides = [1, 1]} : vector<16x64xbf16> to vector<16x16xbf16>
    %130 = vector.extract_strided_slice %76 {offsets = [48, 0], sizes = [16, 16], strides = [1, 1]} : vector<64x16xbf16> to vector<16x16xbf16>
    %cst_44 = arith.constant dense<0.000000e+00> : vector<16x16xf32>
    %131 = tpu.matmul %129, %130, %cst_44 {dimension_numbers = #tpu.dot_dimension_numbers<[1], [0], [0], [1], [0, 0, 1, 1], [], []>} : vector<16x16xbf16>, vector<16x16xbf16>, vector<16x16xf32> -> vector<16x16xf32>
    %132 = arith.addf %131, %27 : vector<16x16xf32>
    %cst_45 = arith.constant dense<0xFF800000> : vector<16xf32>
    %133 = vector.multi_reduction <maximumf>, %132, %cst_45 [1] : vector<16x16xf32> to vector<16xf32>
    %134 = vector.shape_cast %133 : vector<16xf32> to vector<16x1xf32>
    %135 = vector.broadcast %134 : vector<16x1xf32> to vector<16x16xf32>
    %136 = arith.subf %132, %135 : vector<16x16xf32>
    %137 = math.exp %136 : vector<16x16xf32>
    %cst_46 = arith.constant dense<0.000000e+00> : vector<16xf32>
    %138 = vector.multi_reduction <add>, %137, %cst_46 [1] : vector<16x16xf32> to vector<16xf32>
    %139 = vector.shape_cast %138 : vector<16xf32> to vector<16x1xf32>
    %140 = tpu.reciprocal %139 {approx = true} : vector<16x1xf32> -> vector<16x1xf32>
    %141 = vector.broadcast %140 : vector<16x1xf32> to vector<16x16xf32>
    %142 = arith.mulf %137, %141 : vector<16x16xf32>
    %143 = arith.truncf %142 : vector<16x16xf32> to vector<16x16xbf16>
    %144 = vector.extract_strided_slice %77 {offsets = [0, 48], sizes = [16, 16], strides = [1, 1]} : vector<16x64xbf16> to vector<16x16xbf16>
    %cst_47 = arith.constant dense<0.000000e+00> : vector<16x16xf32>
    %145 = tpu.matmul %143, %144, %cst_47 {dimension_numbers = #tpu.dot_dimension_numbers<[1], [0], [0], [1], [0, 0, 1, 1], [], []>} : vector<16x16xbf16>, vector<16x16xbf16>, vector<16x16xf32> -> vector<16x16xf32>
    %146 = tpu.concatenate %94, %111, %128, %145 in 1 : vector<16x16xf32>, vector<16x16xf32>, vector<16x16xf32>, vector<16x16xf32> -> vector<16x64xf32>
    %147 = arith.truncf %146 : vector<16x64xf32> to vector<16x64xbf16>
    %c0_48 = arith.constant 0 : index
    %c1280 = arith.constant 1280 : index
    %148 = vector.load %arg5[%c0_48, %c1280] : memref<64x2688xbf16, #tpu.memory_space<vmem>>, vector<64x64xbf16>
    %cst_49 = arith.constant dense<0.000000e+00> : vector<16x64xf32>
    %149 = tpu.matmul %147, %148, %cst_49 {dimension_numbers = #tpu.dot_dimension_numbers<[1], [0], [0], [1], [0, 0, 1, 1], [], []>} : vector<16x64xbf16>, vector<64x64xbf16>, vector<16x64xf32> -> vector<16x64xf32>
    %c0_50 = arith.constant 0 : index
    %c1152_51 = arith.constant 1152 : index
    %150 = vector.load %arg7[%c0_50, %c1152_51] : memref<1x2816xf32, #tpu.memory_space<vmem>>, vector<1x64xf32>
    %151 = vector.broadcast %150 : vector<1x64xf32> to vector<16x64xf32>
    %152 = arith.addf %149, %151 : vector<16x64xf32>
    %153 = arith.mulf %152, %28 : vector<16x64xf32>
    %154 = arith.addf %14, %153 : vector<16x64xf32>
    %cst_52 = arith.constant dense<0.000000e+00> : vector<16xf32>
    %155 = vector.multi_reduction <add>, %154, %cst_52 [1] : vector<16x64xf32> to vector<16xf32>
    %156 = vector.shape_cast %155 : vector<16xf32> to vector<16x1xf32>
    %cst_53 = arith.constant 6.400000e+01 : f32
    %157 = vector.broadcast %cst_53 : f32 to vector<16x1xf32>
    %158 = arith.divf %156, %157 : vector<16x1xf32>
    %159 = arith.mulf %154, %154 : vector<16x64xf32>
    %cst_54 = arith.constant dense<0.000000e+00> : vector<16xf32>
    %160 = vector.multi_reduction <add>, %159, %cst_54 [1] : vector<16x64xf32> to vector<16xf32>
    %161 = vector.shape_cast %160 : vector<16xf32> to vector<16x1xf32>
    %cst_55 = arith.constant 6.400000e+01 : f32
    %162 = vector.broadcast %cst_55 : f32 to vector<16x1xf32>
    %163 = arith.divf %161, %162 : vector<16x1xf32>
    %164 = arith.mulf %158, %158 : vector<16x1xf32>
    %165 = arith.subf %163, %164 : vector<16x1xf32>
    %cst_56 = arith.constant 0.000000e+00 : f32
    %166 = vector.broadcast %cst_56 : f32 to vector<16x1xf32>
    %167 = arith.maximumf %165, %166 : vector<16x1xf32>
    %168 = vector.broadcast %158 : vector<16x1xf32> to vector<16x64xf32>
    %169 = arith.subf %154, %168 : vector<16x64xf32>
    %cst_57 = arith.constant 9.99999997E-7 : f32
    %170 = vector.broadcast %cst_57 : f32 to vector<16x1xf32>
    %171 = arith.addf %167, %170 : vector<16x1xf32>
    %172 = math.rsqrt %171 : vector<16x1xf32>
    %173 = vector.broadcast %172 : vector<16x1xf32> to vector<16x64xf32>
    %174 = arith.mulf %169, %173 : vector<16x64xf32>
    %cst_58 = arith.constant 1.000000e+00 : f32
    %175 = vector.broadcast %cst_58 : f32 to vector<16x64xf32>
    %176 = arith.addf %175, %31 : vector<16x64xf32>
    %177 = arith.mulf %174, %176 : vector<16x64xf32>
    %178 = arith.addf %177, %33 : vector<16x64xf32>
    %179 = arith.truncf %178 : vector<16x64xf32> to vector<16x64xbf16>
    %c0_59 = arith.constant 0 : index
    %c1408 = arith.constant 1408 : index
    %180 = vector.load %arg5[%c0_59, %c1408] : memref<64x2688xbf16, #tpu.memory_space<vmem>>, vector<64x256xbf16>
    %cst_60 = arith.constant dense<0.000000e+00> : vector<16x256xf32>
    %181 = tpu.matmul %179, %180, %cst_60 {dimension_numbers = #tpu.dot_dimension_numbers<[1], [0], [0], [1], [0, 0, 1, 1], [], []>} : vector<16x64xbf16>, vector<64x256xbf16>, vector<16x256xf32> -> vector<16x256xf32>
    %c0_61 = arith.constant 0 : index
    %c1280_62 = arith.constant 1280 : index
    %182 = vector.load %arg7[%c0_61, %c1280_62] : memref<1x2816xf32, #tpu.memory_space<vmem>>, vector<1x256xf32>
    %183 = vector.broadcast %182 : vector<1x256xf32> to vector<16x256xf32>
    %184 = arith.addf %181, %183 : vector<16x256xf32>
    %185 = arith.mulf %184, %184 : vector<16x256xf32>
    %186 = arith.mulf %184, %185 : vector<16x256xf32>
    %cst_63 = arith.constant 4.471500e-02 : f32
    %187 = vector.broadcast %cst_63 : f32 to vector<16x256xf32>
    %188 = arith.mulf %187, %186 : vector<16x256xf32>
    %189 = arith.addf %184, %188 : vector<16x256xf32>
    %cst_64 = arith.constant 0.797884583 : f32
    %190 = vector.broadcast %cst_64 : f32 to vector<16x256xf32>
    %191 = arith.mulf %190, %189 : vector<16x256xf32>
    %192 = math.tanh %191 : vector<16x256xf32>
    %cst_65 = arith.constant 1.000000e+00 : f32
    %193 = vector.broadcast %cst_65 : f32 to vector<16x256xf32>
    %194 = arith.addf %193, %192 : vector<16x256xf32>
    %cst_66 = arith.constant 5.000000e-01 : f32
    %195 = vector.broadcast %cst_66 : f32 to vector<16x256xf32>
    %196 = arith.mulf %195, %194 : vector<16x256xf32>
    %197 = arith.mulf %184, %196 : vector<16x256xf32>
    %198 = arith.truncf %197 : vector<16x256xf32> to vector<16x256xbf16>
    %c0_67 = arith.constant 0 : index
    %c0_68 = arith.constant 0 : index
    %199 = vector.load %arg6[%c0_67, %c0_68] : memref<256x256xbf16, #tpu.memory_space<vmem>>, vector<256x64xbf16>
    %cst_69 = arith.constant dense<0.000000e+00> : vector<16x64xf32>
    %200 = tpu.matmul %198, %199, %cst_69 {dimension_numbers = #tpu.dot_dimension_numbers<[1], [0], [0], [1], [0, 0, 1, 1], [], []>} : vector<16x256xbf16>, vector<256x64xbf16>, vector<16x64xf32> -> vector<16x64xf32>
    %c0_70 = arith.constant 0 : index
    %c1536 = arith.constant 1536 : index
    %201 = vector.load %arg7[%c0_70, %c1536] : memref<1x2816xf32, #tpu.memory_space<vmem>>, vector<1x64xf32>
    %202 = vector.broadcast %201 : vector<1x64xf32> to vector<16x64xf32>
    %203 = arith.addf %200, %202 : vector<16x64xf32>
    %204 = arith.mulf %203, %29 : vector<16x64xf32>
    %205 = arith.addf %154, %204 : vector<16x64xf32>
    %206 = vector.extract_strided_slice %26 {offsets = [0, 384], sizes = [16, 64], strides = [1, 1]} : vector<16x768xf32> to vector<16x64xf32>
    %207 = vector.extract_strided_slice %26 {offsets = [0, 448], sizes = [16, 64], strides = [1, 1]} : vector<16x768xf32> to vector<16x64xf32>
    %208 = vector.extract_strided_slice %26 {offsets = [0, 512], sizes = [16, 64], strides = [1, 1]} : vector<16x768xf32> to vector<16x64xf32>
    %209 = vector.extract_strided_slice %26 {offsets = [0, 576], sizes = [16, 64], strides = [1, 1]} : vector<16x768xf32> to vector<16x64xf32>
    %210 = vector.extract_strided_slice %26 {offsets = [0, 640], sizes = [16, 64], strides = [1, 1]} : vector<16x768xf32> to vector<16x64xf32>
    %211 = vector.extract_strided_slice %26 {offsets = [0, 704], sizes = [16, 64], strides = [1, 1]} : vector<16x768xf32> to vector<16x64xf32>
    %cst_71 = arith.constant dense<0.000000e+00> : vector<16xf32>
    %212 = vector.multi_reduction <add>, %205, %cst_71 [1] : vector<16x64xf32> to vector<16xf32>
    %213 = vector.shape_cast %212 : vector<16xf32> to vector<16x1xf32>
    %cst_72 = arith.constant 6.400000e+01 : f32
    %214 = vector.broadcast %cst_72 : f32 to vector<16x1xf32>
    %215 = arith.divf %213, %214 : vector<16x1xf32>
    %216 = arith.mulf %205, %205 : vector<16x64xf32>
    %cst_73 = arith.constant dense<0.000000e+00> : vector<16xf32>
    %217 = vector.multi_reduction <add>, %216, %cst_73 [1] : vector<16x64xf32> to vector<16xf32>
    %218 = vector.shape_cast %217 : vector<16xf32> to vector<16x1xf32>
    %cst_74 = arith.constant 6.400000e+01 : f32
    %219 = vector.broadcast %cst_74 : f32 to vector<16x1xf32>
    %220 = arith.divf %218, %219 : vector<16x1xf32>
    %221 = arith.mulf %215, %215 : vector<16x1xf32>
    %222 = arith.subf %220, %221 : vector<16x1xf32>
    %cst_75 = arith.constant 0.000000e+00 : f32
    %223 = vector.broadcast %cst_75 : f32 to vector<16x1xf32>
    %224 = arith.maximumf %222, %223 : vector<16x1xf32>
    %225 = vector.broadcast %215 : vector<16x1xf32> to vector<16x64xf32>
    %226 = arith.subf %205, %225 : vector<16x64xf32>
    %cst_76 = arith.constant 9.99999997E-7 : f32
    %227 = vector.broadcast %cst_76 : f32 to vector<16x1xf32>
    %228 = arith.addf %224, %227 : vector<16x1xf32>
    %229 = math.rsqrt %228 : vector<16x1xf32>
    %230 = vector.broadcast %229 : vector<16x1xf32> to vector<16x64xf32>
    %231 = arith.mulf %226, %230 : vector<16x64xf32>
    %cst_77 = arith.constant 1.000000e+00 : f32
    %232 = vector.broadcast %cst_77 : f32 to vector<16x64xf32>
    %233 = arith.addf %232, %208 : vector<16x64xf32>
    %234 = arith.mulf %231, %233 : vector<16x64xf32>
    %235 = arith.addf %234, %210 : vector<16x64xf32>
    %236 = arith.truncf %235 : vector<16x64xf32> to vector<16x64xbf16>
    %c0_78 = arith.constant 0 : index
    %c1664 = arith.constant 1664 : index
    %237 = vector.load %arg5[%c0_78, %c1664] : memref<64x2688xbf16, #tpu.memory_space<vmem>>, vector<64x64xbf16>
    %cst_79 = arith.constant dense<0.000000e+00> : vector<16x64xf32>
    %238 = tpu.matmul %236, %237, %cst_79 {dimension_numbers = #tpu.dot_dimension_numbers<[1], [0], [0], [1], [0, 0, 1, 1], [], []>} : vector<16x64xbf16>, vector<64x64xbf16>, vector<16x64xf32> -> vector<16x64xf32>
    %c0_80 = arith.constant 0 : index
    %c1664_81 = arith.constant 1664 : index
    %239 = vector.load %arg7[%c0_80, %c1664_81] : memref<1x2816xf32, #tpu.memory_space<vmem>>, vector<1x64xf32>
    %240 = vector.broadcast %239 : vector<1x64xf32> to vector<16x64xf32>
    %241 = arith.addf %238, %240 : vector<16x64xf32>
    %c0_82 = arith.constant 0 : index
    %c1792 = arith.constant 1792 : index
    %242 = vector.load %arg5[%c0_82, %c1792] : memref<64x2688xbf16, #tpu.memory_space<vmem>>, vector<64x64xbf16>
    %cst_83 = arith.constant dense<0.000000e+00> : vector<16x64xf32>
    %243 = tpu.matmul %236, %242, %cst_83 {dimension_numbers = #tpu.dot_dimension_numbers<[1], [0], [0], [1], [0, 0, 1, 1], [], []>} : vector<16x64xbf16>, vector<64x64xbf16>, vector<16x64xf32> -> vector<16x64xf32>
    %c0_84 = arith.constant 0 : index
    %c1792_85 = arith.constant 1792 : index
    %244 = vector.load %arg7[%c0_84, %c1792_85] : memref<1x2816xf32, #tpu.memory_space<vmem>>, vector<1x64xf32>
    %245 = vector.broadcast %244 : vector<1x64xf32> to vector<16x64xf32>
    %246 = arith.addf %243, %245 : vector<16x64xf32>
    %c0_86 = arith.constant 0 : index
    %c1920 = arith.constant 1920 : index
    %247 = vector.load %arg5[%c0_86, %c1920] : memref<64x2688xbf16, #tpu.memory_space<vmem>>, vector<64x64xbf16>
    %cst_87 = arith.constant dense<0.000000e+00> : vector<16x64xf32>
    %248 = tpu.matmul %236, %247, %cst_87 {dimension_numbers = #tpu.dot_dimension_numbers<[1], [0], [0], [1], [0, 0, 1, 1], [], []>} : vector<16x64xbf16>, vector<64x64xbf16>, vector<16x64xf32> -> vector<16x64xf32>
    %c0_88 = arith.constant 0 : index
    %c1920_89 = arith.constant 1920 : index
    %249 = vector.load %arg7[%c0_88, %c1920_89] : memref<1x2816xf32, #tpu.memory_space<vmem>>, vector<1x64xf32>
    %250 = vector.broadcast %249 : vector<1x64xf32> to vector<16x64xf32>
    %251 = arith.addf %248, %250 : vector<16x64xf32>
    %252 = arith.truncf %241 : vector<16x64xf32> to vector<16x64xbf16>
    %253 = tpu.transpose %246, [1, 0] : vector<16x64xf32> -> vector<64x16xf32>
    %254 = arith.truncf %253 : vector<64x16xf32> to vector<64x16xbf16>
    %255 = arith.truncf %251 : vector<16x64xf32> to vector<16x64xbf16>
    %256 = vector.extract_strided_slice %252 {offsets = [0, 0], sizes = [16, 16], strides = [1, 1]} : vector<16x64xbf16> to vector<16x16xbf16>
    %257 = vector.extract_strided_slice %254 {offsets = [0, 0], sizes = [16, 16], strides = [1, 1]} : vector<64x16xbf16> to vector<16x16xbf16>
    %cst_90 = arith.constant dense<0.000000e+00> : vector<16x16xf32>
    %258 = tpu.matmul %256, %257, %cst_90 {dimension_numbers = #tpu.dot_dimension_numbers<[1], [0], [0], [1], [0, 0, 1, 1], [], []>} : vector<16x16xbf16>, vector<16x16xbf16>, vector<16x16xf32> -> vector<16x16xf32>
    %259 = arith.addf %258, %27 : vector<16x16xf32>
    %cst_91 = arith.constant dense<0xFF800000> : vector<16xf32>
    %260 = vector.multi_reduction <maximumf>, %259, %cst_91 [1] : vector<16x16xf32> to vector<16xf32>
    %261 = vector.shape_cast %260 : vector<16xf32> to vector<16x1xf32>
    %262 = vector.broadcast %261 : vector<16x1xf32> to vector<16x16xf32>
    %263 = arith.subf %259, %262 : vector<16x16xf32>
    %264 = math.exp %263 : vector<16x16xf32>
    %cst_92 = arith.constant dense<0.000000e+00> : vector<16xf32>
    %265 = vector.multi_reduction <add>, %264, %cst_92 [1] : vector<16x16xf32> to vector<16xf32>
    %266 = vector.shape_cast %265 : vector<16xf32> to vector<16x1xf32>
    %267 = tpu.reciprocal %266 {approx = true} : vector<16x1xf32> -> vector<16x1xf32>
    %268 = vector.broadcast %267 : vector<16x1xf32> to vector<16x16xf32>
    %269 = arith.mulf %264, %268 : vector<16x16xf32>
    %270 = arith.truncf %269 : vector<16x16xf32> to vector<16x16xbf16>
    %271 = vector.extract_strided_slice %255 {offsets = [0, 0], sizes = [16, 16], strides = [1, 1]} : vector<16x64xbf16> to vector<16x16xbf16>
    %cst_93 = arith.constant dense<0.000000e+00> : vector<16x16xf32>
    %272 = tpu.matmul %270, %271, %cst_93 {dimension_numbers = #tpu.dot_dimension_numbers<[1], [0], [0], [1], [0, 0, 1, 1], [], []>} : vector<16x16xbf16>, vector<16x16xbf16>, vector<16x16xf32> -> vector<16x16xf32>
    %273 = vector.extract_strided_slice %252 {offsets = [0, 16], sizes = [16, 16], strides = [1, 1]} : vector<16x64xbf16> to vector<16x16xbf16>
    %274 = vector.extract_strided_slice %254 {offsets = [16, 0], sizes = [16, 16], strides = [1, 1]} : vector<64x16xbf16> to vector<16x16xbf16>
    %cst_94 = arith.constant dense<0.000000e+00> : vector<16x16xf32>
    %275 = tpu.matmul %273, %274, %cst_94 {dimension_numbers = #tpu.dot_dimension_numbers<[1], [0], [0], [1], [0, 0, 1, 1], [], []>} : vector<16x16xbf16>, vector<16x16xbf16>, vector<16x16xf32> -> vector<16x16xf32>
    %276 = arith.addf %275, %27 : vector<16x16xf32>
    %cst_95 = arith.constant dense<0xFF800000> : vector<16xf32>
    %277 = vector.multi_reduction <maximumf>, %276, %cst_95 [1] : vector<16x16xf32> to vector<16xf32>
    %278 = vector.shape_cast %277 : vector<16xf32> to vector<16x1xf32>
    %279 = vector.broadcast %278 : vector<16x1xf32> to vector<16x16xf32>
    %280 = arith.subf %276, %279 : vector<16x16xf32>
    %281 = math.exp %280 : vector<16x16xf32>
    %cst_96 = arith.constant dense<0.000000e+00> : vector<16xf32>
    %282 = vector.multi_reduction <add>, %281, %cst_96 [1] : vector<16x16xf32> to vector<16xf32>
    %283 = vector.shape_cast %282 : vector<16xf32> to vector<16x1xf32>
    %284 = tpu.reciprocal %283 {approx = true} : vector<16x1xf32> -> vector<16x1xf32>
    %285 = vector.broadcast %284 : vector<16x1xf32> to vector<16x16xf32>
    %286 = arith.mulf %281, %285 : vector<16x16xf32>
    %287 = arith.truncf %286 : vector<16x16xf32> to vector<16x16xbf16>
    %288 = vector.extract_strided_slice %255 {offsets = [0, 16], sizes = [16, 16], strides = [1, 1]} : vector<16x64xbf16> to vector<16x16xbf16>
    %cst_97 = arith.constant dense<0.000000e+00> : vector<16x16xf32>
    %289 = tpu.matmul %287, %288, %cst_97 {dimension_numbers = #tpu.dot_dimension_numbers<[1], [0], [0], [1], [0, 0, 1, 1], [], []>} : vector<16x16xbf16>, vector<16x16xbf16>, vector<16x16xf32> -> vector<16x16xf32>
    %290 = vector.extract_strided_slice %252 {offsets = [0, 32], sizes = [16, 16], strides = [1, 1]} : vector<16x64xbf16> to vector<16x16xbf16>
    %291 = vector.extract_strided_slice %254 {offsets = [32, 0], sizes = [16, 16], strides = [1, 1]} : vector<64x16xbf16> to vector<16x16xbf16>
    %cst_98 = arith.constant dense<0.000000e+00> : vector<16x16xf32>
    %292 = tpu.matmul %290, %291, %cst_98 {dimension_numbers = #tpu.dot_dimension_numbers<[1], [0], [0], [1], [0, 0, 1, 1], [], []>} : vector<16x16xbf16>, vector<16x16xbf16>, vector<16x16xf32> -> vector<16x16xf32>
    %293 = arith.addf %292, %27 : vector<16x16xf32>
    %cst_99 = arith.constant dense<0xFF800000> : vector<16xf32>
    %294 = vector.multi_reduction <maximumf>, %293, %cst_99 [1] : vector<16x16xf32> to vector<16xf32>
    %295 = vector.shape_cast %294 : vector<16xf32> to vector<16x1xf32>
    %296 = vector.broadcast %295 : vector<16x1xf32> to vector<16x16xf32>
    %297 = arith.subf %293, %296 : vector<16x16xf32>
    %298 = math.exp %297 : vector<16x16xf32>
    %cst_100 = arith.constant dense<0.000000e+00> : vector<16xf32>
    %299 = vector.multi_reduction <add>, %298, %cst_100 [1] : vector<16x16xf32> to vector<16xf32>
    %300 = vector.shape_cast %299 : vector<16xf32> to vector<16x1xf32>
    %301 = tpu.reciprocal %300 {approx = true} : vector<16x1xf32> -> vector<16x1xf32>
    %302 = vector.broadcast %301 : vector<16x1xf32> to vector<16x16xf32>
    %303 = arith.mulf %298, %302 : vector<16x16xf32>
    %304 = arith.truncf %303 : vector<16x16xf32> to vector<16x16xbf16>
    %305 = vector.extract_strided_slice %255 {offsets = [0, 32], sizes = [16, 16], strides = [1, 1]} : vector<16x64xbf16> to vector<16x16xbf16>
    %cst_101 = arith.constant dense<0.000000e+00> : vector<16x16xf32>
    %306 = tpu.matmul %304, %305, %cst_101 {dimension_numbers = #tpu.dot_dimension_numbers<[1], [0], [0], [1], [0, 0, 1, 1], [], []>} : vector<16x16xbf16>, vector<16x16xbf16>, vector<16x16xf32> -> vector<16x16xf32>
    %307 = vector.extract_strided_slice %252 {offsets = [0, 48], sizes = [16, 16], strides = [1, 1]} : vector<16x64xbf16> to vector<16x16xbf16>
    %308 = vector.extract_strided_slice %254 {offsets = [48, 0], sizes = [16, 16], strides = [1, 1]} : vector<64x16xbf16> to vector<16x16xbf16>
    %cst_102 = arith.constant dense<0.000000e+00> : vector<16x16xf32>
    %309 = tpu.matmul %307, %308, %cst_102 {dimension_numbers = #tpu.dot_dimension_numbers<[1], [0], [0], [1], [0, 0, 1, 1], [], []>} : vector<16x16xbf16>, vector<16x16xbf16>, vector<16x16xf32> -> vector<16x16xf32>
    %310 = arith.addf %309, %27 : vector<16x16xf32>
    %cst_103 = arith.constant dense<0xFF800000> : vector<16xf32>
    %311 = vector.multi_reduction <maximumf>, %310, %cst_103 [1] : vector<16x16xf32> to vector<16xf32>
    %312 = vector.shape_cast %311 : vector<16xf32> to vector<16x1xf32>
    %313 = vector.broadcast %312 : vector<16x1xf32> to vector<16x16xf32>
    %314 = arith.subf %310, %313 : vector<16x16xf32>
    %315 = math.exp %314 : vector<16x16xf32>
    %cst_104 = arith.constant dense<0.000000e+00> : vector<16xf32>
    %316 = vector.multi_reduction <add>, %315, %cst_104 [1] : vector<16x16xf32> to vector<16xf32>
    %317 = vector.shape_cast %316 : vector<16xf32> to vector<16x1xf32>
    %318 = tpu.reciprocal %317 {approx = true} : vector<16x1xf32> -> vector<16x1xf32>
    %319 = vector.broadcast %318 : vector<16x1xf32> to vector<16x16xf32>
    %320 = arith.mulf %315, %319 : vector<16x16xf32>
    %321 = arith.truncf %320 : vector<16x16xf32> to vector<16x16xbf16>
    %322 = vector.extract_strided_slice %255 {offsets = [0, 48], sizes = [16, 16], strides = [1, 1]} : vector<16x64xbf16> to vector<16x16xbf16>
    %cst_105 = arith.constant dense<0.000000e+00> : vector<16x16xf32>
    %323 = tpu.matmul %321, %322, %cst_105 {dimension_numbers = #tpu.dot_dimension_numbers<[1], [0], [0], [1], [0, 0, 1, 1], [], []>} : vector<16x16xbf16>, vector<16x16xbf16>, vector<16x16xf32> -> vector<16x16xf32>
    %324 = tpu.concatenate %272, %289, %306, %323 in 1 : vector<16x16xf32>, vector<16x16xf32>, vector<16x16xf32>, vector<16x16xf32> -> vector<16x64xf32>
    %325 = arith.truncf %324 : vector<16x64xf32> to vector<16x64xbf16>
    %c0_106 = arith.constant 0 : index
    %c2048 = arith.constant 2048 : index
    %326 = vector.load %arg5[%c0_106, %c2048] : memref<64x2688xbf16, #tpu.memory_space<vmem>>, vector<64x64xbf16>
    %cst_107 = arith.constant dense<0.000000e+00> : vector<16x64xf32>
    %327 = tpu.matmul %325, %326, %cst_107 {dimension_numbers = #tpu.dot_dimension_numbers<[1], [0], [0], [1], [0, 0, 1, 1], [], []>} : vector<16x64xbf16>, vector<64x64xbf16>, vector<16x64xf32> -> vector<16x64xf32>
    %c0_108 = arith.constant 0 : index
    %c2048_109 = arith.constant 2048 : index
    %328 = vector.load %arg7[%c0_108, %c2048_109] : memref<1x2816xf32, #tpu.memory_space<vmem>>, vector<1x64xf32>
    %329 = vector.broadcast %328 : vector<1x64xf32> to vector<16x64xf32>
    %330 = arith.addf %327, %329 : vector<16x64xf32>
    %331 = arith.mulf %330, %206 : vector<16x64xf32>
    %332 = arith.addf %205, %331 : vector<16x64xf32>
    %cst_110 = arith.constant dense<0.000000e+00> : vector<16xf32>
    %333 = vector.multi_reduction <add>, %332, %cst_110 [1] : vector<16x64xf32> to vector<16xf32>
    %334 = vector.shape_cast %333 : vector<16xf32> to vector<16x1xf32>
    %cst_111 = arith.constant 6.400000e+01 : f32
    %335 = vector.broadcast %cst_111 : f32 to vector<16x1xf32>
    %336 = arith.divf %334, %335 : vector<16x1xf32>
    %337 = arith.mulf %332, %332 : vector<16x64xf32>
    %cst_112 = arith.constant dense<0.000000e+00> : vector<16xf32>
    %338 = vector.multi_reduction <add>, %337, %cst_112 [1] : vector<16x64xf32> to vector<16xf32>
    %339 = vector.shape_cast %338 : vector<16xf32> to vector<16x1xf32>
    %cst_113 = arith.constant 6.400000e+01 : f32
    %340 = vector.broadcast %cst_113 : f32 to vector<16x1xf32>
    %341 = arith.divf %339, %340 : vector<16x1xf32>
    %342 = arith.mulf %336, %336 : vector<16x1xf32>
    %343 = arith.subf %341, %342 : vector<16x1xf32>
    %cst_114 = arith.constant 0.000000e+00 : f32
    %344 = vector.broadcast %cst_114 : f32 to vector<16x1xf32>
    %345 = arith.maximumf %343, %344 : vector<16x1xf32>
    %346 = vector.broadcast %336 : vector<16x1xf32> to vector<16x64xf32>
    %347 = arith.subf %332, %346 : vector<16x64xf32>
    %cst_115 = arith.constant 9.99999997E-7 : f32
    %348 = vector.broadcast %cst_115 : f32 to vector<16x1xf32>
    %349 = arith.addf %345, %348 : vector<16x1xf32>
    %350 = math.rsqrt %349 : vector<16x1xf32>
    %351 = vector.broadcast %350 : vector<16x1xf32> to vector<16x64xf32>
    %352 = arith.mulf %347, %351 : vector<16x64xf32>
    %cst_116 = arith.constant 1.000000e+00 : f32
    %353 = vector.broadcast %cst_116 : f32 to vector<16x64xf32>
    %354 = arith.addf %353, %209 : vector<16x64xf32>
    %355 = arith.mulf %352, %354 : vector<16x64xf32>
    %356 = arith.addf %355, %211 : vector<16x64xf32>
    %357 = arith.truncf %356 : vector<16x64xf32> to vector<16x64xbf16>
    %c0_117 = arith.constant 0 : index
    %c2176 = arith.constant 2176 : index
    %358 = vector.load %arg5[%c0_117, %c2176] : memref<64x2688xbf16, #tpu.memory_space<vmem>>, vector<64x256xbf16>
    %cst_118 = arith.constant dense<0.000000e+00> : vector<16x256xf32>
    %359 = tpu.matmul %357, %358, %cst_118 {dimension_numbers = #tpu.dot_dimension_numbers<[1], [0], [0], [1], [0, 0, 1, 1], [], []>} : vector<16x64xbf16>, vector<64x256xbf16>, vector<16x256xf32> -> vector<16x256xf32>
    %c0_119 = arith.constant 0 : index
    %c2176_120 = arith.constant 2176 : index
    %360 = vector.load %arg7[%c0_119, %c2176_120] : memref<1x2816xf32, #tpu.memory_space<vmem>>, vector<1x256xf32>
    %361 = vector.broadcast %360 : vector<1x256xf32> to vector<16x256xf32>
    %362 = arith.addf %359, %361 : vector<16x256xf32>
    %363 = arith.mulf %362, %362 : vector<16x256xf32>
    %364 = arith.mulf %362, %363 : vector<16x256xf32>
    %cst_121 = arith.constant 4.471500e-02 : f32
    %365 = vector.broadcast %cst_121 : f32 to vector<16x256xf32>
    %366 = arith.mulf %365, %364 : vector<16x256xf32>
    %367 = arith.addf %362, %366 : vector<16x256xf32>
    %cst_122 = arith.constant 0.797884583 : f32
    %368 = vector.broadcast %cst_122 : f32 to vector<16x256xf32>
    %369 = arith.mulf %368, %367 : vector<16x256xf32>
    %370 = math.tanh %369 : vector<16x256xf32>
    %cst_123 = arith.constant 1.000000e+00 : f32
    %371 = vector.broadcast %cst_123 : f32 to vector<16x256xf32>
    %372 = arith.addf %371, %370 : vector<16x256xf32>
    %cst_124 = arith.constant 5.000000e-01 : f32
    %373 = vector.broadcast %cst_124 : f32 to vector<16x256xf32>
    %374 = arith.mulf %373, %372 : vector<16x256xf32>
    %375 = arith.mulf %362, %374 : vector<16x256xf32>
    %376 = arith.truncf %375 : vector<16x256xf32> to vector<16x256xbf16>
    %c0_125 = arith.constant 0 : index
    %c128_126 = arith.constant 128 : index
    %377 = vector.load %arg6[%c0_125, %c128_126] : memref<256x256xbf16, #tpu.memory_space<vmem>>, vector<256x64xbf16>
    %cst_127 = arith.constant dense<0.000000e+00> : vector<16x64xf32>
    %378 = tpu.matmul %376, %377, %cst_127 {dimension_numbers = #tpu.dot_dimension_numbers<[1], [0], [0], [1], [0, 0, 1, 1], [], []>} : vector<16x256xbf16>, vector<256x64xbf16>, vector<16x64xf32> -> vector<16x64xf32>
    %c0_128 = arith.constant 0 : index
    %c2432 = arith.constant 2432 : index
    %379 = vector.load %arg7[%c0_128, %c2432] : memref<1x2816xf32, #tpu.memory_space<vmem>>, vector<1x64xf32>
    %380 = vector.broadcast %379 : vector<1x64xf32> to vector<16x64xf32>
    %381 = arith.addf %378, %380 : vector<16x64xf32>
    %382 = arith.mulf %381, %207 : vector<16x64xf32>
    %383 = arith.addf %332, %382 : vector<16x64xf32>
    %c0_129 = arith.constant 0 : index
    %c2432_130 = arith.constant 2432 : index
    %384 = vector.load %arg5[%c0_129, %c2432_130] : memref<64x2688xbf16, #tpu.memory_space<vmem>>, vector<64x128xbf16>
    %cst_131 = arith.constant dense<0.000000e+00> : vector<16x128xf32>
    %385 = tpu.matmul %21, %384, %cst_131 {dimension_numbers = #tpu.dot_dimension_numbers<[1], [0], [0], [1], [0, 0, 1, 1], [], []>} : vector<16x64xbf16>, vector<64x128xbf16>, vector<16x128xf32> -> vector<16x128xf32>
    %c0_132 = arith.constant 0 : index
    %c2560 = arith.constant 2560 : index
    %386 = vector.load %arg7[%c0_132, %c2560] : memref<1x2816xf32, #tpu.memory_space<vmem>>, vector<1x128xf32>
    %387 = vector.broadcast %386 : vector<1x128xf32> to vector<16x128xf32>
    %388 = arith.addf %385, %387 : vector<16x128xf32>
    %389 = vector.extract_strided_slice %388 {offsets = [0, 0], sizes = [16, 64], strides = [1, 1]} : vector<16x128xf32> to vector<16x64xf32>
    %390 = vector.extract_strided_slice %388 {offsets = [0, 64], sizes = [16, 64], strides = [1, 1]} : vector<16x128xf32> to vector<16x64xf32>
    %cst_133 = arith.constant dense<0.000000e+00> : vector<16xf32>
    %391 = vector.multi_reduction <add>, %383, %cst_133 [1] : vector<16x64xf32> to vector<16xf32>
    %392 = vector.shape_cast %391 : vector<16xf32> to vector<16x1xf32>
    %cst_134 = arith.constant 6.400000e+01 : f32
    %393 = vector.broadcast %cst_134 : f32 to vector<16x1xf32>
    %394 = arith.divf %392, %393 : vector<16x1xf32>
    %395 = arith.mulf %383, %383 : vector<16x64xf32>
    %cst_135 = arith.constant dense<0.000000e+00> : vector<16xf32>
    %396 = vector.multi_reduction <add>, %395, %cst_135 [1] : vector<16x64xf32> to vector<16xf32>
    %397 = vector.shape_cast %396 : vector<16xf32> to vector<16x1xf32>
    %cst_136 = arith.constant 6.400000e+01 : f32
    %398 = vector.broadcast %cst_136 : f32 to vector<16x1xf32>
    %399 = arith.divf %397, %398 : vector<16x1xf32>
    %400 = arith.mulf %394, %394 : vector<16x1xf32>
    %401 = arith.subf %399, %400 : vector<16x1xf32>
    %cst_137 = arith.constant 0.000000e+00 : f32
    %402 = vector.broadcast %cst_137 : f32 to vector<16x1xf32>
    %403 = arith.maximumf %401, %402 : vector<16x1xf32>
    %404 = vector.broadcast %394 : vector<16x1xf32> to vector<16x64xf32>
    %405 = arith.subf %383, %404 : vector<16x64xf32>
    %cst_138 = arith.constant 9.99999997E-7 : f32
    %406 = vector.broadcast %cst_138 : f32 to vector<16x1xf32>
    %407 = arith.addf %403, %406 : vector<16x1xf32>
    %408 = math.rsqrt %407 : vector<16x1xf32>
    %409 = vector.broadcast %408 : vector<16x1xf32> to vector<16x64xf32>
    %410 = arith.mulf %405, %409 : vector<16x64xf32>
    %cst_139 = arith.constant 1.000000e+00 : f32
    %411 = vector.broadcast %cst_139 : f32 to vector<16x64xf32>
    %412 = arith.addf %411, %389 : vector<16x64xf32>
    %413 = arith.mulf %410, %412 : vector<16x64xf32>
    %414 = arith.addf %413, %390 : vector<16x64xf32>
    %415 = arith.truncf %414 : vector<16x64xf32> to vector<16x64xbf16>
    %c0_140 = arith.constant 0 : index
    %c2560_141 = arith.constant 2560 : index
    %416 = vector.load %arg5[%c0_140, %c2560_141] : memref<64x2688xbf16, #tpu.memory_space<vmem>>, vector<64x128xbf16>
    %cst_142 = arith.constant dense<0.000000e+00> : vector<16x128xf32>
    %417 = tpu.matmul %415, %416, %cst_142 {dimension_numbers = #tpu.dot_dimension_numbers<[1], [0], [0], [1], [0, 0, 1, 1], [], []>} : vector<16x64xbf16>, vector<64x128xbf16>, vector<16x128xf32> -> vector<16x128xf32>
    %c0_143 = arith.constant 0 : index
    %c2688 = arith.constant 2688 : index
    %418 = vector.load %arg7[%c0_143, %c2688] : memref<1x2816xf32, #tpu.memory_space<vmem>>, vector<1x128xf32>
    %419 = vector.broadcast %418 : vector<1x128xf32> to vector<16x128xf32>
    %420 = arith.addf %417, %419 : vector<16x128xf32>
    %c0_144 = arith.constant 0 : index
    %c0_145 = arith.constant 0 : index
    %421 = vector.load %arg8[%c0_144, %c0_145] : memref<16x128xf32, #tpu.memory_space<vmem>>, vector<16x128xf32>
    tpu.vector_store %arg8[%c0_144, %c0_145], %420 {strides = array<i32>} : memref<16x128xf32, #tpu.memory_space<vmem>>, vector<16x128xf32>,
    return
  }
  func.func @transform_0(%arg0: i32) -> (i32, i32) {
    %c0_i32 = arith.constant 0 : i32
    %c0_i32_0 = arith.constant 0 : i32
    return %arg0, %c0_i32 : i32, i32
  }
  func.func @transform_1(%arg0: i32) -> (i32, i32) {
    %c0_i32 = arith.constant 0 : i32
    %c0_i32_0 = arith.constant 0 : i32
    return %arg0, %c0_i32 : i32, i32
  }
  func.func @transform_2(%arg0: i32) -> (i32, i32) {
    %c0_i32 = arith.constant 0 : i32
    %c0_i32_0 = arith.constant 0 : i32
    %c0_i32_1 = arith.constant 0 : i32
    return %c0_i32, %c0_i32_0 : i32, i32
  }
  func.func @transform_3(%arg0: i32) -> (i32, i32) {
    %c0_i32 = arith.constant 0 : i32
    %c0_i32_0 = arith.constant 0 : i32
    %c0_i32_1 = arith.constant 0 : i32
    return %c0_i32, %c0_i32_0 : i32, i32
  }
  func.func @transform_4(%arg0: i32) -> (i32, i32) {
    %c0_i32 = arith.constant 0 : i32
    %c0_i32_0 = arith.constant 0 : i32
    %c0_i32_1 = arith.constant 0 : i32
    return %c0_i32, %c0_i32_0 : i32, i32
  }
  func.func @transform_5(%arg0: i32) -> (i32, i32) {
    %c0_i32 = arith.constant 0 : i32
    %c0_i32_0 = arith.constant 0 : i32
    %c0_i32_1 = arith.constant 0 : i32
    return %c0_i32, %c0_i32_0 : i32, i32
  }
  func.func @transform_6(%arg0: i32) -> (i32, i32) {
    %c0_i32 = arith.constant 0 : i32
    %c0_i32_0 = arith.constant 0 : i32
    %c0_i32_1 = arith.constant 0 : i32
    return %c0_i32, %c0_i32_0 : i32, i32
  }
  func.func @transform_7(%arg0: i32) -> (i32, i32) {
    %c0_i32 = arith.constant 0 : i32
    %c0_i32_0 = arith.constant 0 : i32
    return %arg0, %c0_i32 : i32, i32
  }
}

</mosaic_0001>

<bundles_post_ra>
// kernel: flexvar_forward.1
= control target key start
LH: loop header
LB: loop body
LE: loop exit
PB: predicated region body
PF: predicated region fallthrough
CT: control target
= control target key end

     0   :  { %12 = vsyncpa [#allocation3], 0  ;;  %s5160_s0 = inlined_call_operand.vmem [shape: f32[32,64], index: 0, kind: input, shape index: {}]   ;;  %s5161_s1 = inlined_call_operand.vmem [shape: f32[32,64], index: 1, kind: input, shape index: {}]   ;;  %s5162_s2 = inlined_call_operand.vmem [shape: f32[16,64], index: 2, kind: input, shape index: {}]   ;;  %s5163_s3 = inlined_call_operand.vmem [shape: f32[16,16], index: 3, kind: input, shape index: {}]   ;;  %s5164_s4 = inlined_call_operand.hbm [shape: bf16[64,2688], index: 4, kind: input, shape index: {}]   ;;  %s5165_s5 = inlined_call_operand.hbm [shape: bf16[256,256], index: 5, kind: input, shape index: {}]   ;;  %s5166_s6 = inlined_call_operand.vmem [shape: f32[1,2816], index: 6, kind: input, shape index: {}]   ;;  %s5167_s7 = inlined_call_operand.vmem [shape: f32[32,128], index: 7, kind: output, shape index: {}]  }
   0x1   :  { %13 = vsyncpa [#allocation5], 0  ;;  %s4615_s24 = smov 0  }
   0x2 LB: > { %s4559_s25 = smov [#allocation2]   ;;  %s3633_s27 = sadd.s32 4294967295, %s4557_s24   ;;  %s4557_s24 = sphi %s4615_s24, %s19_s24  }
   0x3   : > { %s225_s26 = sshll.u32 %s4559_s25, 4  ;;  %p3635_p0 = scmp.ge.s32.totalorder %s4557_s24, 1  ;;  %s226_s26 = int_to_ptr.vmem [resolvable:$true] %s225_s26 }
   0x4   : > { %p207_p1 = scmp.lt.s32.totalorder %s4557_s24, 3  ;;  %p4629_p3 = scmp.eq.s32.totalorder %s3633_s27, 0 }
   0x5   : > { %s4560_s30 = smov [#allocation4]   ;;  %s4502_s10 = scalar_lea.vmem %s226_s26, 10752 }
   0x6   : > { %p4623_p2 = pnand %p3635_p0, %p207_p1  ;;  %s238_s8 = sshll.u32 %s4560_s30, 4  ;;  %s239_s8 = int_to_ptr.vmem [resolvable:$true] %s238_s8 }
   0x7   : > { %p4503_p7 = scmp.ne.s32.totalorder %s226_s26, %s4502_s10  ;;  %p4510_p10 = scmp.lt.s32.totalorder %s226_s26, %s226_s26 }
   0x8   : > { %p4179_p4 = pneg %p4623_p2  ;;  %p4511_p11 = scmp.lt.s32.totalorder %s4502_s10, %s4502_s10 }
   0xa   : > { %p4637_p5 = pnand %p4629_p3, %p4179_p4  ;;  %p4512_p12 = por %p4511_p11, %p4510_p10 }
   0xc   : > { %p4493_p6 = pneg %p4637_p5 }
   0xe   : > { %p4505_p8 = pnand %p4503_p7, %p4493_p6 }
  0x10   : > { %p4506_p9 = pneg %p4505_p8 }
  0x12   : > { %p4513_p13 = pnand %p4512_p12, %p4506_p9 }
  0x14   : > { %4516 = shalt.err (!%p4513_p13)
}
  0x15   : > { %s4561_s11 = smov 1344   ;;  %s4562_s12 = smov 84  }
  0x16   : > { %4182 = dma.hbm_to_vmem [thread:$0]  (!%p4637_p5), %s5164_s4, 10752, %s226_s26, [#allocation3], %s4561_s11, %s4561_s11, %s4562_s12  }
  0x17   : > { %s4528_s15 = scalar_lea.vmem %s239_s8, 4096  ;;  %p4536_p7 = scmp.lt.s32.totalorder %s239_s8, %s239_s8 }
  0x18   : > { %p4529_p0 = scmp.ne.s32.totalorder %s239_s8, %s4528_s15  ;;  %p4537_p8 = scmp.lt.s32.totalorder %s4528_s15, %s4528_s15 }
  0x1a   : > { %p4531_p1 = pnand %p4529_p0, %p4493_p6  ;;  %p4538_p10 = por %p4537_p8, %p4536_p7 }
  0x1c   : > { %p4532_p4 = pneg %p4531_p1 }
  0x1e   : > { %p4539_p9 = pnand %p4538_p10, %p4532_p4 }
  0x20   : > { %4542 = shalt.err (!%p4539_p9)
}
  0x21   : > { %s4563_s16 = smov 128   ;;  %s4564_s17 = smov 8  }
  0x22   : > { %4185 = dma.hbm_to_vmem [thread:$0]  (!%p4637_p5), %s5165_s5, 4096, %s239_s8, [#allocation5], %s4563_s16, %s4563_s16, %s4564_s17  }
  0x23   : > { %275 = sbr.rel (%p4623_p2) target bundleno = 5079 (0x13d7), region = 48 }
  0x28   : > { %4548 = dma.done.wait (%p4629_p3), [#allocation3], 10752  }
  0x29   : > { %4550 = vsyncadd (%p4629_p3), [#allocation3], 4294956544 }
  0x2a   : > { %4552 = dma.done.wait (%p4629_p3), [#allocation5], 4096  }
  0x2b   : > { %4554 = vsyncadd (%p4629_p3), [#allocation5], 4294963200  ;;  %s3642_s20 = sshll.u32 %s3633_s27, 1  ;;  %v4565_v0 = vmov 0.0   ;;  %vm4566_vm0 = vmmov 0   ;;  %v4567_v1 = vmov 0   ;;  %v417_v38 = vlaneseq }
  0x2c   : > { %3943 = vmatprep.subr.bf16.mxu0 %v4565_v0  ;;  %3951 = vmatprep.mubr.msk.bf16.mxu0 %vm4566_vm0, %v4565_v0  ;;  %p317_p2 = scmp.lt.s32.totalorder %s3642_s20, 3  ;;  %v4244_v2 = vld [vmem:[#allocation2 + $0x1f8] ss:$84 sps:$4 sm:$0xff]   ;;  %v4245_v3 = vld [vmem:[#allocation2 + $0x150] ss:$84 sps:$4 sm:$0xff]   ;;  %vm372_vm1 = vcmask 523264  }
  0x2d   : > { %660 = vmatprep.mubr.bf16.mxu1 %v4567_v1  ;;  %3944 = vmatpush3.bf16.msra.mxu0 %v4244_v2  ;;  %v4246_v4 = vld [vmem:[#allocation2 + $0xa8] ss:$84 sps:$4 sm:$0xff]   ;;  %v4248_v5 = vld [vmem:[#allocation2 + $0x200] ss:$84 sps:$4 sm:$0xff]   ;;  %v4251_v7 = vld [vmem:[#allocation2 + $0x158] ss:$84 sps:$4 sm:$0xff]  }
  0x2e   : > { %s5172_s20 = smov (!%p317_p2, %s3642_s20), 3  ;;  %3945 = vmatprep.subr.bf16.mxu0 %v4565_v0  ;;  %v4250_v6 = vld [vmem:[#allocation2 + $0x1fc] ss:$84 sps:$4 sm:$0xff]   ;;  %636 = vmatprep.subr.bf16.mxu1 %v4248_v5  ;;  %v4247_v8 = vld [vmem:[#allocation2] ss:$84 sps:$4 sm:$0xff]   ;;  %v4700_v39 = vshrl.u32 %v417_v38, 7 }
  0x2f   : > { %s4676_s21 = sshll.u32 %s5172_s20, 3  ;;  %637 = vmatpush1.bf16.msra.mxu1 %v4250_v6  ;;  %v4253_v9 = vld [vmem:[#allocation2 + $0x154] ss:$84 sps:$4 sm:$0xff]   ;;  %v4257_v11 = vld [vmem:[#allocation2 + $0xb0] ss:$84 sps:$4 sm:$0xff]   ;;  %s4568_s14 = smov 96  }
  0x30   : > { %s320_s25 = scalar_lea.vmem %s5160_s0, %s4676_s21  ;;  %638 = vmatprep.subr.bf16.mxu1 %v4251_v7  ;;  %v4256_v13 = vld [vmem:[#allocation2 + $0x208] ss:$84 sps:$4 sm:$0xff]   ;;  %s326_s28 = scalar_lea.vmem %s5161_s1, %s4676_s21  ;;  %v4254_v14 = vld [vmem:[#allocation2 + $0x204] ss:$84 sps:$4 sm:$0xff]   ;;  %v4259_v15 = vld [vmem:[#allocation2 + $0xac] ss:$84 sps:$4 sm:$0xff]  }
  0x31   : > { %3946 = vmatpush3.bf16.msra.mxu0 %v4245_v3  ;;  %v337_v10 = vld [vmem:[%s320_s25] sm:$0xff]  ;;  %v338_v12 = vld [vmem:[%s320_s25 + $0x8] sm:$0xff]  ;;  %v4260_v23 = vld [vmem:[#allocation2 + $0x15c] ss:$84 sps:$4 sm:$0xff]   ;;  %v420_v40 = vand.u32 15, %v4700_v39  ;;  %s4569_s15 = smov 112   ;;  %s332_s20 = scalar_lea.vmem %s5167_s7, %s4676_s21 }
  0x32   : > { %3947 = vmatprep.subr.bf16.mxu0 %v4565_v0  ;;  %v339_v16 = vpack.c.bf16 %v338_v12, %v337_v10  ;;  %v4262_v17 = vld [vmem:[#allocation2 + $0x160] ss:$84 sps:$4 sm:$0xff]   ;;  %v4263_v18 = vld [vmem:[#allocation2 + $0x8] ss:$84 sps:$4 sm:$0xff]   ;;  %v4265_v24 = vld [vmem:[#allocation2 + $0x4] ss:$84 sps:$4 sm:$0xff]  }
  0x33   : > { %639 = vmatpush1.bf16.msra.mxu1 %v4253_v9  ;;  %v335_v19 = vld [vmem:[%s326_s28] sm:$0xff]  ;;  %v336_v20 = vld [vmem:[%s326_s28 + $0x8] sm:$0xff]  ;;  %vm422_vm2 = vcmp.lt.s32.totalorder %v420_v40, 1  ;;  %v4278_v61 = vld [vmem:[#allocation2 + $0xbc] ss:$84 sps:$4 sm:$0xff]   ;;  %s4570_s16 = smov 80  }
  0x34   : > { %640 = vmatprep.subr.bf16.mxu1 %v4257_v11  ;;  %v3653_v21 = vmul.f32 -1.442695, %v335_v19  ;;  %v3654_v22 = vmul.f32 -1.442695, %v336_v20  ;;  %v4268_v25 = vld [vmem:[#allocation2 + $0xb8] ss:$84 sps:$4 sm:$0xff]  }
  0x35   : > { %3948 = vmatpush3.bf16.msra.mxu0 %v4246_v4  ;;  %v4266_v26 = vld [vmem:[#allocation2 + $0xb4] ss:$84 sps:$4 sm:$0xff]   ;;  %v4271_v27 = vld [vmem:[#allocation2 + $0x10] ss:$84 sps:$4 sm:$0xff]   ;;  %v4269_v28 = vld [vmem:[#allocation2 + $0xc] ss:$84 sps:$4 sm:$0xff]  }
  0x36   : > { %3949 = vmatprep.subr.bf16.mxu0 %v4565_v0  ;;  %4380 = vpow2.f32 %v3653_v21  ;;  %v430_v41 = vld [vmem:[%s5162_s2] sm:$0xff]  ;;  %v431_v46 = vld [vmem:[%s5162_s2 + $0x8] sm:$0xff]  ;;  %vm1080_vm3 = vcmask 130048   ;;  %s4571_s27 = smov 16   ;;  %s4572_s28 = smov 32   ;;  %vm1568_vm4 = vcmask 261120  }
  0x37   : > { %641 = vmatpush1.bf16.msra.mxu1 %v4259_v15  ;;  %4382 = vpow2.f32 %v3654_v22  ;;  %v4274_v56 = vld [vmem:[#allocation2 + $0x210] ss:$84 sps:$4 sm:$0xff]   ;;  %v4272_v57 = vld [vmem:[#allocation2 + $0x20c] ss:$84 sps:$4 sm:$0xff]   ;;  %v4277_v58 = vld [vmem:[#allocation2 + $0x168] ss:$84 sps:$4 sm:$0xff]  }
  0x38   : > { %642 = vmatprep.subr.bf16.mxu1 %v4263_v18  ;;  %v4275_v59 = vld [vmem:[#allocation2 + $0x164] ss:$84 sps:$4 sm:$0xff]   ;;  %v4280_v60 = vld [vmem:[#allocation2 + $0xc0] ss:$84 sps:$4 sm:$0xff]   ;;  %v4289_v7 = vld [vmem:[#allocation2 + $0xc8] ss:$84 sps:$4 sm:$0xff]  }
  0x39   : > { %3950 = vmatpush3.bf16.msra.mxu0 %v4247_v8  ;;  %v4283_v62 = vld [vmem:[#allocation2 + $0x18] ss:$84 sps:$4 sm:$0xff]   ;;  %v4281_v63 = vld [vmem:[#allocation2 + $0x14] ss:$84 sps:$4 sm:$0xff]   ;;  %v4287_v5 = vld [vmem:[#allocation2 + $0x170] ss:$84 sps:$4 sm:$0xff]  }
  0x3a   : > { %679 = vmatprep.subr.bf16.mxu0 %v4256_v13  ;;  %v4284_v2 = vld [vmem:[#allocation2 + $0x214] ss:$84 sps:$4 sm:$0xff]   ;;  %v4285_v3 = vld [vmem:[#allocation2 + $0x218] ss:$84 sps:$4 sm:$0xff]   ;;  %v4290_v8 = vld [vmem:[#allocation2 + $0x1c] ss:$84 sps:$4 sm:$0xff]  }
  0x3b   : > { %643 = vmatpush1.bf16.msra.mxu1 %v4265_v24  ;;  %v4286_v4 = vld [vmem:[#allocation2 + $0x16c] ss:$84 sps:$4 sm:$0xff]   ;;  %v4288_v6 = vld [vmem:[#allocation2 + $0xc4] ss:$84 sps:$4 sm:$0xff]   ;;  %s4573_s29 = smov 48   ;;  %vm1571_vm5 = vcmask 392192  }
  0x3c   : > { %3952 = vmatmul.mubr.msk.bf16.vlgmr.msra.gmra.mxu0 %vm372_vm1, %v339_v16  ;;  %722 = vmatprep.subr.bf16.mxu1 %v4274_v56  ;;  %v4291_v9 = vld [vmem:[#allocation2 + $0x20] ss:$84 sps:$4 sm:$0xff]   ;;  %s4574_s9 = smov 64  }
  0x3d   : > { %680 = vmatpush1.bf16.msra.mxu0 %v4254_v14  ;;  %703 = vmatprep.mubr.bf16.mxu0 %v4567_v1 }
  0x3e   : > { %681 = vmatprep.subr.bf16.mxu0 %v4262_v17 }
  0x41   : > { %682 = vmatpush1.bf16.msra.mxu0 %v4260_v23 }
  0x42   : > { %683 = vmatprep.subr.bf16.mxu0 %v4268_v25 }
  0x43   : > { %v4381_v29 = vpop.eup %4380 }
  0x44   : > { %v4383_v30 = vpop.eup %4382  ;;  %v440_v31 = vadd.f32 1.0, %v4381_v29  ;;  %v4744_v29 = vld [vmem:[%s5166_s6] sm:$0x3f] }
  0x45   : > { %684 = vmatpush1.bf16.msra.mxu0 %v4266_v26  ;;  %v441_v32 = vadd.f32 1.0, %v4383_v30 }
  0x46   : > { %685 = vmatprep.subr.bf16.mxu0 %v4271_v27  ;;  %4384 = vrcp.f32 %v440_v31 }
  0x47   : > { %4386 = vrcp.f32 %v441_v32  ;;  %v485_v32 = vsub.s32 2, %v4700_v39 }
  0x49   : > { %686 = vmatpush1.bf16.msra.mxu0 %v4269_v28  ;;  %v4739_v28 = vsub.s32 1, %v4700_v39 }
  0x4a   : > { %3955 = vmatprep.subr.bf16.mxu0 %v4565_v0 }
  0x4b   : > { %v482_v31 = vrot.slane %v4744_v29, %v4739_v28 }
  0x53   : > { %v4385_v33 = vpop.eup %4384 }
  0x54   : > { %v4387_v34 = vpop.eup %4386  ;;  %v446_v35 = vmul.f32 %v4385_v33, %v335_v19 }
  0x55   : > { %v447_v36 = vmul.f32 %v4387_v34, %v336_v20 }
  0x57   : > { %v4691_v37 = vpack.c.bf16 %v447_v36, %v446_v35 }
  0x59   : > { %3679 = vmatmul.mubr.msk.bf16.vlgmr.msra.gmra.mxu1 %vm372_vm1, %v4691_v37  ;;  %3680 = vmatmul.mubr.msk.bf16.vlgmr.msra.gmra.mxu0 %vm372_vm1, %v4691_v37 }
  0x5a   : > { %746 = vmatprep.mubr.bf16.mxu1 %v4567_v1  ;;  %3963 = vmatprep.mubr.msk.bf16.mxu0 %vm4566_vm0, %v4565_v0 }
  0x5b   : > { %723 = vmatpush1.bf16.msra.mxu1 %v4272_v57  ;;  %3956 = vmatpush3.bf16.msra.mxu0 %v4284_v2 }
  0x5c   : > { %724 = vmatprep.subr.bf16.mxu1 %v4277_v58  ;;  %3957 = vmatprep.subr.bf16.mxu0 %v4565_v0  ;;  %v4292_v58 = vld [vmem:[#allocation2 + $0x21c] ss:$84 sps:$4 sm:$0xff]  }
  0x5f   : > { %725 = vmatpush1.bf16.msra.mxu1 %v4275_v59  ;;  %3958 = vmatpush3.bf16.msra.mxu0 %v4286_v4 }
  0x60   : > { %726 = vmatprep.subr.bf16.mxu1 %v4280_v60  ;;  %3959 = vmatprep.subr.bf16.mxu0 %v4565_v0  ;;  %v4293_v60 = vld [vmem:[#allocation2 + $0x174] ss:$84 sps:$4 sm:$0xff]  }
  0x63   : > { %727 = vmatpush1.bf16.msra.mxu1 %v4278_v61  ;;  %3960 = vmatpush3.bf16.msra.mxu0 %v4288_v6  ;;  %v4294_v61 = vld [vmem:[#allocation2 + $0xcc] ss:$84 sps:$4 sm:$0xff]  }
  0x64   : > { %728 = vmatprep.subr.bf16.mxu1 %v4283_v62  ;;  %3961 = vmatprep.subr.bf16.mxu0 %v4565_v0  ;;  %v4295_v62 = vld [vmem:[#allocation2 + $0x24] ss:$84 sps:$4 sm:$0xff]  }
  0x67   : > { %729 = vmatpush1.bf16.msra.mxu1 %v4281_v63  ;;  %3962 = vmatpush3.bf16.msra.mxu0 %v4290_v8  ;;  %v3682_v8 = vld [vmem:[%s5166_s6 + $0x6] ss:$0 sm:$0xff] }
  0x68   : > { %3967 = vmatprep.subr.bf16.mxu1 %v4565_v0  ;;  %3979 = vmatprep.subr.bf16.mxu0 %v4565_v0 }
  0x6a   : > { %3681 = vmatmul.mubr.msk.bf16.vlgmr.msra.gmra.mxu1 %vm372_vm1, %v4691_v37 }
  0x6b   : > { %3968 = vmatpush3.bf16.msra.mxu1 %v4285_v3  ;;  %3975 = vmatprep.mubr.msk.bf16.mxu1 %vm4566_vm0, %v4565_v0 }
  0x6c   : > { %3969 = vmatprep.subr.bf16.mxu1 %v4565_v0 }
  0x6f   : > { %3970 = vmatpush3.bf16.msra.mxu1 %v4287_v5 }
  0x70   : > { %3971 = vmatprep.subr.bf16.mxu1 %v4565_v0 }
  0x73   : > { %3972 = vmatpush3.bf16.msra.mxu1 %v4289_v7 }
  0x74   : > { %3973 = vmatprep.subr.bf16.mxu1 %v4565_v0 }
  0x77   : > { %3974 = vmatpush3.bf16.msra.mxu1 %v4291_v9 }
  0x78   : > { %3991 = vmatprep.subr.bf16.mxu1 %v4565_v0 }
  0xfc   : > { %v410_v42 = vpop.f32.mrf.mxu0 }
  0xfd   : > { %v428_v43 = vsel %vm422_vm2, %v335_v19, %v410_v42  ;;  %v486_v42 = vrot.slane %v4744_v29, %v485_v32 }
  0xfe   : > { %v4706_v44 = vadd.f32 %v430_v41, %v428_v43  ;;  %v3953_v45 = vpop.f32.mrf.mxu0 }
 0x100   : > { %v413_v47 = vpop.f32.mrf.mxu0  ;;  %v759_v48 = vsel %vm372_vm1, %v4706_v44, 0.0  ;;  %v768_v49 = vmul.f32 %v4706_v44, %v4706_v44 }
 0x101   : > { %v4715_v50 = vadd.f32 %v431_v46, %v413_v47  ;;  %760 = vadd.xlane.f32.xlu0 %v759_v48 }
 0x102   : > { %v3954_v51 = vpop.f32.mrf.mxu0  ;;  %v770_v52 = vsel %vm372_vm1, %v768_v49, 0.0 }
 0x103   : > { %771 = vadd.xlane.f32.xlu1 %v770_v52  ;;  %v762_v53 = vsel %vm372_vm1, %v4715_v50, 0.0  ;;  %v769_v54 = vmul.f32 %v4715_v50, %v4715_v50 }
 0x105   : > { %763 = vadd.xlane.f32.xlu0 %v762_v53  ;;  %v773_v55 = vsel %vm372_vm1, %v769_v54, 0.0 }
 0x107   : > { %774 = vadd.xlane.f32.xlu1 %v773_v55 }
 0x119   : > { %v4736_v24 = vpop.f32.mrf.mxu1  ;;  %v705_v34 = vpop.f32.mrf.mxu0 }
 0x11a   : > { %v4761_v52 = vadd.f32 %v705_v34, %v486_v42 }
 0x11b   : > { %v664_v27 = vpop.f32.mrf.mxu1  ;;  %v4753_v43 = vpop.f32.mrf.mxu0 }
 0x11c   : > { %v665_v36 = vadd.f32 %v664_v27, %v482_v31  ;;  %v3688_v27 = vld [vmem:[%s5166_s6 + $0x7] ss:$0 sm:$0xff] }
 0x11d   : > { %v4746_v30 = vpop.f32.mrf.mxu1  ;;  %v709_v53 = vpop.f32.mrf.mxu0 }
 0x11e   : > { %v4756_v46 = vadd.f32 1.0, %v665_v36  ;;  %v4764_v55 = vadd.f32 %v709_v53, %v486_v42 }
 0x11f   : > { %v668_v33 = vpop.f32.mrf.mxu1  ;;  %v4789_v5 = vpop.f32.mrf.mxu0 }
 0x120   : > { %v669_v41 = vadd.f32 %v668_v33, %v482_v31 }
 0x122   : > { %v4759_v51 = vadd.f32 1.0, %v669_v41 }
 0x12a   : > { %v4781_v63 = vpop.f32.mrf.mxu1 }
 0x12c   : > { %v4783_v2 = vpop.f32.mrf.mxu1 }
 0x12e   : > { %v4785_v3 = vpop.f32.mrf.mxu1 }
 0x130   : > { %v4787_v4 = vpop.f32.mrf.mxu1 }
 0x18a   : > { %v761_v10 = vpop.xlane.xlu0 %760 }
 0x18b   : > { %v766_v11 = vmul.f32 0.015625, %v761_v10 }
 0x18c   : > { %v772_v12 = vpop.xlane.xlu1 %771 }
 0x18d   : > { %v778_v13 = vmul.f32 %v766_v11, %v766_v11  ;;  %v776_v14 = vmul.f32 0.015625, %v772_v12  ;;  %v784_v35 = vsub.f32 %v4706_v44, %v766_v11 }
 0x18e   : > { %v764_v15 = vpop.xlane.xlu0 %763 }
 0x18f   : > { %v780_v16 = vsub.f32 %v776_v14, %v778_v13  ;;  %v767_v17 = vmul.f32 0.015625, %v764_v15 }
 0x190   : > { %v775_v18 = vpop.xlane.xlu1 %774 }
 0x191   : > { %v782_v19 = vmax.f32 %v780_v16, 0.0  ;;  %v779_v20 = vmul.f32 %v767_v17, %v767_v17  ;;  %v777_v21 = vmul.f32 0.015625, %v775_v18  ;;  %v785_v45 = vsub.f32 %v4715_v50, %v767_v17 }
 0x193   : > { %v786_v22 = vadd.f32 1e-06, %v782_v19  ;;  %v781_v23 = vsub.f32 %v777_v21, %v779_v20  ;;  %v3694_v19 = vld [vmem:[%s5166_s6 + $0x8] ss:$0 sm:$0xff] }
 0x195   : > { %4388 = vrsqrt.f32 %v786_v22  ;;  %v783_v25 = vmax.f32 %v781_v23, 0.0 }
 0x197   : > { %v787_v26 = vadd.f32 1e-06, %v783_v25 }
 0x199   : > { %4390 = vrsqrt.f32 %v787_v26 }
 0x1a2   : > { %v4389_v38 = vpop.eup %4388 }
 0x1a3   : > { %v790_v40 = vmul.f32 %v4389_v38, %v784_v35 }
 0x1a5   : > { %v794_v48 = vmul.f32 %v4756_v46, %v790_v40 }
 0x1a6   : > { %v4391_v47 = vpop.eup %4390 }
 0x1a7   : > { %v791_v49 = vmul.f32 %v4391_v47, %v785_v45  ;;  %v796_v56 = vadd.f32 %v794_v48, %v4761_v52 }
 0x1a9   : > { %v795_v54 = vmul.f32 %v4759_v51, %v791_v49 }
 0x1ab   : > { %v797_v57 = vadd.f32 %v795_v54, %v4764_v55 }
 0x1ad   : > { %v798_v59 = vpack.c.bf16 %v797_v57, %v796_v56  ;;  %v757_v57 = vld [vmem:[%s5163_s3] sm:$0xff] }
 0x1af   : > { %3964 = vmatmul.mubr.msk.bf16.vlgmr.msra.gmra.mxu0 %vm372_vm1, %v798_v59  ;;  %3976 = vmatmul.mubr.msk.bf16.vlgmr.msra.gmra.mxu1 %vm372_vm1, %v798_v59 }
 0x1b0   : > { %3980 = vmatpush3.bf16.msra.mxu0 %v4292_v58  ;;  %3987 = vmatprep.mubr.msk.bf16.mxu0 %vm4566_vm0, %v4565_v0 }
 0x1b1   : > { %3981 = vmatprep.subr.bf16.mxu0 %v4565_v0  ;;  %3993 = vmatprep.mubr.msk.bf16.mxu1 %vm4566_vm0, %v4565_v0 }
 0x1b4   : > { %3982 = vmatpush3.bf16.msra.mxu0 %v4293_v60 }
 0x1b5   : > { %3983 = vmatprep.subr.bf16.mxu0 %v4565_v0 }
 0x1b8   : > { %3984 = vmatpush3.bf16.msra.mxu0 %v4294_v61  ;;  %v758_v61 = vld [vmem:[%s5163_s3 + $0x8] sm:$0xff] }
 0x1b9   : > { %3985 = vmatprep.subr.bf16.mxu0 %v4565_v0 }
 0x1bc   : > { %3986 = vmatpush3.bf16.msra.mxu0 %v4295_v62 }
 0x1bd   : > { %4003 = vmatprep.subr.bf16.mxu0 %v4565_v0 }
 0x1bf   : > { %3988 = vmatmul.mubr.msk.bf16.vlgmr.msra.gmra.mxu0 %vm372_vm1, %v798_v59 }
 0x1c0   : > { %4005 = vmatprep.mubr.msk.bf16.mxu0 %vm4566_vm0, %v4565_v0 }
 0x26f   : > { %v875_v6 = vpop.f32.mrf.mxu0  ;;  %v955_v7 = vpop.f32.mrf.mxu1 }
 0x270   : > { %v876_v13 = vadd.f32 %v3682_v8, %v875_v6  ;;  %v956_v31 = vadd.f32 %v3688_v27, %v955_v7 }
 0x271   : > { %v3965_v9 = vpop.f32.mrf.mxu0  ;;  %v3977_v10 = vpop.f32.mrf.mxu1 }
 0x273   : > { %v878_v11 = vpop.f32.mrf.mxu0  ;;  %v958_v12 = vpop.f32.mrf.mxu1 }
 0x274   : > { %v879_v14 = vadd.f32 %v3682_v8, %v878_v11  ;;  %v959_v32 = vadd.f32 %v3688_v27, %v958_v12 }
 0x275   : > { %v3966_v15 = vpop.f32.mrf.mxu0  ;;  %v3978_v16 = vpop.f32.mrf.mxu1 }
 0x276   : > { %v1042_v17 = vpack.c.bf16 %v879_v14, %v876_v13 }
 0x278   : > { %1310 = vrot.lane.b32.xlu1 %v1042_v17, %s4568_s14  ;;  %1193 = vrot.lane.b32.xlu0 %v1042_v17, %s4569_s15 }
 0x27c   : > { %1426 = vrot.lane.b32.xlu0 %v1042_v17, %s4570_s16 }
 0x27f   : > { %v1035_v18 = vpop.f32.mrf.mxu0 }
 0x280   : > { %v1036_v22 = vadd.f32 %v3694_v19, %v1035_v18 }
 0x281   : > { %v3989_v20 = vpop.f32.mrf.mxu0 }
 0x283   : > { %v1038_v21 = vpop.f32.mrf.mxu0 }
 0x284   : > { %v1039_v23 = vadd.f32 %v3694_v19, %v1038_v21 }
 0x285   : > { %v3990_v25 = vpop.f32.mrf.mxu0 }
 0x286   : > { %v4800_v26 = vpack.c.bf16 %v1039_v23, %v1036_v22 }
 0x2a1   : > { %1043 = vxpose.xlu1.b32.start [1/2] (short) (narrow) %v956_v31, 64 }
 0x2a5   : > { %1044 = vxpose.xlu1.b32.end [2/2] (short) (narrow) %v959_v32, 64 }
 0x2ea   : > { %v1311_v33 = vpop.permute.xlu1 %1310  ;;  %v1194_v45 = vpop.permute.xlu0 %1193 }
 0x2ee   : > { %v1427_v56 = vpop.permute.xlu0 %1426 }
 0x31d   : > { %v1059_v34 = vpop.trf.xlu1 }
 0x321   : > { %v1060_v35 = vpop.trf.xlu1 }
 0x322   : > { %v1075_v36 = vpack.c.bf16 %v1060_v35, %v1059_v34 }
 0x324   : > { %3992 = vmatpush3.bf16.msra.mxu1 %v1075_v36 }
 0x325   : > { %v1061_v38 = vpop.trf.xlu1  ;;  %3997 = vmatprep.subr.bf16.mxu1 %v4565_v0 }
 0x327   : > { %3994 = vmatmul.mubr.msk.bf16.vlgmr.msra.gmra.mxu1 %vm1080_vm3, %v1042_v17 }
 0x328   : > { %3998 = vmatpush3.bf16.msra.mxu1 %v4800_v26  ;;  %3999 = vmatprep.mubr.msk.bf16.mxu1 %vm4566_vm0, %v4565_v0 }
 0x329   : > { %v1062_v40 = vpop.trf.xlu1  ;;  %4009 = vmatprep.subr.bf16.mxu1 %v4565_v0 }
 0x32a   : > { %v1076_v41 = vpack.c.bf16 %v1062_v40, %v1061_v38 }
 0x32c   : > { %4004 = vmatpush3.bf16.msra.mxu0 %v1076_v41 }
 0x32d   : > { %v1063_v42 = vpop.trf.xlu1  ;;  %4015 = vmatprep.subr.bf16.mxu0 %v4565_v0 }
 0x32f   : > { %4006 = vmatmul.mubr.msk.bf16.vlgmr.msra.gmra.mxu0 %vm1080_vm3, %v1194_v45 }
 0x330   : > { %4017 = vmatprep.mubr.msk.bf16.mxu0 %vm4566_vm0, %v4565_v0 }
 0x331   : > { %v1064_v47 = vpop.trf.xlu1 }
 0x332   : > { %v1077_v48 = vpack.c.bf16 %v1064_v47, %v1063_v42 }
 0x334   : > { %4016 = vmatpush3.bf16.msra.mxu0 %v1077_v48 }
 0x335   : > { %v1065_v49 = vpop.trf.xlu1  ;;  %4027 = vmatprep.subr.bf16.mxu0 %v4565_v0 }
 0x337   : > { %4018 = vmatmul.mubr.msk.bf16.vlgmr.msra.gmra.mxu0 %vm1080_vm3, %v1311_v33 }
 0x338   : > { %4029 = vmatprep.mubr.msk.bf16.mxu0 %vm4566_vm0, %v4565_v0 }
 0x339   : > { %v1066_v53 = vpop.trf.xlu1 }
 0x33a   : > { %v1078_v54 = vpack.c.bf16 %v1066_v53, %v1065_v49 }
 0x33c   : > { %4028 = vmatpush3.bf16.msra.mxu0 %v1078_v54 }
 0x33d   : > { %4039 = vmatprep.subr.bf16.mxu0 %v4565_v0 }
 0x33f   : > { %4030 = vmatmul.mubr.msk.bf16.vlgmr.msra.gmra.mxu0 %vm1080_vm3, %v1427_v56 }
 0x340   : > { %4047 = vmatprep.mubr.msk.bf16.mxu0 %vm4566_vm0, %v4565_v0 }
 0x3e7   : > { %v1118_v58 = vpop.f32.mrf.mxu1 }
 0x3e8   : > { %v1119_v59 = vadd.f32 %v1118_v58, %v757_v57 }
 0x3e9   : > { %v3995_v60 = vpop.f32.mrf.mxu1 }
 0x3ea   : > { %v1125_v62 = vsel %vm1080_vm3, %v1119_v59, -inf }
 0x3eb   : > { %v1121_v6 = vpop.f32.mrf.mxu1  ;;  %1126 = vmax.xlane.f32.xlu0 %v1125_v62 }
 0x3ec   : > { %v1122_v7 = vadd.f32 %v1121_v6, %v758_v61 }
 0x3ed   : > { %v3996_v8 = vpop.f32.mrf.mxu1 }
 0x3ee   : > { %v1128_v9 = vsel %vm1080_vm3, %v1122_v7, -inf }
 0x3ef   : > { %1129 = vmax.xlane.f32.xlu0 %v1128_v9  ;;  %v1232_v10 = vpop.f32.mrf.mxu0 }
 0x3f0   : > { %v1233_v11 = vadd.f32 %v1232_v10, %v757_v57 }
 0x3f1   : > { %v4007_v12 = vpop.f32.mrf.mxu0 }
 0x3f2   : > { %v1239_v13 = vsel %vm1080_vm3, %v1233_v11, -inf }
 0x3f3   : > { %1240 = vmax.xlane.f32.xlu0 %v1239_v13  ;;  %v1235_v14 = vpop.f32.mrf.mxu0 }
 0x3f4   : > { %v1236_v15 = vadd.f32 %v1235_v14, %v758_v61 }
 0x3f5   : > { %v4008_v16 = vpop.f32.mrf.mxu0 }
 0x3f6   : > { %v1242_v17 = vsel %vm1080_vm3, %v1236_v15, -inf }
 0x3f7   : > { %1243 = vmax.xlane.f32.xlu1 %v1242_v17  ;;  %v1349_v18 = vpop.f32.mrf.mxu0 }
 0x3f8   : > { %v1350_v19 = vadd.f32 %v1349_v18, %v757_v57 }
 0x3f9   : > { %v4019_v20 = vpop.f32.mrf.mxu0 }
 0x3fa   : > { %v1356_v21 = vsel %vm1080_vm3, %v1350_v19, -inf }
 0x3fb   : > { %1357 = vmax.xlane.f32.xlu0 %v1356_v21  ;;  %v1352_v22 = vpop.f32.mrf.mxu0 }
 0x3fc   : > { %v1353_v23 = vadd.f32 %v1352_v22, %v758_v61 }
 0x3fd   : > { %v4020_v25 = vpop.f32.mrf.mxu0 }
 0x3fe   : > { %v1359_v27 = vsel %vm1080_vm3, %v1353_v23, -inf }
 0x3ff   : > { %1360 = vmax.xlane.f32.xlu0 %v1359_v27  ;;  %v1465_v31 = vpop.f32.mrf.mxu0 }
 0x400   : > { %v1466_v32 = vadd.f32 %v1465_v31, %v757_v57 }
 0x401   : > { %v4031_v33 = vpop.f32.mrf.mxu0 }
 0x402   : > { %v1472_v34 = vsel %vm1080_vm3, %v1466_v32, -inf }
 0x403   : > { %1473 = vmax.xlane.f32.xlu0 %v1472_v34  ;;  %v1468_v35 = vpop.f32.mrf.mxu0 }
 0x404   : > { %v1469_v36 = vadd.f32 %v1468_v35, %v758_v61 }
 0x405   : > { %v4032_v38 = vpop.f32.mrf.mxu0 }
 0x406   : > { %v1475_v40 = vsel %vm1080_vm3, %v1469_v36, -inf }
 0x407   : > { %1476 = vmax.xlane.f32.xlu0 %v1475_v40 }
 0x408   : > { %1379 = vrot.lane.b32.xlu1 %v4800_v26, %s4568_s14 }
 0x41d   : > { %1263 = vrot.lane.b32.xlu0 %v4800_v26, %s4569_s15 }
 0x474   : > { %v1127_v41 = vpop.xlane.xlu0 %1126 }
 0x475   : > { %v1131_v42 = vsub.f32 %v1119_v59, %v1127_v41 }
 0x477   : > { %v1133_v45 = vmul.f32 1.442695, %v1131_v42 }
 0x478   : > { %v1130_v47 = vpop.xlane.xlu0 %1129 }
 0x479   : > { %4392 = vpow2.f32 %v1133_v45  ;;  %v1132_v48 = vsub.f32 %v1122_v7, %v1130_v47 }
 0x47b   : > { %v1135_v49 = vmul.f32 1.442695, %v1132_v48 }
 0x47c   : > { %v1241_v53 = vpop.xlane.xlu0 %1240 }
 0x47d   : > { %4394 = vpow2.f32 %v1135_v49  ;;  %v1245_v54 = vsub.f32 %v1233_v11, %v1241_v53 }
 0x47f   : > { %v1247_v56 = vmul.f32 1.442695, %v1245_v54 }
 0x480   : > { %v1244_v57 = vpop.xlane.xlu1 %1243 }
 0x481   : > { %4396 = vpow2.f32 %v1247_v56  ;;  %v1246_v58 = vsub.f32 %v1236_v15, %v1244_v57 }
 0x483   : > { %v1249_v60 = vmul.f32 1.442695, %v1246_v58 }
 0x484   : > { %v1358_v61 = vpop.xlane.xlu0 %1357 }
 0x485   : > { %4398 = vpow2.f32 %v1249_v60  ;;  %v1362_v62 = vsub.f32 %v1350_v19, %v1358_v61 }
 0x486   : > { %v4393_v6 = vpop.eup %4392 }
 0x487   : > { %v1364_v8 = vmul.f32 1.442695, %v1362_v62  ;;  %v1137_v59 = vsel %vm1080_vm3, %v4393_v6, 0.0 }
 0x488   : > { %v1361_v9 = vpop.xlane.xlu0 %1360  ;;  %1138 = vadd.xlane.f32.xlu0 %v1137_v59 }
 0x489   : > { %4400 = vpow2.f32 %v1364_v8  ;;  %v1363_v7 = vsub.f32 %v1353_v23, %v1361_v9  ;;  %v1380_v8 = vpop.permute.xlu1 %1379 }
 0x48a   : > { %v4395_v10 = vpop.eup %4394 }
 0x48b   : > { %v1366_v12 = vmul.f32 1.442695, %v1363_v7  ;;  %v1140_v11 = vsel %vm1080_vm3, %v4395_v10, 0.0 }
 0x48c   : > { %v1474_v13 = vpop.xlane.xlu0 %1473  ;;  %1141 = vadd.xlane.f32.xlu0 %v1140_v11 }
 0x48d   : > { %4402 = vpow2.f32 %v1366_v12  ;;  %v1478_v14 = vsub.f32 %v1466_v32, %v1474_v13 }
 0x48e   : > { %v4397_v15 = vpop.eup %4396 }
 0x48f   : > { %v1480_v16 = vmul.f32 1.442695, %v1478_v14  ;;  %v1251_v17 = vsel %vm1080_vm3, %v4397_v15, 0.0 }
 0x490   : > { %1252 = vadd.xlane.f32.xlu0 %v1251_v17  ;;  %v1477_v18 = vpop.xlane.xlu0 %1476 }
 0x491   : > { %4404 = vpow2.f32 %v1480_v16  ;;  %v1479_v19 = vsub.f32 %v1469_v36, %v1477_v18 }
 0x492   : > { %v4399_v20 = vpop.eup %4398 }
 0x493   : > { %v1482_v21 = vmul.f32 1.442695, %v1479_v19  ;;  %v1254_v22 = vsel %vm1080_vm3, %v4399_v20, 0.0 }
 0x494   : > { %1255 = vadd.xlane.f32.xlu0 %v1254_v22  ;;  %v1264_v36 = vpop.permute.xlu0 %1263 }
 0x495   : > { %4406 = vpow2.f32 %v1482_v21  ;;  %v4296_v21 = vld [vmem:[#allocation2 + $0x220] ss:$84 sps:$4 sm:$0xff]  }
 0x496   : > { %v4401_v23 = vpop.eup %4400  ;;  %4040 = vmatpush3.bf16.msra.mxu0 %v4296_v21 }
 0x497   : > { %v1368_v25 = vsel %vm1080_vm3, %v4401_v23, 0.0  ;;  %4041 = vmatprep.subr.bf16.mxu0 %v4565_v0 }
 0x498   : > { %1369 = vadd.xlane.f32.xlu0 %v1368_v25 }
 0x49a   : > { %v4403_v27 = vpop.eup %4402 }
 0x49b   : > { %v1371_v31 = vsel %vm1080_vm3, %v4403_v27, 0.0 }
 0x49c   : > { %1372 = vadd.xlane.f32.xlu0 %v1371_v31 }
 0x49e   : > { %v4405_v32 = vpop.eup %4404 }
 0x49f   : > { %v1484_v33 = vsel %vm1080_vm3, %v4405_v32, 0.0 }
 0x4a0   : > { %1485 = vadd.xlane.f32.xlu0 %v1484_v33 }
 0x4a2   : > { %v4407_v34 = vpop.eup %4406 }
 0x4a3   : > { %v1487_v35 = vsel %vm1080_vm3, %v4407_v34, 0.0 }
 0x4a4   : > { %1488 = vadd.xlane.f32.xlu0 %v1487_v35 }
 0x4ba   : > { %1495 = vrot.lane.b32.xlu0 %v4800_v26, %s4570_s16 }
 0x511   : > { %v1139_v38 = vpop.xlane.xlu0 %1138 }
 0x512   : > { %4408 = vrcp.f32 %v1139_v38  ;;  %v4299_v38 = vld [vmem:[#allocation2 + $0x28] ss:$84 sps:$4 sm:$0xff]  }
 0x515   : > { %v1142_v40 = vpop.xlane.xlu0 %1141 }
 0x516   : > { %4410 = vrcp.f32 %v1142_v40 }
 0x519   : > { %v1253_v41 = vpop.xlane.xlu0 %1252 }
 0x51a   : > { %4412 = vrcp.f32 %v1253_v41 }
 0x51d   : > { %v1256_v42 = vpop.xlane.xlu0 %1255 }
 0x51e   : > { %4414 = vrcp.f32 %v1256_v42 }
 0x51f   : > { %v4409_v45 = vpop.eup %4408 }
 0x520   : > { %v1145_v49 = vmul.f32 %v4409_v45, %v4393_v6 }
 0x521   : > { %v1370_v47 = vpop.xlane.xlu0 %1369 }
 0x522   : > { %4416 = vrcp.f32 %v1370_v47 }
 0x523   : > { %v4411_v48 = vpop.eup %4410 }
 0x524   : > { %v1146_v53 = vmul.f32 %v4411_v48, %v4395_v10 }
 0x525   : > { %v1373_v54 = vpop.xlane.xlu0 %1372 }
 0x526   : > { %4418 = vrcp.f32 %v1373_v54  ;;  %v1147_v56 = vpack.c.bf16 %v1146_v53, %v1145_v49 }
 0x527   : > { %v4413_v26 = vpop.eup %4412 }
 0x528   : > { %4000 = vmatmul.mubr.msk.bf16.vlgmr.msra.gmra.mxu1 %vm1080_vm3, %v1147_v56  ;;  %v1259_v60 = vmul.f32 %v4413_v26, %v4397_v15 }
 0x529   : > { %4010 = vmatpush3.bf16.msra.mxu1 %v1264_v36  ;;  %v1486_v57 = vpop.xlane.xlu0 %1485  ;;  %4011 = vmatprep.mubr.msk.bf16.mxu1 %vm4566_vm0, %v4565_v0 }
 0x52a   : > { %4021 = vmatprep.subr.bf16.mxu1 %v4565_v0  ;;  %4420 = vrcp.f32 %v1486_v57 }
 0x52b   : > { %v4415_v58 = vpop.eup %4414 }
 0x52c   : > { %v1260_v61 = vmul.f32 %v4415_v58, %v4399_v20 }
 0x52d   : > { %v1489_v62 = vpop.xlane.xlu0 %1488 }
 0x52e   : > { %4422 = vrcp.f32 %v1489_v62  ;;  %v1261_v6 = vpack.c.bf16 %v1260_v61, %v1259_v60 }
 0x52f   : > { %v4417_v59 = vpop.eup %4416 }
 0x530   : > { %4012 = vmatmul.mubr.msk.bf16.vlgmr.msra.gmra.mxu1 %vm1080_vm3, %v1261_v6  ;;  %v1376_v7 = vmul.f32 %v4417_v59, %v4401_v23 }
 0x531   : > { %4022 = vmatpush3.bf16.msra.mxu1 %v1380_v8  ;;  %4023 = vmatprep.mubr.msk.bf16.mxu1 %vm4566_vm0, %v4565_v0  ;;  %v1496_v11 = vpop.permute.xlu0 %1495 }
 0x532   : > { %4033 = vmatprep.subr.bf16.mxu1 %v4565_v0 }
 0x533   : > { %v4419_v9 = vpop.eup %4418 }
 0x534   : > { %v1377_v10 = vmul.f32 %v4419_v9, %v4403_v27  ;;  %v4297_v27 = vld [vmem:[#allocation2 + $0x178] ss:$84 sps:$4 sm:$0xff]  }
 0x535   : > { %4042 = vmatpush3.bf16.msra.mxu0 %v4297_v27 }
 0x536   : > { %v1378_v12 = vpack.c.bf16 %v1377_v10, %v1376_v7  ;;  %4043 = vmatprep.subr.bf16.mxu0 %v4565_v0 }
 0x537   : > { %v4421_v13 = vpop.eup %4420 }
 0x538   : > { %4024 = vmatmul.mubr.msk.bf16.vlgmr.msra.gmra.mxu1 %vm1080_vm3, %v1378_v12  ;;  %v1492_v15 = vmul.f32 %v4421_v13, %v4405_v32  ;;  %v4298_v32 = vld [vmem:[#allocation2 + $0xd0] ss:$84 sps:$4 sm:$0xff]   ;;  %v4878_v13 = vsub.s32 0, %v4700_v39 }
 0x539   : > { %4034 = vmatpush3.bf16.msra.mxu1 %v1496_v11  ;;  %4035 = vmatprep.mubr.msk.bf16.mxu1 %vm4566_vm0, %v4565_v0 }
 0x53a   : > { %4044 = vmatpush3.bf16.msra.mxu0 %v4298_v32 }
 0x53b   : > { %v4423_v14 = vpop.eup %4422  ;;  %4045 = vmatprep.subr.bf16.mxu0 %v4565_v0 }
 0x53c   : > { %v1493_v16 = vmul.f32 %v4423_v14, %v4407_v34  ;;  %v478_v14 = vrot.slane %v4744_v29, %v4878_v13 }
 0x53e   : > { %v1494_v17 = vpack.c.bf16 %v1493_v16, %v1492_v15  ;;  %4046 = vmatpush3.bf16.msra.mxu0 %v4299_v38  ;;  %v3708_v15 = vld [vmem:[%s5166_s6 + $0x9] ss:$0 sm:$0xff]  ;;  %v4303_v38 = vld [vmem:[#allocation2 + $0x17c] ss:$84 sps:$4 sm:$0xff]  }
 0x540   : > { %4036 = vmatmul.mubr.msk.bf16.vlgmr.msra.gmra.mxu1 %vm1080_vm3, %v1494_v17  ;;  %v663_v17 = vadd.f32 %v4736_v24, %v478_v14 }
 0x541   : > { %1810 = vmatprep.mubr.bf16.mxu1 %v4567_v1 }
 0x5e8   : > { %v1185_v18 = vpop.f32.mrf.mxu1 }
 0x5ea   : > { %v4001_v19 = vpop.f32.mrf.mxu1 }
 0x5ec   : > { %v1188_v20 = vpop.f32.mrf.mxu1 }
 0x5ee   : > { %v4002_v22 = vpop.f32.mrf.mxu1 }
 0x5ef   : > { %v667_v22 = vadd.f32 %v4746_v30, %v478_v14 }
 0x5f0   : > { %v1303_v23 = vpop.f32.mrf.mxu1 }
 0x5f2   : > { %v4013_v25 = vpop.f32.mrf.mxu1 }
 0x5f4   : > { %v1306_v31 = vpop.f32.mrf.mxu1 }
 0x5f5   : > { %v4214_v33 = vpack.i.bf16 %v1306_v31, %v1303_v23 }
 0x5f6   : > { %v4014_v34 = vpop.f32.mrf.mxu1 }
 0x5f7   : > { %4215 = vrot.lane.b32.xlu0 %v4214_v33, %s4571_s27 }
 0x5f8   : > { %v1419_v35 = vpop.f32.mrf.mxu1 }
 0x5fa   : > { %v4025_v36 = vpop.f32.mrf.mxu1 }
 0x5fb   : > { %v4305_v36 = vld [vmem:[#allocation2 + $0x180] ss:$84 sps:$4 sm:$0xff]  }
 0x5fc   : > { %v1422_v40 = vpop.f32.mrf.mxu1 }
 0x5fd   : > { %v4219_v41 = vpack.i.bf16 %v1422_v40, %v1419_v35  ;;  %v4300_v35 = vld [vmem:[#allocation2 + $0x224] ss:$84 sps:$4 sm:$0xff]   ;;  %v4309_v40 = vld [vmem:[#allocation2 + $0x2c] ss:$84 sps:$4 sm:$0xff]  }
 0x5fe   : > { %v4026_v42 = vpop.f32.mrf.mxu1 }
 0x5ff   : > { %4220 = vrot.lane.b32.xlu1 %v4219_v41, %s4572_s28 }
 0x600   : > { %v1535_v45 = vpop.f32.mrf.mxu1 }
 0x602   : > { %v4037_v47 = vpop.f32.mrf.mxu1 }
 0x604   : > { %v1538_v48 = vpop.f32.mrf.mxu1 }
 0x605   : > { %v4224_v49 = vpack.i.bf16 %v1538_v48, %v1535_v45 }
 0x606   : > { %v4038_v53 = vpop.f32.mrf.mxu1 }
 0x607   : > { %4225 = vrot.lane.b32.xlu0 %v4224_v49, %s4573_s29 }
 0x669   : > { %v4216_v54 = vpop.permute.xlu0 %4215 }
 0x66a   : > { %v4218_v26 = vunpack.i.h.bf16 %v4216_v54  ;;  %v4217_v57 = vunpack.i.l.bf16 %v4216_v54 }
 0x66c   : > { %v1567_v62 = vsel %vm1080_vm3, %v1188_v20, %v4218_v26  ;;  %v1566_v6 = vsel %vm1080_vm3, %v1185_v18, %v4217_v57 }
 0x671   : > { %v4221_v56 = vpop.permute.xlu1 %4220 }
 0x672   : > { %v4223_v58 = vunpack.i.h.bf16 %v4221_v56  ;;  %v4222_v60 = vunpack.i.l.bf16 %v4221_v56 }
 0x674   : > { %v1569_v9 = vsel %vm1568_vm4, %v1566_v6, %v4222_v60  ;;  %v1570_v7 = vsel %vm1568_vm4, %v1567_v62, %v4223_v58 }
 0x679   : > { %v4226_v61 = vpop.permute.xlu0 %4225 }
 0x67a   : > { %v4228_v8 = vunpack.i.h.bf16 %v4226_v61  ;;  %v4227_v59 = vunpack.i.l.bf16 %v4226_v61 }
 0x67c   : > { %v1572_v10 = vsel %vm1571_vm5, %v1569_v9, %v4227_v59  ;;  %v1573_v12 = vsel %vm1571_vm5, %v1570_v7, %v4228_v8 }
 0x67d   : > { %v1574_v11 = vpack.c.bf16 %v1573_v12, %v1572_v10 }
 0x67f   : > { %4048 = vmatmul.mubr.msk.bf16.vlgmr.msra.gmra.mxu0 %vm372_vm1, %v1574_v11 }
 0x73f   : > { %v1651_v16 = vpop.f32.mrf.mxu0 }
 0x740   : > { %v1652_v18 = vadd.f32 %v3708_v15, %v1651_v16 }
 0x741   : > { %v4049_v19 = vpop.f32.mrf.mxu0 }
 0x742   : > { %v1658_v20 = vmul.f32 %v1652_v18, %v663_v17 }
 0x743   : > { %v1654_v21 = vpop.f32.mrf.mxu0 }
 0x744   : > { %v4888_v23 = vadd.f32 %v1658_v20, %v4706_v44  ;;  %v1655_v25 = vadd.f32 %v3708_v15, %v1654_v21  ;;  %v4312_v21 = vld [vmem:[#allocation4 + $0xf0] ss:$8 sps:$4 sm:$0xff]  }
 0x745   : > { %v4050_v27 = vpop.f32.mrf.mxu0  ;;  %3853 = vmatprep.subr.bf16.mxu0 %v4312_v21 }
 0x746   : > { %v1659_v31 = vmul.f32 %v1655_v25, %v667_v22  ;;  %v1662_v29 = vsel %vm372_vm1, %v4888_v23, 0.0  ;;  %v1670_v33 = vmul.f32 %v4888_v23, %v4888_v23  ;;  %v4314_v25 = vld [vmem:[#allocation4 + $0xe0] ss:$8 sps:$4 sm:$0xff]  }
 0x747   : > { %1663 = vadd.xlane.f32.xlu1 %v1662_v29  ;;  %v4315_v27 = vld [vmem:[#allocation4 + $0x60] ss:$8 sps:$4 sm:$0xff]   ;;  %v4317_v29 = vld [vmem:[#allocation4 + $0x50] ss:$8 sps:$4 sm:$0xff]  }
 0x748   : > { %v4895_v24 = vadd.f32 %v1659_v31, %v4715_v50  ;;  %v1672_v32 = vsel %vm372_vm1, %v1670_v33, 0.0  ;;  %v4302_v50 = vld [vmem:[#allocation2 + $0x228] ss:$84 sps:$4 sm:$0xff]   ;;  %v4316_v31 = vld [vmem:[#allocation4 + $0xd0] ss:$8 sps:$4 sm:$0xff]  }
 0x749   : > { %1673 = vadd.xlane.f32.xlu0 %v1672_v32  ;;  %1786 = vmatprep.subr.bf16.mxu1 %v4302_v50  ;;  %v4318_v33 = vld [vmem:[#allocation4 + $0xc0] ss:$8 sps:$4 sm:$0xff]  }
 0x74a   : > { %v1665_v44 = vsel %vm372_vm1, %v4895_v24, 0.0  ;;  %v1671_v30 = vmul.f32 %v4895_v24, %v4895_v24  ;;  %1787 = vmatpush1.bf16.msra.mxu1 %v4300_v35  ;;  %v4319_v32 = vld [vmem:[#allocation4 + $0x40] ss:$8 sps:$4 sm:$0xff]   ;;  %v4324_v35 = vld [vmem:[#allocation4 + $0x90] ss:$8 sps:$4 sm:$0xff]  }
 0x74b   : > { %1788 = vmatprep.subr.bf16.mxu1 %v4305_v36  ;;  %v4323_v50 = vld [vmem:[#allocation4 + $0x20] ss:$8 sps:$4 sm:$0xff]   ;;  %v4325_v36 = vld [vmem:[#allocation4 + $0x10] ss:$8 sps:$4 sm:$0xff]  }
 0x74c   : > { %v1675_v34 = vsel %vm372_vm1, %v1671_v30, 0.0  ;;  %v4321_v30 = vld [vmem:[#allocation4 + $0x30] ss:$8 sps:$4 sm:$0xff]  }
 0x74d   : > { %1666 = vadd.xlane.f32.xlu0 %v1665_v44  ;;  %v4320_v44 = vld [vmem:[#allocation4 + $0xb0] ss:$8 sps:$4 sm:$0xff]  }
 0x74e   : > { %1789 = vmatpush1.bf16.msra.mxu1 %v4303_v38  ;;  %v4326_v38 = vld [vmem:[#allocation4 + $0x80] ss:$8 sps:$4 sm:$0xff]  }
 0x751   : > { %1676 = vadd.xlane.f32.xlu0 %v1675_v34  ;;  %v4322_v34 = vld [vmem:[#allocation4 + $0xa0] ss:$8 sps:$4 sm:$0xff]  }
 0x758   : > { %1696 = vrot.lane.b32.xlu1 %v4756_v46, %s4574_s9  ;;  %v4308_v46 = vld [vmem:[#allocation2 + $0xd8] ss:$84 sps:$4 sm:$0xff]  }
 0x759   : > { %1790 = vmatprep.subr.bf16.mxu1 %v4308_v46  ;;  %v4327_v46 = vld [vmem:[#allocation4] ss:$8 sps:$4 sm:$0xff]  }
 0x75c   : > { %1706 = vrot.lane.b32.xlu1 %v4761_v52, %s4574_s9  ;;  %v4306_v52 = vld [vmem:[#allocation2 + $0xd4] ss:$84 sps:$4 sm:$0xff]  }
 0x75d   : > { %1791 = vmatpush1.bf16.msra.mxu1 %v4306_v52  ;;  %v1723_v52 = vld [vmem:[%s5166_s6 + $0xa] sm:$0x3] }
 0x760   : > { %1708 = vrot.lane.b32.xlu1 %v4764_v55, %s4574_s9  ;;  %v4311_v55 = vld [vmem:[#allocation2 + $0x30] ss:$84 sps:$4 sm:$0xff]  }
 0x761   : > { %1792 = vmatprep.subr.bf16.mxu1 %v4311_v55  ;;  %v1728_v55 = vrot.slane %v1723_v52, %v4878_v13 }
 0x762   : > { %1793 = vmatpush1.bf16.msra.mxu1 %v4309_v40  ;;  %v1732_v40 = vrot.slane %v1723_v52, %v4739_v28  ;;  %v3723_v52 = vld [vmem:[%s5166_s6 + $0xc] ss:$0 sm:$0xff] }
 0x763   : > { %4051 = vmatprep.subr.bf16.mxu1 %v4565_v0 }
 0x764   : > { %2037 = vrot.lane.b32.xlu1 %v663_v17, %s4574_s9 }
 0x767   : > { %1698 = vrot.lane.b32.xlu0 %v4759_v51, %s4574_s9 }
 0x76b   : > { %2039 = vrot.lane.b32.xlu0 %v667_v22, %s4574_s9  ;;  %v4313_v22 = vld [vmem:[#allocation4 + $0x70] ss:$8 sps:$4 sm:$0xff]  }
 0x76c   : > { %3854 = vmatpush3.bf16.msra.mxu0 %v4313_v22 }
 0x76d   : > { %3855 = vmatprep.subr.bf16.mxu0 %v4314_v25 }
 0x770   : > { %3856 = vmatpush3.bf16.msra.mxu0 %v4315_v27 }
 0x771   : > { %3857 = vmatprep.subr.bf16.mxu0 %v4316_v31 }
 0x774   : > { %3858 = vmatpush3.bf16.msra.mxu0 %v4317_v29 }
 0x775   : > { %3859 = vmatprep.subr.bf16.mxu0 %v4318_v33 }
 0x778   : > { %3860 = vmatpush3.bf16.msra.mxu0 %v4319_v32 }
 0x779   : > { %3861 = vmatprep.subr.bf16.mxu0 %v4320_v44 }
 0x77c   : > { %3862 = vmatpush3.bf16.msra.mxu0 %v4321_v30 }
 0x77d   : > { %3863 = vmatprep.subr.bf16.mxu0 %v4322_v34 }
 0x780   : > { %3864 = vmatpush3.bf16.msra.mxu0 %v4323_v50 }
 0x781   : > { %3865 = vmatprep.subr.bf16.mxu0 %v4324_v35 }
 0x784   : > { %3866 = vmatpush3.bf16.msra.mxu0 %v4325_v36 }
 0x785   : > { %3867 = vmatprep.subr.bf16.mxu0 %v4326_v38 }
 0x788   : > { %3868 = vmatpush3.bf16.msra.mxu0 %v4327_v46 }
 0x789   : > { %4075 = vmatprep.subr.bf16.mxu0 %v4565_v0 }
 0x7d0   : > { %v1664_v51 = vpop.xlane.xlu1 %1663 }
 0x7d1   : > { %v1668_v41 = vmul.f32 0.015625, %v1664_v51 }
 0x7d2   : > { %v1674_v42 = vpop.xlane.xlu0 %1673 }
 0x7d3   : > { %v1680_v45 = vmul.f32 %v1668_v41, %v1668_v41  ;;  %v1678_v47 = vmul.f32 0.015625, %v1674_v42  ;;  %v1686_v59 = vsub.f32 %v4888_v23, %v1668_v41 }
 0x7d4   : > { %v1697_v6 = vpop.permute.xlu1 %1696 }
 0x7d5   : > { %v1682_v48 = vsub.f32 %v1678_v47, %v1680_v45 }
 0x7d6   : > { %v1667_v49 = vpop.xlane.xlu0 %1666 }
 0x7d7   : > { %v1684_v53 = vmax.f32 %v1682_v48, 0.0  ;;  %v1669_v54 = vmul.f32 0.015625, %v1667_v49 }
 0x7d8   : > { %v1707_v7 = vpop.permute.xlu1 %1706 }
 0x7d9   : > { %v1688_v56 = vadd.f32 1e-06, %v1684_v53  ;;  %v1681_v57 = vmul.f32 %v1669_v54, %v1669_v54  ;;  %v1687_v10 = vsub.f32 %v4895_v24, %v1669_v54 }
 0x7da   : > { %v1677_v26 = vpop.xlane.xlu0 %1676 }
 0x7db   : > { %v1679_v58 = vmul.f32 0.015625, %v1677_v26  ;;  %4424 = vrsqrt.f32 %v1688_v56 }
 0x7dc   : > { %v1709_v17 = vpop.permute.xlu1 %1708 }
 0x7dd   : > { %v1683_v60 = vsub.f32 %v1679_v58, %v1681_v57 }
 0x7de   : > { %v1699_v15 = vpop.permute.xlu0 %1698 }
 0x7df   : > { %v1685_v61 = vmax.f32 %v1683_v60, 0.0 }
 0x7e1   : > { %v1689_v62 = vadd.f32 1e-06, %v1685_v61 }
 0x7e3   : > { %4426 = vrsqrt.f32 %v1689_v62 }
 0x7e8   : > { %v4425_v8 = vpop.eup %4424 }
 0x7e9   : > { %v1692_v9 = vmul.f32 %v4425_v8, %v1686_v59 }
 0x7eb   : > { %v1702_v11 = vmul.f32 %v1697_v6, %v1692_v9 }
 0x7ed   : > { %v1712_v18 = vadd.f32 %v1707_v7, %v1702_v11 }
 0x7f0   : > { %v4427_v12 = vpop.eup %4426 }
 0x7f1   : > { %v1693_v14 = vmul.f32 %v4427_v12, %v1687_v10 }
 0x7f3   : > { %v1703_v16 = vmul.f32 %v1699_v15, %v1693_v14 }
 0x7f5   : > { %v1713_v19 = vadd.f32 %v1709_v17, %v1703_v16 }
 0x7f7   : > { %v1714_v20 = vpack.c.bf16 %v1713_v19, %v1712_v18 }
 0x7f9   : > { %3722 = vmatmul.mubr.msk.bf16.vlgmr.msra.gmra.mxu1 %vm372_vm1, %v1714_v20 }
 0x7fa   : > { %4059 = vmatprep.mubr.msk.bf16.mxu1 %vm4566_vm0, %v4565_v0 }
 0x8b9   : > { %v1812_v51 = vpop.f32.mrf.mxu1 }
 0x8ba   : > { %v1813_v41 = vadd.f32 %v1812_v51, %v1728_v55 }
 0x8bb   : > { %v1814_v42 = vpop.f32.mrf.mxu1 }
 0x8bc   : > { %v1821_v45 = vmul.f32 %v1813_v41, %v1813_v41  ;;  %v1815_v47 = vadd.f32 %v1814_v42, %v1732_v40 }
 0x8bd   : > { %v1816_v48 = vpop.f32.mrf.mxu1 }
 0x8be   : > { %v1825_v49 = vmul.f32 %v1821_v45, %v1813_v41  ;;  %v1822_v53 = vmul.f32 %v1815_v47, %v1815_v47  ;;  %v1817_v54 = vadd.f32 %v1816_v48, %v1728_v55  ;;  %v2038_v45 = vpop.permute.xlu1 %2037 }
 0x8bf   : > { %v1818_v56 = vpop.f32.mrf.mxu1 }
 0x8c0   : > { %v1829_v26 = vmul.f32 0.044715, %v1825_v49  ;;  %v1826_v57 = vmul.f32 %v1822_v53, %v1815_v47  ;;  %v1823_v58 = vmul.f32 %v1817_v54, %v1817_v54  ;;  %v1819_v60 = vadd.f32 %v1818_v56, %v1732_v40 }
 0x8c2   : > { %v1833_v61 = vadd.f32 %v1829_v26, %v1813_v41  ;;  %v1830_v62 = vmul.f32 0.044715, %v1826_v57  ;;  %v1827_v6 = vmul.f32 %v1823_v58, %v1817_v54  ;;  %v1824_v8 = vmul.f32 %v1819_v60, %v1819_v60 }
 0x8c4   : > { %v1837_v59 = vmul.f32 0.7978846, %v1833_v61  ;;  %v1834_v9 = vadd.f32 %v1830_v62, %v1815_v47  ;;  %v1831_v7 = vmul.f32 0.044715, %v1827_v6  ;;  %v1828_v10 = vmul.f32 %v1824_v8, %v1819_v60  ;;  %v4328_v6 = vld [vmem:[#allocation2 + $0x22c] ss:$84 sps:$4 sm:$0xff]  }
 0x8c5   : > { %v4329_v8 = vld [vmem:[#allocation2 + $0x234] ss:$84 sps:$4 sm:$0xff]   ;;  %4052 = vmatpush3.bf16.msra.mxu1 %v4328_v6 }
 0x8c6   : > { %v1838_v12 = vmul.f32 0.7978846, %v1834_v9  ;;  %v1835_v11 = vadd.f32 %v1831_v7, %v1817_v54  ;;  %v1832_v14 = vmul.f32 0.044715, %v1828_v10  ;;  %4428 = vtanh.f32 %v1837_v59  ;;  %v4330_v59 = vld [vmem:[#allocation2 + $0x184] ss:$84 sps:$4 sm:$0xff]   ;;  %4053 = vmatprep.subr.bf16.mxu1 %v4565_v0 }
 0x8c7   : > { %v4332_v9 = vld [vmem:[#allocation2 + $0xdc] ss:$84 sps:$4 sm:$0xff]   ;;  %v4333_v7 = vld [vmem:[#allocation2 + $0xe4] ss:$84 sps:$4 sm:$0xff]   ;;  %v4334_v10 = vld [vmem:[#allocation2 + $0x34] ss:$84 sps:$4 sm:$0xff]  }
 0x8c8   : > { %4430 = vtanh.f32 %v1838_v12  ;;  %v1839_v15 = vmul.f32 0.7978846, %v1835_v11  ;;  %v1836_v16 = vadd.f32 %v1832_v14, %v1819_v60  ;;  %v4335_v12 = vld [vmem:[#allocation2 + $0x3c] ss:$84 sps:$4 sm:$0xff]  }
 0x8c9   : > { %4054 = vmatpush3.bf16.msra.mxu1 %v4330_v59 }
 0x8ca   : > { %4432 = vtanh.f32 %v1839_v15  ;;  %v1840_v17 = vmul.f32 0.7978846, %v1836_v16  ;;  %4055 = vmatprep.subr.bf16.mxu1 %v4565_v0 }
 0x8cc   : > { %4434 = vtanh.f32 %v1840_v17 }
 0x8cd   : > { %4056 = vmatpush3.bf16.msra.mxu1 %v4332_v9 }
 0x8ce   : > { %4057 = vmatprep.subr.bf16.mxu1 %v4565_v0 }
 0x8d1   : > { %4058 = vmatpush3.bf16.msra.mxu1 %v4334_v10 }
 0x8d2   : > { %4063 = vmatprep.subr.bf16.mxu1 %v4565_v0 }
 0x8d3   : > { %v4429_v18 = vpop.eup %4428 }
 0x8d4   : > { %v1845_v22 = vadd.f32 1.0, %v4429_v18 }
 0x8d5   : > { %v4431_v19 = vpop.eup %4430 }
 0x8d6   : > { %v1846_v20 = vadd.f32 1.0, %v4431_v19  ;;  %v1849_v32 = vmul.f32 0.5, %v1845_v22 }
 0x8d7   : > { %v4433_v21 = vpop.eup %4432 }
 0x8d8   : > { %v1847_v25 = vadd.f32 1.0, %v4433_v21  ;;  %v1850_v33 = vmul.f32 0.5, %v1846_v20  ;;  %v1853_v35 = vmul.f32 %v1849_v32, %v1813_v41 }
 0x8d9   : > { %v4435_v27 = vpop.eup %4434 }
 0x8da   : > { %v1851_v31 = vmul.f32 0.5, %v1847_v25  ;;  %v1848_v29 = vadd.f32 1.0, %v4435_v27  ;;  %v1854_v34 = vmul.f32 %v1850_v33, %v1815_v47 }
 0x8dc   : > { %v1852_v44 = vmul.f32 0.5, %v1848_v29  ;;  %v1855_v30 = vmul.f32 %v1851_v31, %v1817_v54  ;;  %v2040_v54 = vpop.permute.xlu0 %2039 }
 0x8de   : > { %v1856_v50 = vmul.f32 %v1852_v44, %v1819_v60  ;;  %v1857_v38 = vpack.c.bf16 %v1855_v30, %v1853_v35  ;;  %v493_v44 = vsub.s32 4, %v4700_v39  ;;  %v4958_v30 = vld [vmem:[%s5166_s6] sm:$0x3f] }
 0x8e0   : > { %v1858_v36 = vpack.c.bf16 %v1856_v50, %v1854_v34  ;;  %v494_v34 = vrot.slane %v4958_v30, %v493_v44 }
 0x8e2   : > { %2026 = vmatprep.mubr.bf16.mxu0 %v1858_v36  ;;  %v749_v35 = vadd.f32 %v4781_v63, %v494_v34  ;;  %v497_v36 = vsub.s32 5, %v4700_v39 }
 0x8e3   : > { %2027 = vmatmul.mubr.bf16.vlgmr.msra.gmra.mxu0 %v1857_v38 }
 0x8e4   : > { %4083 = vmatprep.mubr.msk.bf16.mxu0 %vm4566_vm0, %v4565_v0  ;;  %4076 = vmatpush3.bf16.msra.mxu0 %v4329_v8 }
 0x8e5   : > { %4077 = vmatprep.subr.bf16.mxu0 %v4565_v0 }
 0x9a3   : > { %v3869_v46 = vpop.f32.mrf.mxu0 }
 0x9a5   : > { %v3870_v55 = vpop.f32.mrf.mxu0 }
 0x9a6   : > { %v3871_v40 = vadd.f32 %v3870_v55, %v3869_v46  ;;  %v753_v46 = vadd.f32 %v4785_v3, %v494_v34  ;;  %v4965_v55 = vadd.f32 1.0, %v749_v35 }
 0x9a7   : > { %v3872_v51 = vpop.f32.mrf.mxu0 }
 0x9a8   : > { %v2029_v42 = vadd.f32 %v3871_v40, %v3723_v52  ;;  %v498_v40 = vrot.slane %v4958_v30, %v497_v36 }
 0x9a9   : > { %v3873_v47 = vpop.f32.mrf.mxu0 }
 0x9aa   : > { %v2043_v48 = vmul.f32 %v2038_v45, %v2029_v42  ;;  %v3874_v41 = vadd.f32 %v3873_v47, %v3872_v51  ;;  %v4969_v45 = vadd.f32 1.0, %v753_v46  ;;  %v4973_v63 = vadd.f32 %v4783_v2, %v498_v40  ;;  %v4338_v2 = vld [vmem:[#allocation2 + $0xe0] ss:$84 sps:$4 sm:$0xff]  }
 0x9ac   : > { %v4931_v49 = vadd.f32 %v2043_v48, %v4888_v23  ;;  %v2032_v53 = vadd.f32 %v3874_v41, %v3723_v52  ;;  %v4976_v41 = vadd.f32 %v4787_v4, %v498_v40  ;;  %v4339_v4 = vld [vmem:[#allocation2 + $0x38] ss:$84 sps:$4 sm:$0xff]  }
 0x9ae   : > { %v2044_v56 = vmul.f32 %v2040_v54, %v2032_v53  ;;  %v2047_v26 = vsel %vm372_vm1, %v4931_v49, 0.0  ;;  %v2055_v57 = vmul.f32 %v4931_v49, %v4931_v49 }
 0x9af   : > { %2048 = vadd.xlane.f32.xlu1 %v2047_v26 }
 0x9b0   : > { %v4938_v58 = vadd.f32 %v2044_v56, %v4895_v24  ;;  %v2057_v60 = vsel %vm372_vm1, %v2055_v57, 0.0  ;;  %v4331_v24 = vld [vmem:[#allocation2 + $0x18c] ss:$84 sps:$4 sm:$0xff]   ;;  %v4336_v56 = vld [vmem:[#allocation2 + $0x230] ss:$84 sps:$4 sm:$0xff]  }
 0x9b1   : > { %2058 = vadd.xlane.f32.xlu0 %v2057_v60  ;;  %4078 = vmatpush3.bf16.msra.mxu0 %v4331_v24  ;;  %v4337_v57 = vld [vmem:[#allocation2 + $0x188] ss:$84 sps:$4 sm:$0xff]  }
 0x9b2   : > { %v2050_v23 = vsel %vm372_vm1, %v4938_v58, 0.0  ;;  %v2056_v61 = vmul.f32 %v4938_v58, %v4938_v58  ;;  %4079 = vmatprep.subr.bf16.mxu0 %v4565_v0 }
 0x9b4   : > { %v2060_v62 = vsel %vm372_vm1, %v2056_v61, 0.0  ;;  %v3740_v61 = vld [vmem:[%s5166_s6 + $0xd] ss:$0 sm:$0xff] }
 0x9b5   : > { %2051 = vadd.xlane.f32.xlu0 %v2050_v23  ;;  %4080 = vmatpush3.bf16.msra.mxu0 %v4333_v7 }
 0x9b6   : > { %4081 = vmatprep.subr.bf16.mxu0 %v4565_v0 }
 0x9b9   : > { %2061 = vadd.xlane.f32.xlu0 %v2060_v62  ;;  %4082 = vmatpush3.bf16.msra.mxu0 %v4335_v12  ;;  %v3752_v62 = vld [vmem:[%s5166_s6 + $0xf] ss:$0 sm:$0xff] }
 0x9ba   : > { %4099 = vmatprep.subr.bf16.mxu0 %v4565_v0 }
 0xa38   : > { %v2049_v11 = vpop.xlane.xlu1 %2048 }
 0xa39   : > { %v2053_v14 = vmul.f32 0.015625, %v2049_v11 }
 0xa3a   : > { %v2059_v15 = vpop.xlane.xlu0 %2058 }
 0xa3b   : > { %v2065_v16 = vmul.f32 %v2053_v14, %v2053_v14  ;;  %v2063_v17 = vmul.f32 0.015625, %v2059_v15  ;;  %v2071_v38 = vsub.f32 %v4931_v49, %v2053_v14 }
 0xa3d   : > { %v2067_v18 = vsub.f32 %v2063_v17, %v2065_v16 }
 0xa3e   : > { %v2052_v19 = vpop.xlane.xlu0 %2051 }
 0xa3f   : > { %v2069_v20 = vmax.f32 %v2067_v18, 0.0  ;;  %v2054_v21 = vmul.f32 0.015625, %v2052_v19 }
 0xa41   : > { %v2073_v22 = vadd.f32 1e-06, %v2069_v20  ;;  %v2066_v27 = vmul.f32 %v2054_v21, %v2054_v21  ;;  %v2072_v51 = vsub.f32 %v4938_v58, %v2054_v21  ;;  %v3746_v21 = vld [vmem:[%s5166_s6 + $0xe] ss:$0 sm:$0xff] }
 0xa42   : > { %v2062_v25 = vpop.xlane.xlu0 %2061 }
 0xa43   : > { %v2064_v31 = vmul.f32 0.015625, %v2062_v25  ;;  %4436 = vrsqrt.f32 %v2073_v22 }
 0xa45   : > { %v2068_v29 = vsub.f32 %v2064_v31, %v2066_v27 }
 0xa47   : > { %v2070_v33 = vmax.f32 %v2068_v29, 0.0 }
 0xa49   : > { %v2074_v32 = vadd.f32 1e-06, %v2070_v33 }
 0xa4b   : > { %4438 = vrsqrt.f32 %v2074_v32 }
 0xa50   : > { %v4437_v50 = vpop.eup %4436 }
 0xa51   : > { %v2077_v52 = vmul.f32 %v4437_v50, %v2071_v38 }
 0xa53   : > { %v2081_v48 = vmul.f32 %v4965_v55, %v2077_v52 }
 0xa55   : > { %v2083_v53 = vadd.f32 %v2081_v48, %v4973_v63 }
 0xa58   : > { %v4439_v42 = vpop.eup %4438 }
 0xa59   : > { %v2078_v47 = vmul.f32 %v4439_v42, %v2072_v51 }
 0xa5b   : > { %v2082_v3 = vmul.f32 %v4969_v45, %v2078_v47  ;;  %v4489_v47 = vld [vmem:[%s5163_s3] sm:$0xff] }
 0xa5d   : > { %v2084_v54 = vadd.f32 %v2082_v3, %v4976_v41 }
 0xa5f   : > { %v2085_v26 = vpack.c.bf16 %v2084_v54, %v2083_v53 }
 0xa61   : > { %4060 = vmatmul.mubr.msk.bf16.vlgmr.msra.gmra.mxu1 %vm372_vm1, %v2085_v26  ;;  %4084 = vmatmul.mubr.msk.bf16.vlgmr.msra.gmra.mxu0 %vm372_vm1, %v2085_v26 }
 0xa62   : > { %4064 = vmatpush3.bf16.msra.mxu1 %v4336_v56  ;;  %4071 = vmatprep.mubr.msk.bf16.mxu1 %vm4566_vm0, %v4565_v0  ;;  %v4490_v56 = vld [vmem:[%s5163_s3 + $0x8] sm:$0xff] }
 0xa63   : > { %4065 = vmatprep.subr.bf16.mxu1 %v4565_v0  ;;  %4101 = vmatprep.mubr.msk.bf16.mxu0 %vm4566_vm0, %v4565_v0 }
 0xa66   : > { %4066 = vmatpush3.bf16.msra.mxu1 %v4337_v57 }
 0xa67   : > { %4067 = vmatprep.subr.bf16.mxu1 %v4565_v0 }
 0xa6a   : > { %4068 = vmatpush3.bf16.msra.mxu1 %v4338_v2 }
 0xa6b   : > { %4069 = vmatprep.subr.bf16.mxu1 %v4565_v0 }
 0xa6e   : > { %4070 = vmatpush3.bf16.msra.mxu1 %v4339_v4 }
 0xa6f   : > { %4087 = vmatprep.subr.bf16.mxu1 %v4565_v0 }
 0xa71   : > { %4072 = vmatmul.mubr.msk.bf16.vlgmr.msra.gmra.mxu1 %vm372_vm1, %v2085_v26 }
 0xa72   : > { %4089 = vmatprep.mubr.msk.bf16.mxu1 %vm4566_vm0, %v4565_v0 }
 0xb21   : > { %v2162_v60 = vpop.f32.mrf.mxu1  ;;  %v2322_v23 = vpop.f32.mrf.mxu0 }
 0xb22   : > { %v2163_v9 = vadd.f32 %v3740_v61, %v2162_v60  ;;  %v2323_v7 = vadd.f32 %v3752_v62, %v2322_v23 }
 0xb23   : > { %v4061_v6 = vpop.f32.mrf.mxu1  ;;  %v4085_v8 = vpop.f32.mrf.mxu0 }
 0xb25   : > { %v2165_v59 = vpop.f32.mrf.mxu1  ;;  %v2325_v24 = vpop.f32.mrf.mxu0 }
 0xb26   : > { %v2166_v10 = vadd.f32 %v3740_v61, %v2165_v59  ;;  %v2326_v12 = vadd.f32 %v3752_v62, %v2325_v24 }
 0xb27   : > { %v4062_v11 = vpop.f32.mrf.mxu1  ;;  %v4086_v14 = vpop.f32.mrf.mxu0 }
 0xb28   : > { %v2329_v15 = vpack.c.bf16 %v2166_v10, %v2163_v9  ;;  %v5000_v16 = vpack.c.bf16 %v2326_v12, %v2323_v7 }
 0xb2a   : > { %2596 = vrot.lane.b32.xlu0 %v2329_v15, %s4568_s14  ;;  %2479 = vrot.lane.b32.xlu1 %v2329_v15, %s4569_s15 }
 0xb2e   : > { %2712 = vrot.lane.b32.xlu0 %v2329_v15, %s4570_s16 }
 0xb31   : > { %v2242_v17 = vpop.f32.mrf.mxu1 }
 0xb32   : > { %v2243_v22 = vadd.f32 %v3746_v21, %v2242_v17 }
 0xb33   : > { %v4073_v18 = vpop.f32.mrf.mxu1 }
 0xb35   : > { %v2245_v19 = vpop.f32.mrf.mxu1 }
 0xb36   : > { %v2246_v25 = vadd.f32 %v3746_v21, %v2245_v19 }
 0xb37   : > { %v4074_v20 = vpop.f32.mrf.mxu1 }
 0xb53   : > { %2330 = vxpose.xlu1.b32.start [1/2] (short) (narrow) %v2243_v22, 64 }
 0xb57   : > { %2331 = vxpose.xlu1.b32.end [2/2] (short) (narrow) %v2246_v25, 64 }
 0xb9c   : > { %v2480_v27 = vpop.permute.xlu1 %2479  ;;  %v2597_v46 = vpop.permute.xlu0 %2596 }
 0xba0   : > { %v2713_v51 = vpop.permute.xlu0 %2712 }
 0xbcf   : > { %v2346_v31 = vpop.trf.xlu1 }
 0xbd3   : > { %v2347_v29 = vpop.trf.xlu1 }
 0xbd4   : > { %v2362_v33 = vpack.c.bf16 %v2347_v29, %v2346_v31 }
 0xbd6   : > { %4088 = vmatpush3.bf16.msra.mxu1 %v2362_v33 }
 0xbd7   : > { %v2348_v32 = vpop.trf.xlu1  ;;  %4093 = vmatprep.subr.bf16.mxu1 %v4565_v0 }
 0xbd9   : > { %4090 = vmatmul.mubr.msk.bf16.vlgmr.msra.gmra.mxu1 %vm1080_vm3, %v2329_v15 }
 0xbda   : > { %4094 = vmatpush3.bf16.msra.mxu1 %v5000_v16  ;;  %4095 = vmatprep.mubr.msk.bf16.mxu1 %vm4566_vm0, %v4565_v0 }
 0xbdb   : > { %v2349_v44 = vpop.trf.xlu1  ;;  %4105 = vmatprep.subr.bf16.mxu1 %v4565_v0 }
 0xbdc   : > { %v2363_v34 = vpack.c.bf16 %v2349_v44, %v2348_v32 }
 0xbde   : > { %4100 = vmatpush3.bf16.msra.mxu0 %v2363_v34 }
 0xbdf   : > { %v2350_v50 = vpop.trf.xlu1  ;;  %4111 = vmatprep.subr.bf16.mxu0 %v4565_v0 }
 0xbe1   : > { %4102 = vmatmul.mubr.msk.bf16.vlgmr.msra.gmra.mxu0 %vm1080_vm3, %v2480_v27 }
 0xbe2   : > { %4113 = vmatprep.mubr.msk.bf16.mxu0 %vm4566_vm0, %v4565_v0 }
 0xbe3   : > { %v2351_v35 = vpop.trf.xlu1 }
 0xbe4   : > { %v2364_v36 = vpack.c.bf16 %v2351_v35, %v2350_v50 }
 0xbe6   : > { %4112 = vmatpush3.bf16.msra.mxu0 %v2364_v36 }
 0xbe7   : > { %v2352_v38 = vpop.trf.xlu1  ;;  %4123 = vmatprep.subr.bf16.mxu0 %v4565_v0 }
 0xbe9   : > { %4114 = vmatmul.mubr.msk.bf16.vlgmr.msra.gmra.mxu0 %vm1080_vm3, %v2597_v46 }
 0xbea   : > { %4125 = vmatprep.mubr.msk.bf16.mxu0 %vm4566_vm0, %v4565_v0 }
 0xbeb   : > { %v2353_v52 = vpop.trf.xlu1 }
 0xbec   : > { %v2365_v40 = vpack.c.bf16 %v2353_v52, %v2352_v38 }
 0xbee   : > { %4124 = vmatpush3.bf16.msra.mxu0 %v2365_v40 }
 0xbef   : > { %4135 = vmatprep.subr.bf16.mxu0 %v4565_v0 }
 0xbf1   : > { %4126 = vmatmul.mubr.msk.bf16.vlgmr.msra.gmra.mxu0 %vm1080_vm3, %v2713_v51 }
 0xbf2   : > { %4143 = vmatprep.mubr.msk.bf16.mxu0 %vm4566_vm0, %v4565_v0 }
 0xc99   : > { %v2404_v42 = vpop.f32.mrf.mxu1 }
 0xc9a   : > { %v2405_v48 = vadd.f32 %v4489_v47, %v2404_v42 }
 0xc9b   : > { %v4091_v3 = vpop.f32.mrf.mxu1 }
 0xc9c   : > { %v2411_v53 = vsel %vm1080_vm3, %v2405_v48, -inf }
 0xc9d   : > { %2412 = vmax.xlane.f32.xlu0 %v2411_v53  ;;  %v2407_v54 = vpop.f32.mrf.mxu1 }
 0xc9e   : > { %v2408_v26 = vadd.f32 %v4490_v56, %v2407_v54 }
 0xc9f   : > { %v4092_v57 = vpop.f32.mrf.mxu1 }
 0xca0   : > { %v2414_v2 = vsel %vm1080_vm3, %v2408_v26, -inf }
 0xca1   : > { %v2518_v4 = vpop.f32.mrf.mxu0  ;;  %2415 = vmax.xlane.f32.xlu0 %v2414_v2 }
 0xca2   : > { %v2519_v60 = vadd.f32 %v4489_v47, %v2518_v4 }
 0xca3   : > { %v4103_v23 = vpop.f32.mrf.mxu0 }
 0xca4   : > { %v2525_v61 = vsel %vm1080_vm3, %v2519_v60, -inf }
 0xca5   : > { %2526 = vmax.xlane.f32.xlu1 %v2525_v61  ;;  %v2521_v62 = vpop.f32.mrf.mxu0 }
 0xca6   : > { %v2522_v6 = vadd.f32 %v4490_v56, %v2521_v62 }
 0xca7   : > { %v4104_v8 = vpop.f32.mrf.mxu0 }
 0xca8   : > { %v2528_v59 = vsel %vm1080_vm3, %v2522_v6, -inf }
 0xca9   : > { %v2635_v24 = vpop.f32.mrf.mxu0  ;;  %2529 = vmax.xlane.f32.xlu0 %v2528_v59 }
 0xcaa   : > { %v2636_v9 = vadd.f32 %v4489_v47, %v2635_v24 }
 0xcab   : > { %v4115_v7 = vpop.f32.mrf.mxu0 }
 0xcac   : > { %v2642_v10 = vsel %vm1080_vm3, %v2636_v9, -inf }
 0xcad   : > { %v2638_v12 = vpop.f32.mrf.mxu0  ;;  %2643 = vmax.xlane.f32.xlu0 %v2642_v10 }
 0xcae   : > { %v2639_v11 = vadd.f32 %v4490_v56, %v2638_v12 }
 0xcaf   : > { %v4116_v14 = vpop.f32.mrf.mxu0 }
 0xcb0   : > { %v2645_v15 = vsel %vm1080_vm3, %v2639_v11, -inf }
 0xcb1   : > { %v2751_v17 = vpop.f32.mrf.mxu0  ;;  %2646 = vmax.xlane.f32.xlu0 %v2645_v15 }
 0xcb2   : > { %v2752_v18 = vadd.f32 %v4489_v47, %v2751_v17 }
 0xcb3   : > { %v4127_v19 = vpop.f32.mrf.mxu0 }
 0xcb4   : > { %v2758_v20 = vsel %vm1080_vm3, %v2752_v18, -inf }
 0xcb5   : > { %v2754_v21 = vpop.f32.mrf.mxu0  ;;  %2759 = vmax.xlane.f32.xlu0 %v2758_v20 }
 0xcb6   : > { %v2755_v22 = vadd.f32 %v4490_v56, %v2754_v21  ;;  %2665 = vrot.lane.b32.xlu1 %v5000_v16, %s4568_s14 }
 0xcb7   : > { %v4128_v25 = vpop.f32.mrf.mxu0 }
 0xcb8   : > { %v2761_v27 = vsel %vm1080_vm3, %v2755_v22, -inf }
 0xcb9   : > { %2762 = vmax.xlane.f32.xlu0 %v2761_v27 }
 0xccf   : > { %2549 = vrot.lane.b32.xlu0 %v5000_v16, %s4569_s15 }
 0xd26   : > { %v2413_v31 = vpop.xlane.xlu0 %2412 }
 0xd27   : > { %v2417_v29 = vsub.f32 %v2405_v48, %v2413_v31 }
 0xd29   : > { %v2419_v33 = vmul.f32 1.442695, %v2417_v29 }
 0xd2a   : > { %v2416_v32 = vpop.xlane.xlu0 %2415 }
 0xd2b   : > { %4440 = vpow2.f32 %v2419_v33  ;;  %v2418_v44 = vsub.f32 %v2408_v26, %v2416_v32 }
 0xd2d   : > { %v2421_v34 = vmul.f32 1.442695, %v2418_v44 }
 0xd2e   : > { %v2527_v50 = vpop.xlane.xlu1 %2526 }
 0xd2f   : > { %4442 = vpow2.f32 %v2421_v34  ;;  %v2531_v35 = vsub.f32 %v2519_v60, %v2527_v50 }
 0xd31   : > { %v2533_v36 = vmul.f32 1.442695, %v2531_v35 }
 0xd32   : > { %v2530_v38 = vpop.xlane.xlu0 %2529 }
 0xd33   : > { %4444 = vpow2.f32 %v2533_v36  ;;  %v2532_v46 = vsub.f32 %v2522_v6, %v2530_v38 }
 0xd35   : > { %v2535_v52 = vmul.f32 1.442695, %v2532_v46  ;;  %v2666_v46 = vpop.permute.xlu1 %2665 }
 0xd36   : > { %v2644_v40 = vpop.xlane.xlu0 %2643 }
 0xd37   : > { %4446 = vpow2.f32 %v2535_v52  ;;  %v2648_v51 = vsub.f32 %v2636_v9, %v2644_v40 }
 0xd38   : > { %v4441_v42 = vpop.eup %4440 }
 0xd39   : > { %v2650_v47 = vmul.f32 1.442695, %v2648_v51  ;;  %v2423_v48 = vsel %vm1080_vm3, %v4441_v42, 0.0 }
 0xd3a   : > { %2424 = vadd.xlane.f32.xlu0 %v2423_v48  ;;  %v2647_v3 = vpop.xlane.xlu0 %2646 }
 0xd3b   : > { %4448 = vpow2.f32 %v2650_v47  ;;  %v2649_v53 = vsub.f32 %v2639_v11, %v2647_v3 }
 0xd3c   : > { %v4443_v54 = vpop.eup %4442 }
 0xd3d   : > { %v2652_v56 = vmul.f32 1.442695, %v2649_v53  ;;  %v2426_v26 = vsel %vm1080_vm3, %v4443_v54, 0.0 }
 0xd3e   : > { %2427 = vadd.xlane.f32.xlu0 %v2426_v26  ;;  %v2760_v57 = vpop.xlane.xlu0 %2759 }
 0xd3f   : > { %4450 = vpow2.f32 %v2652_v56  ;;  %v2764_v2 = vsub.f32 %v2752_v18, %v2760_v57 }
 0xd40   : > { %v4445_v4 = vpop.eup %4444 }
 0xd41   : > { %v2766_v60 = vmul.f32 1.442695, %v2764_v2  ;;  %v2537_v23 = vsel %vm1080_vm3, %v4445_v4, 0.0 }
 0xd42   : > { %2538 = vadd.xlane.f32.xlu0 %v2537_v23  ;;  %v2763_v61 = vpop.xlane.xlu0 %2762 }
 0xd43   : > { %4452 = vpow2.f32 %v2766_v60  ;;  %v2765_v62 = vsub.f32 %v2755_v22, %v2763_v61  ;;  %v4340_v60 = vld [vmem:[#allocation2 + $0x238] ss:$84 sps:$4 sm:$0xff]  }
 0xd44   : > { %v4447_v6 = vpop.eup %4446  ;;  %4136 = vmatpush3.bf16.msra.mxu0 %v4340_v60 }
 0xd45   : > { %v2768_v8 = vmul.f32 1.442695, %v2765_v62  ;;  %v2540_v59 = vsel %vm1080_vm3, %v4447_v6, 0.0  ;;  %4137 = vmatprep.subr.bf16.mxu0 %v4565_v0 }
 0xd46   : > { %2541 = vadd.xlane.f32.xlu0 %v2540_v59  ;;  %v2550_v17 = vpop.permute.xlu0 %2549 }
 0xd47   : > { %4454 = vpow2.f32 %v2768_v8 }
 0xd48   : > { %v4449_v24 = vpop.eup %4448 }
 0xd49   : > { %v2654_v9 = vsel %vm1080_vm3, %v4449_v24, 0.0 }
 0xd4a   : > { %2655 = vadd.xlane.f32.xlu0 %v2654_v9 }
 0xd4c   : > { %v4451_v7 = vpop.eup %4450 }
 0xd4d   : > { %v2657_v10 = vsel %vm1080_vm3, %v4451_v7, 0.0 }
 0xd4e   : > { %2658 = vadd.xlane.f32.xlu0 %v2657_v10  ;;  %v4343_v10 = vld [vmem:[#allocation2 + $0x40] ss:$84 sps:$4 sm:$0xff]  }
 0xd50   : > { %v4453_v12 = vpop.eup %4452 }
 0xd51   : > { %v2770_v11 = vsel %vm1080_vm3, %v4453_v12, 0.0 }
 0xd52   : > { %2771 = vadd.xlane.f32.xlu0 %v2770_v11 }
 0xd54   : > { %v4455_v14 = vpop.eup %4454 }
 0xd55   : > { %v2773_v15 = vsel %vm1080_vm3, %v4455_v14, 0.0 }
 0xd56   : > { %2774 = vadd.xlane.f32.xlu0 %v2773_v15 }
 0xd6c   : > { %2781 = vrot.lane.b32.xlu0 %v5000_v16, %s4570_s16 }
 0xdc3   : > { %v2425_v18 = vpop.xlane.xlu0 %2424 }
 0xdc4   : > { %4456 = vrcp.f32 %v2425_v18 }
 0xdc7   : > { %v2428_v19 = vpop.xlane.xlu0 %2427 }
 0xdc8   : > { %4458 = vrcp.f32 %v2428_v19 }
 0xdcb   : > { %v2539_v20 = vpop.xlane.xlu0 %2538 }
 0xdcc   : > { %4460 = vrcp.f32 %v2539_v20 }
 0xdcf   : > { %v2542_v21 = vpop.xlane.xlu0 %2541 }
 0xdd0   : > { %4462 = vrcp.f32 %v2542_v21 }
 0xdd1   : > { %v4457_v22 = vpop.eup %4456 }
 0xdd2   : > { %v2431_v31 = vmul.f32 %v4457_v22, %v4441_v42 }
 0xdd3   : > { %v2656_v25 = vpop.xlane.xlu0 %2655 }
 0xdd4   : > { %4464 = vrcp.f32 %v2656_v25 }
 0xdd5   : > { %v4459_v27 = vpop.eup %4458 }
 0xdd6   : > { %v2432_v29 = vmul.f32 %v4459_v27, %v4443_v54 }
 0xdd7   : > { %v2659_v33 = vpop.xlane.xlu0 %2658 }
 0xdd8   : > { %4466 = vrcp.f32 %v2659_v33  ;;  %v2433_v32 = vpack.c.bf16 %v2432_v29, %v2431_v31 }
 0xdd9   : > { %v4461_v16 = vpop.eup %4460 }
 0xdda   : > { %4096 = vmatmul.mubr.msk.bf16.vlgmr.msra.gmra.mxu1 %vm1080_vm3, %v2433_v32  ;;  %v2545_v50 = vmul.f32 %v4461_v16, %v4445_v4 }
 0xddb   : > { %4106 = vmatpush3.bf16.msra.mxu1 %v2550_v17  ;;  %v2772_v44 = vpop.xlane.xlu0 %2771  ;;  %4107 = vmatprep.mubr.msk.bf16.mxu1 %vm4566_vm0, %v4565_v0 }
 0xddc   : > { %4117 = vmatprep.subr.bf16.mxu1 %v4565_v0  ;;  %4468 = vrcp.f32 %v2772_v44 }
 0xddd   : > { %v4463_v34 = vpop.eup %4462 }
 0xdde   : > { %v2546_v35 = vmul.f32 %v4463_v34, %v4447_v6  ;;  %v4341_v6 = vld [vmem:[#allocation2 + $0x190] ss:$84 sps:$4 sm:$0xff]  }
 0xddf   : > { %v2775_v36 = vpop.xlane.xlu0 %2774  ;;  %4138 = vmatpush3.bf16.msra.mxu0 %v4341_v6  ;;  %v4347_v6 = vld [vmem:[#allocation2 + $0x194] ss:$84 sps:$4 sm:$0xff]  }
 0xde0   : > { %4470 = vrcp.f32 %v2775_v36  ;;  %v2547_v38 = vpack.c.bf16 %v2546_v35, %v2545_v50  ;;  %4139 = vmatprep.subr.bf16.mxu0 %v4565_v0 }
 0xde1   : > { %v4465_v52 = vpop.eup %4464 }
 0xde2   : > { %4108 = vmatmul.mubr.msk.bf16.vlgmr.msra.gmra.mxu1 %vm1080_vm3, %v2547_v38  ;;  %v2662_v51 = vmul.f32 %v4465_v52, %v4449_v24  ;;  %v4342_v24 = vld [vmem:[#allocation2 + $0xe8] ss:$84 sps:$4 sm:$0xff]   ;;  %v489_v52 = vsub.s32 3, %v4700_v39 }
 0xde3   : > { %4118 = vmatpush3.bf16.msra.mxu1 %v2666_v46  ;;  %4119 = vmatprep.mubr.msk.bf16.mxu1 %vm4566_vm0, %v4565_v0  ;;  %v2782_v48 = vpop.permute.xlu0 %2781 }
 0xde4   : > { %4129 = vmatprep.subr.bf16.mxu1 %v4565_v0  ;;  %4140 = vmatpush3.bf16.msra.mxu0 %v4342_v24 }
 0xde5   : > { %v4467_v40 = vpop.eup %4466  ;;  %4141 = vmatprep.subr.bf16.mxu0 %v4565_v0 }
 0xde6   : > { %v2663_v42 = vmul.f32 %v4467_v40, %v4451_v7  ;;  %v490_v40 = vrot.slane %v4958_v30, %v489_v52  ;;  %v4356_v52 = vld [vmem:[#allocation4 + $0xf4] ss:$8 sps:$4 sm:$0xff]  }
 0xde8   : > { %v2664_v47 = vpack.c.bf16 %v2663_v42, %v2662_v51  ;;  %4142 = vmatpush3.bf16.msra.mxu0 %v4343_v10  ;;  %v3766_v51 = vld [vmem:[%s5166_s6 + $0x10] ss:$0 sm:$0xff] }
 0xde9   : > { %v4469_v3 = vpop.eup %4468  ;;  %3911 = vmatprep.subr.bf16.mxu0 %v4356_v52 }
 0xdea   : > { %4120 = vmatmul.mubr.msk.bf16.vlgmr.msra.gmra.mxu1 %vm1080_vm3, %v2664_v47  ;;  %v2778_v54 = vmul.f32 %v4469_v3, %v4453_v12  ;;  %v708_v47 = vadd.f32 %v4753_v43, %v490_v40 }
 0xdeb   : > { %4130 = vmatpush3.bf16.msra.mxu1 %v2782_v48  ;;  %4131 = vmatprep.mubr.msk.bf16.mxu1 %vm4566_vm0, %v4565_v0 }
 0xded   : > { %v4471_v53 = vpop.eup %4470 }
 0xdee   : > { %v2779_v56 = vmul.f32 %v4471_v53, %v4455_v14 }
 0xdf0   : > { %v2780_v26 = vpack.c.bf16 %v2779_v56, %v2778_v54  ;;  %v712_v56 = vadd.f32 %v4789_v5, %v490_v40  ;;  %v4357_v40 = vld [vmem:[#allocation4 + $0x74] ss:$8 sps:$4 sm:$0xff]  }
 0xdf2   : > { %4132 = vmatmul.mubr.msk.bf16.vlgmr.msra.gmra.mxu1 %vm1080_vm3, %v2780_v26 }
 0xdf3   : > { %3094 = vmatprep.mubr.bf16.mxu1 %v4567_v1 }
 0xe9a   : > { %v2471_v57 = vpop.f32.mrf.mxu1 }
 0xe9c   : > { %v4097_v2 = vpop.f32.mrf.mxu1 }
 0xe9e   : > { %v2474_v4 = vpop.f32.mrf.mxu1 }
 0xea0   : > { %v4098_v23 = vpop.f32.mrf.mxu1 }
 0xea2   : > { %v2589_v61 = vpop.f32.mrf.mxu1 }
 0xea4   : > { %v4109_v62 = vpop.f32.mrf.mxu1 }
 0xea5   : > { %v4349_v62 = vld [vmem:[#allocation2 + $0x198] ss:$84 sps:$4 sm:$0xff]  }
 0xea6   : > { %v2592_v8 = vpop.f32.mrf.mxu1 }
 0xea7   : > { %v4229_v59 = vpack.i.bf16 %v2592_v8, %v2589_v61  ;;  %v4344_v61 = vld [vmem:[#allocation2 + $0x23c] ss:$84 sps:$4 sm:$0xff]   ;;  %v4353_v8 = vld [vmem:[#allocation2 + $0x44] ss:$84 sps:$4 sm:$0xff]  }
 0xea8   : > { %v4110_v9 = vpop.f32.mrf.mxu1 }
 0xea9   : > { %4230 = vrot.lane.b32.xlu1 %v4229_v59, %s4571_s27 }
 0xeaa   : > { %v2705_v1 = vpop.f32.mrf.mxu1 }
 0xeac   : > { %v4121_v7 = vpop.f32.mrf.mxu1 }
 0xeae   : > { %v2708_v12 = vpop.f32.mrf.mxu1 }
 0xeaf   : > { %v4234_v11 = vpack.i.bf16 %v2708_v12, %v2705_v1 }
 0xeb0   : > { %v4122_v14 = vpop.f32.mrf.mxu1 }
 0xeb1   : > { %4235 = vrot.lane.b32.xlu0 %v4234_v11, %s4572_s28 }
 0xeb2   : > { %v2821_v15 = vpop.f32.mrf.mxu1 }
 0xeb4   : > { %v4133_v17 = vpop.f32.mrf.mxu1 }
 0xeb6   : > { %v2824_v18 = vpop.f32.mrf.mxu1 }
 0xeb7   : > { %v4239_v19 = vpack.i.bf16 %v2824_v18, %v2821_v15 }
 0xeb8   : > { %v4134_v20 = vpop.f32.mrf.mxu1 }
 0xeb9   : > { %4240 = vrot.lane.b32.xlu1 %v4239_v19, %s4573_s29 }
 0xf1b   : > { %v4231_v21 = vpop.permute.xlu1 %4230 }
 0xf1c   : > { %v4233_v25 = vunpack.i.h.bf16 %v4231_v21  ;;  %v4232_v27 = vunpack.i.l.bf16 %v4231_v21 }
 0xf1e   : > { %v2853_v32 = vsel %vm1080_vm3, %v2474_v4, %v4233_v25  ;;  %v2852_v16 = vsel %vm1080_vm3, %v2471_v57, %v4232_v27 }
 0xf23   : > { %v4236_v22 = vpop.permute.xlu0 %4235 }
 0xf24   : > { %v4238_v31 = vunpack.i.h.bf16 %v4236_v22  ;;  %v4237_v29 = vunpack.i.l.bf16 %v4236_v22 }
 0xf26   : > { %v2855_v50 = vsel %vm1568_vm4, %v2853_v32, %v4238_v31  ;;  %v2854_v35 = vsel %vm1568_vm4, %v2852_v16, %v4237_v29 }
 0xf2b   : > { %v4241_v33 = vpop.permute.xlu1 %4240 }
 0xf2c   : > { %v4243_v44 = vunpack.i.h.bf16 %v4241_v33  ;;  %v4242_v34 = vunpack.i.l.bf16 %v4241_v33 }
 0xf2e   : > { %v2857_v36 = vsel %vm1571_vm5, %v2855_v50, %v4243_v44  ;;  %v2856_v38 = vsel %vm1571_vm5, %v2854_v35, %v4242_v34 }
 0xf2f   : > { %v2858_v46 = vpack.c.bf16 %v2857_v36, %v2856_v38 }
 0xf31   : > { %4144 = vmatmul.mubr.msk.bf16.vlgmr.msra.gmra.mxu0 %vm372_vm1, %v2858_v46 }
 0xf32   : > { %3912 = vmatpush3.bf16.msra.mxu0 %v4357_v40 }
 0xff1   : > { %v2935_v42 = vpop.f32.mrf.mxu0 }
 0xff2   : > { %v2936_v48 = vadd.f32 %v3766_v51, %v2935_v42  ;;  %v4359_v42 = vld [vmem:[#allocation4 + $0x64] ss:$8 sps:$4 sm:$0xff]  }
 0xff3   : > { %v4145_v3 = vpop.f32.mrf.mxu0 }
 0xff4   : > { %v2942_v53 = vmul.f32 %v2936_v48, %v708_v47  ;;  %v4361_v48 = vld [vmem:[#allocation4 + $0x54] ss:$8 sps:$4 sm:$0xff]   ;;  %v4362_v3 = vld [vmem:[#allocation4 + $0xc4] ss:$8 sps:$4 sm:$0xff]  }
 0xff5   : > { %v2938_v54 = vpop.f32.mrf.mxu0 }
 0xff6   : > { %v5088_v26 = vadd.f32 %v2942_v53, %v4931_v49  ;;  %v2939_v57 = vadd.f32 %v3766_v51, %v2938_v54  ;;  %v4358_v51 = vld [vmem:[#allocation4 + $0xe4] ss:$8 sps:$4 sm:$0xff]   ;;  %v4364_v54 = vld [vmem:[#allocation4 + $0xb4] ss:$8 sps:$4 sm:$0xff]  }
 0xff7   : > { %v4146_v39 = vpop.f32.mrf.mxu0  ;;  %3913 = vmatprep.subr.bf16.mxu0 %v4358_v51  ;;  %v4363_v53 = vld [vmem:[#allocation4 + $0x44] ss:$8 sps:$4 sm:$0xff]  }
 0xff8   : > { %v2943_v2 = vmul.f32 %v2939_v57, %v712_v56  ;;  %v2946_v30 = vsel %vm372_vm1, %v5088_v26, 0.0  ;;  %v2954_v4 = vmul.f32 %v5088_v26, %v5088_v26  ;;  %3914 = vmatpush3.bf16.msra.mxu0 %v4359_v42  ;;  %v4366_v57 = vld [vmem:[#allocation4 + $0xa4] ss:$8 sps:$4 sm:$0xff]  }
 0xff9   : > { %2947 = vadd.xlane.f32.xlu0 %v2946_v30  ;;  %v4367_v39 = vld [vmem:[#allocation4 + $0x24] ss:$8 sps:$4 sm:$0xff]   ;;  %v4369_v30 = vld [vmem:[#allocation4 + $0x14] ss:$8 sps:$4 sm:$0xff]  }
 0xffa   : > { %v5095_v43 = vadd.f32 %v2943_v2, %v4938_v58  ;;  %v2956_v60 = vsel %vm372_vm1, %v2954_v4, 0.0  ;;  %v4346_v58 = vld [vmem:[#allocation2 + $0x240] ss:$84 sps:$4 sm:$0xff]   ;;  %v4370_v4 = vld [vmem:[#allocation4 + $0x84] ss:$8 sps:$4 sm:$0xff]  }
 0xffb   : > { %3070 = vmatprep.subr.bf16.mxu1 %v4346_v58  ;;  %v4368_v2 = vld [vmem:[#allocation4 + $0x94] ss:$8 sps:$4 sm:$0xff]   ;;  %v4375_v58 = vld [vmem:[#allocation2 + $0x4c] ss:$84 sps:$4 sm:$0xff]  }
 0xffc   : > { %v2949_v5 = vsel %vm372_vm1, %v5095_v43, 0.0  ;;  %v2955_v49 = vmul.f32 %v5095_v43, %v5095_v43  ;;  %3071 = vmatpush1.bf16.msra.mxu1 %v4344_v61  ;;  %v3007_v61 = vld [vmem:[%s5166_s6 + $0x11] sm:$0x3] }
 0xffd   : > { %2957 = vadd.xlane.f32.xlu0 %v2956_v60  ;;  %2950 = vadd.xlane.f32.xlu1 %v2949_v5  ;;  %v4371_v60 = vld [vmem:[#allocation4 + $0x4] ss:$8 sps:$4 sm:$0xff]  }
 0xffe   : > { %v2959_v23 = vsel %vm372_vm1, %v2955_v49, 0.0  ;;  %3072 = vmatprep.subr.bf16.mxu1 %v4349_v62  ;;  %v4372_v5 = vld [vmem:[#allocation2 + $0x244] ss:$84 sps:$4 sm:$0xff]   ;;  %v4373_v49 = vld [vmem:[#allocation2 + $0x19c] ss:$84 sps:$4 sm:$0xff]   ;;  %v3012_v62 = vrot.slane %v3007_v61, %v4878_v13 }
0x1000   : > { %3073 = vmatpush1.bf16.msra.mxu1 %v4347_v6  ;;  %v3016_v6 = vrot.slane %v3007_v61, %v4739_v28 }
0x1001   : > { %2960 = vadd.xlane.f32.xlu0 %v2959_v23  ;;  %v4374_v23 = vld [vmem:[#allocation2 + $0xf4] ss:$84 sps:$4 sm:$0xff]  }
0x100e   : > { %2982 = vrot.lane.b32.xlu1 %v4969_v45, %s4574_s9  ;;  %v4352_v45 = vld [vmem:[#allocation2 + $0xf0] ss:$84 sps:$4 sm:$0xff]  }
0x100f   : > { %3074 = vmatprep.subr.bf16.mxu1 %v4352_v45 }
0x1012   : > { %2990 = vrot.lane.b32.xlu1 %v4973_v63, %s4574_s9  ;;  %v4350_v63 = vld [vmem:[#allocation2 + $0xec] ss:$84 sps:$4 sm:$0xff]  }
0x1013   : > { %3075 = vmatpush1.bf16.msra.mxu1 %v4350_v63 }
0x1016   : > { %2992 = vrot.lane.b32.xlu1 %v4976_v41, %s4574_s9  ;;  %v4355_v41 = vld [vmem:[#allocation2 + $0x48] ss:$84 sps:$4 sm:$0xff]  }
0x1017   : > { %2980 = vrot.lane.b32.xlu0 %v4965_v55, %s4574_s9  ;;  %3076 = vmatprep.subr.bf16.mxu1 %v4355_v41 }
0x1018   : > { %3077 = vmatpush1.bf16.msra.mxu1 %v4353_v8 }
0x1019   : > { %4147 = vmatprep.subr.bf16.mxu1 %v4565_v0 }
0x101a   : > { %3323 = vrot.lane.b32.xlu1 %v712_v56, %s4574_s9  ;;  %v4365_v56 = vld [vmem:[#allocation4 + $0x34] ss:$8 sps:$4 sm:$0xff]  }
0x101b   : > { %3321 = vrot.lane.b32.xlu0 %v708_v47, %s4574_s9  ;;  %v4360_v47 = vld [vmem:[#allocation4 + $0xd4] ss:$8 sps:$4 sm:$0xff]  }
0x101c   : > { %3915 = vmatprep.subr.bf16.mxu0 %v4360_v47 }
0x101d   : > { %3916 = vmatpush3.bf16.msra.mxu0 %v4361_v48 }
0x101e   : > { %3917 = vmatprep.subr.bf16.mxu0 %v4362_v3 }
0x1021   : > { %3918 = vmatpush3.bf16.msra.mxu0 %v4363_v53 }
0x1022   : > { %3919 = vmatprep.subr.bf16.mxu0 %v4364_v54 }
0x1025   : > { %3920 = vmatpush3.bf16.msra.mxu0 %v4365_v56 }
0x1026   : > { %3921 = vmatprep.subr.bf16.mxu0 %v4366_v57 }
0x1029   : > { %3922 = vmatpush3.bf16.msra.mxu0 %v4367_v39 }
0x102a   : > { %3923 = vmatprep.subr.bf16.mxu0 %v4368_v2 }
0x102d   : > { %3924 = vmatpush3.bf16.msra.mxu0 %v4369_v30  ;;  %v3781_v30 = vld [vmem:[%s5166_s6 + $0x13] ss:$0 sm:$0xff] }
0x102e   : > { %3925 = vmatprep.subr.bf16.mxu0 %v4370_v4 }
0x1031   : > { %3926 = vmatpush3.bf16.msra.mxu0 %v4371_v60 }
0x1082   : > { %v2948_v55 = vpop.xlane.xlu0 %2947 }
0x1083   : > { %v2952_v59 = vmul.f32 0.015625, %v2948_v55 }
0x1085   : > { %v2964_v1 = vmul.f32 %v2952_v59, %v2952_v59  ;;  %v2970_v25 = vsub.f32 %v5088_v26, %v2952_v59 }
0x1086   : > { %v2958_v24 = vpop.xlane.xlu0 %2957  ;;  %v2951_v9 = vpop.xlane.xlu1 %2950 }
0x1087   : > { %v2962_v7 = vmul.f32 0.015625, %v2958_v24  ;;  %v2953_v10 = vmul.f32 0.015625, %v2951_v9 }
0x1089   : > { %v2966_v12 = vsub.f32 %v2962_v7, %v2964_v1  ;;  %v2965_v15 = vmul.f32 %v2953_v10, %v2953_v10  ;;  %v2971_v33 = vsub.f32 %v5095_v43, %v2953_v10 }
0x108a   : > { %v2961_v11 = vpop.xlane.xlu0 %2960  ;;  %v2983_v22 = vpop.permute.xlu1 %2982 }
0x108b   : > { %v2968_v14 = vmax.f32 %v2966_v12, 0.0  ;;  %v2963_v17 = vmul.f32 0.015625, %v2961_v11 }
0x108d   : > { %v2972_v18 = vadd.f32 1e-06, %v2968_v14  ;;  %v2967_v19 = vsub.f32 %v2963_v17, %v2965_v15 }
0x108e   : > { %v2991_v29 = vpop.permute.xlu1 %2990  ;;  %v2981_v16 = vpop.permute.xlu0 %2980 }
0x108f   : > { %4472 = vrsqrt.f32 %v2972_v18  ;;  %v2969_v20 = vmax.f32 %v2967_v19, 0.0 }
0x1091   : > { %v2973_v21 = vadd.f32 1e-06, %v2969_v20 }
0x1092   : > { %v2993_v35 = vpop.permute.xlu1 %2992 }
0x1093   : > { %4474 = vrsqrt.f32 %v2973_v21 }
0x109c   : > { %v4473_v27 = vpop.eup %4472 }
0x109d   : > { %v2976_v31 = vmul.f32 %v4473_v27, %v2970_v25 }
0x109f   : > { %v2986_v34 = vmul.f32 %v2981_v16, %v2976_v31 }
0x10a0   : > { %v4475_v32 = vpop.eup %4474 }
0x10a1   : > { %v2977_v44 = vmul.f32 %v4475_v32, %v2971_v33  ;;  %v2996_v36 = vadd.f32 %v2991_v29, %v2986_v34 }
0x10a3   : > { %v2987_v50 = vmul.f32 %v2983_v22, %v2977_v44 }
0x10a5   : > { %v2997_v38 = vadd.f32 %v2993_v35, %v2987_v50 }
0x10a7   : > { %v2998_v46 = vpack.c.bf16 %v2997_v38, %v2996_v36 }
0x10a9   : > { %3780 = vmatmul.mubr.msk.bf16.vlgmr.msra.gmra.mxu1 %vm372_vm1, %v2998_v46 }
0x10aa   : > { %4155 = vmatprep.mubr.msk.bf16.mxu1 %vm4566_vm0, %v4565_v0  ;;  %4148 = vmatpush3.bf16.msra.mxu1 %v4372_v5 }
0x10ab   : > { %4149 = vmatprep.subr.bf16.mxu1 %v4565_v0 }
0x10ae   : > { %4150 = vmatpush3.bf16.msra.mxu1 %v4373_v49 }
0x10af   : > { %4151 = vmatprep.subr.bf16.mxu1 %v4565_v0 }
0x10b2   : > { %4152 = vmatpush3.bf16.msra.mxu1 %v4374_v23  ;;  %v3322_v23 = vpop.permute.xlu0 %3321 }
0x10b3   : > { %4153 = vmatprep.subr.bf16.mxu1 %v4565_v0 }
0x10b6   : > { %4154 = vmatpush3.bf16.msra.mxu1 %v4375_v58 }
0x10b7   : > { %4159 = vmatprep.subr.bf16.mxu1 %v4565_v0 }
0x10b9   : > { %4156 = vmatmul.mubr.msk.bf16.vlgmr.msra.gmra.mxu1 %vm372_vm1, %v4691_v37 }
0x10ba   : > { %4167 = vmatprep.mubr.msk.bf16.mxu1 %vm4566_vm0, %v4565_v0 }
0x1169   : > { %v3096_v45 = vpop.f32.mrf.mxu1 }
0x116a   : > { %v3097_v63 = vadd.f32 %v3096_v45, %v3012_v62 }
0x116b   : > { %v3098_v41 = vpop.f32.mrf.mxu1 }
0x116c   : > { %v3105_v8 = vmul.f32 %v3097_v63, %v3097_v63  ;;  %v3099_v55 = vadd.f32 %v3098_v41, %v3016_v6 }
0x116d   : > { %v3100_v59 = vpop.f32.mrf.mxu1 }
0x116e   : > { %v3109_v24 = vmul.f32 %v3105_v8, %v3097_v63  ;;  %v3106_v9 = vmul.f32 %v3099_v55, %v3099_v55  ;;  %v3101_v37 = vadd.f32 %v3100_v59, %v3012_v62 }
0x116f   : > { %v3102_v1 = vpop.f32.mrf.mxu1 }
0x1170   : > { %v3113_v7 = vmul.f32 0.044715, %v3109_v24  ;;  %v3110_v10 = vmul.f32 %v3106_v9, %v3099_v55  ;;  %v3107_v12 = vmul.f32 %v3101_v37, %v3101_v37  ;;  %v3103_v11 = vadd.f32 %v3102_v1, %v3016_v6 }
0x1172   : > { %v3117_v14 = vadd.f32 %v3113_v7, %v3097_v63  ;;  %v3114_v15 = vmul.f32 0.044715, %v3110_v10  ;;  %v3111_v17 = vmul.f32 %v3107_v12, %v3101_v37  ;;  %v3108_v13 = vmul.f32 %v3103_v11, %v3103_v11  ;;  %v4376_v12 = vld [vmem:[#allocation2 + $0x248] ss:$84 sps:$4 sm:$0xff]  }
0x1173   : > { %4160 = vmatpush3.bf16.msra.mxu1 %v4376_v12 }
0x1174   : > { %v3121_v18 = vmul.f32 0.7978846, %v3117_v14  ;;  %v3118_v28 = vadd.f32 %v3114_v15, %v3099_v55  ;;  %v3115_v19 = vmul.f32 0.044715, %v3111_v17  ;;  %v3112_v20 = vmul.f32 %v3108_v13, %v3103_v11  ;;  %4161 = vmatprep.subr.bf16.mxu1 %v4565_v0  ;;  %v4379_v14 = vld [vmem:[#allocation2 + $0x50] ss:$84 sps:$4 sm:$0xff]  }
0x1176   : > { %v3122_v21 = vmul.f32 0.7978846, %v3118_v28  ;;  %v3119_v22 = vadd.f32 %v3115_v19, %v3101_v37  ;;  %v3116_v25 = vmul.f32 0.044715, %v3112_v20  ;;  %4476 = vtanh.f32 %v3121_v18 }
0x1178   : > { %4478 = vtanh.f32 %v3122_v21  ;;  %v3123_v27 = vmul.f32 0.7978846, %v3119_v22  ;;  %v3120_v31 = vadd.f32 %v3116_v25, %v3103_v11 }
0x1179   : > { %v3404_v54 = vpop.f32.mrf.mxu1 }
0x117a   : > { %4480 = vtanh.f32 %v3123_v27  ;;  %v3124_v29 = vmul.f32 0.7978846, %v3120_v31 }
0x117b   : > { %v4157_v56 = vpop.f32.mrf.mxu1 }
0x117c   : > { %4482 = vtanh.f32 %v3124_v29 }
0x117d   : > { %v3407_v57 = vpop.f32.mrf.mxu1 }
0x117f   : > { %v4158_v39 = vpop.f32.mrf.mxu1 }
0x1183   : > { %v4477_v33 = vpop.eup %4476 }
0x1184   : > { %v3129_v34 = vadd.f32 1.0, %v4477_v33 }
0x1185   : > { %v4479_v32 = vpop.eup %4478 }
0x1186   : > { %v3130_v16 = vadd.f32 1.0, %v4479_v32  ;;  %v3133_v52 = vmul.f32 0.5, %v3129_v34 }
0x1187   : > { %v4481_v44 = vpop.eup %4480 }
0x1188   : > { %v3131_v50 = vadd.f32 1.0, %v4481_v44  ;;  %v3134_v46 = vmul.f32 0.5, %v3130_v16  ;;  %v3137_v48 = vmul.f32 %v3133_v52, %v3097_v63  ;;  %v3324_v63 = vpop.permute.xlu1 %3323 }
0x1189   : > { %v4483_v35 = vpop.eup %4482 }
0x118a   : > { %v3135_v36 = vmul.f32 0.5, %v3131_v50  ;;  %v3132_v38 = vadd.f32 1.0, %v4483_v35  ;;  %v3138_v42 = vmul.f32 %v3134_v46, %v3099_v55 }
0x118c   : > { %v3136_v40 = vmul.f32 0.5, %v3132_v38  ;;  %v3139_v51 = vmul.f32 %v3135_v36, %v3101_v37 }
0x118e   : > { %v3140_v47 = vmul.f32 %v3136_v40, %v3103_v11  ;;  %v3141_v53 = vpack.c.bf16 %v3139_v51, %v3137_v48  ;;  %v4378_v11 = vld [vmem:[#allocation2 + $0xf8] ss:$84 sps:$4 sm:$0xff]  }
0x1190   : > { %v3142_v3 = vpack.c.bf16 %v3140_v47, %v3138_v42 }
0x1192   : > { %3310 = vmatprep.mubr.bf16.mxu0 %v3142_v3 }
0x1193   : > { %3311 = vmatmul.mubr.bf16.vlgmr.msra.gmra.mxu0 %v3141_v53  ;;  %v3804_v53 = vld [vmem:[%s5166_s6 + $0x15] ss:$0 sm:$0xff] }
0x1253   : > { %v3927_v2 = vpop.f32.mrf.mxu0 }
0x1255   : > { %v3928_v4 = vpop.f32.mrf.mxu0 }
0x1256   : > { %v3929_v60 = vadd.f32 %v3928_v4, %v3927_v2 }
0x1257   : > { %v3930_v5 = vpop.f32.mrf.mxu0 }
0x1258   : > { %v3313_v49 = vadd.f32 %v3929_v60, %v3781_v30 }
0x1259   : > { %v3931_v58 = vpop.f32.mrf.mxu0 }
0x125a   : > { %v3327_v61 = vmul.f32 %v3322_v23, %v3313_v49  ;;  %v3932_v62 = vadd.f32 %v3931_v58, %v3930_v5 }
0x125c   : > { %v3316_v6 = vadd.f32 %v3932_v62, %v3781_v30  ;;  %v3329_v45 = vadd.f32 %v3327_v61, %v5088_v26  ;;  %v3798_v26 = vld [vmem:[%s5166_s6 + $0x14] ss:$0 sm:$0xff] }
0x125d   : > { %v3408_v7 = vadd.f32 %v3798_v26, %v3407_v57  ;;  %v3405_v10 = vadd.f32 %v3798_v26, %v3404_v54 }
0x125e   : > { %v3328_v41 = vmul.f32 %v3324_v63, %v3316_v6  ;;  %v3411_v8 = vsel %vm372_vm1, %v3329_v45, 0.0  ;;  %v3419_v55 = vmul.f32 %v3329_v45, %v3329_v45 }
0x125f   : > { %3412 = vadd.xlane.f32.xlu0 %v3411_v8  ;;  %v3443_v50 = vadd.f32 1.0, %v3405_v10  ;;  %v3444_v38 = vadd.f32 1.0, %v3408_v7 }
0x1260   : > { %v3330_v59 = vadd.f32 %v3328_v41, %v5095_v43  ;;  %v3421_v9 = vsel %vm372_vm1, %v3419_v55, 0.0  ;;  %v4377_v43 = vld [vmem:[#allocation2 + $0x1a0] ss:$84 sps:$4 sm:$0xff]  }
0x1261   : > { %4162 = vmatpush3.bf16.msra.mxu1 %v4377_v43 }
0x1262   : > { %v3414_v24 = vsel %vm372_vm1, %v3330_v59, 0.0  ;;  %v3420_v37 = vmul.f32 %v3330_v59, %v3330_v59  ;;  %4163 = vmatprep.subr.bf16.mxu1 %v4565_v0 }
0x1263   : > { %3415 = vadd.xlane.f32.xlu1 %v3414_v24  ;;  %3422 = vadd.xlane.f32.xlu0 %v3421_v9 }
0x1264   : > { %v3424_v1 = vsel %vm372_vm1, %v3420_v37, 0.0 }
0x1265   : > { %4164 = vmatpush3.bf16.msra.mxu1 %v4378_v11 }
0x1266   : > { %4165 = vmatprep.subr.bf16.mxu1 %v4565_v0 }
0x1267   : > { %3425 = vadd.xlane.f32.xlu0 %v3424_v1 }
0x1269   : > { %4166 = vmatpush3.bf16.msra.mxu1 %v4379_v14 }
0x1274   : > { %3451 = vrot.lane.b32.xlu1 %v3408_v7, %s4574_s9 }
0x127d   : > { %3449 = vrot.lane.b32.xlu0 %v3405_v10, %s4574_s9 }
0x12e8   : > { %v3413_v15 = vpop.xlane.xlu0 %3412 }
0x12e9   : > { %v3417_v17 = vmul.f32 0.015625, %v3413_v15 }
0x12eb   : > { %v3429_v28 = vmul.f32 %v3417_v17, %v3417_v17  ;;  %v3435_v0 = vsub.f32 %v3329_v45, %v3417_v17 }
0x12ec   : > { %v3416_v13 = vpop.xlane.xlu1 %3415  ;;  %v3423_v18 = vpop.xlane.xlu0 %3422 }
0x12ed   : > { %v3418_v19 = vmul.f32 0.015625, %v3416_v13  ;;  %v3427_v20 = vmul.f32 0.015625, %v3423_v18 }
0x12ef   : > { %v3431_v21 = vsub.f32 %v3427_v20, %v3429_v28  ;;  %v3430_v25 = vmul.f32 %v3418_v19, %v3418_v19  ;;  %v3436_v35 = vsub.f32 %v3330_v59, %v3418_v19 }
0x12f0   : > { %v3426_v22 = vpop.xlane.xlu0 %3425  ;;  %v3452_v42 = vpop.permute.xlu1 %3451 }
0x12f1   : > { %v3433_v27 = vmax.f32 %v3431_v21, 0.0  ;;  %v3428_v31 = vmul.f32 0.015625, %v3426_v22 }
0x12f3   : > { %v3437_v29 = vadd.f32 1e-06, %v3433_v27  ;;  %v3432_v33 = vsub.f32 %v3428_v31, %v3430_v25 }
0x12f4   : > { %v3450_v40 = vpop.permute.xlu0 %3449 }
0x12f5   : > { %4484 = vrsqrt.f32 %v3437_v29  ;;  %v3434_v32 = vmax.f32 %v3432_v33, 0.0 }
0x12f7   : > { %v3438_v16 = vadd.f32 1e-06, %v3434_v32 }
0x12f9   : > { %4486 = vrsqrt.f32 %v3438_v16 }
0x1302   : > { %v4485_v44 = vpop.eup %4484 }
0x1303   : > { %v3441_v34 = vmul.f32 %v4485_v44, %v3435_v0 }
0x1305   : > { %v3445_v46 = vmul.f32 %v3443_v50, %v3441_v34 }
0x1306   : > { %v4487_v36 = vpop.eup %4486 }
0x1307   : > { %v3442_v52 = vmul.f32 %v4487_v36, %v3436_v35  ;;  %v3455_v47 = vadd.f32 %v3450_v40, %v3445_v46 }
0x1309   : > { %v3446_v51 = vmul.f32 %v3444_v38, %v3442_v52 }
0x130b   : > { %v3456_v48 = vadd.f32 %v3452_v42, %v3446_v51 }
0x130d   : > { %v3457_v3 = vpack.c.bf16 %v3456_v48, %v3455_v47 }
0x130f   : > { %4168 = vmatmul.mubr.msk.bf16.vlgmr.msra.gmra.mxu1 %vm372_vm1, %v3457_v3 }
0x13cf   : > { %v3534_v54 = vpop.f32.mrf.mxu1 }
0x13d0   : > { %v3535_v56 = vadd.f32 %v3804_v53, %v3534_v54 }
0x13d1   : > { %v4169_v57 = vpop.f32.mrf.mxu1 }
0x13d2   : > { %3541 = vst [vmem:[%s332_s20] sm:$0xff] %v3535_v56 }
0x13d3   : > { %v3537_v39 = vpop.f32.mrf.mxu1 }
0x13d4   : > { %v3538_v2 = vadd.f32 %v3804_v53, %v3537_v39 }
0x13d5   : > { %v4170_v30 = vpop.f32.mrf.mxu1 }
0x13d6   : > { %3542 = vst [vmem:[%s332_s20 + $0x8] sm:$0xff] %v3538_v2 }
0x13d7 PF: > { %s19_s24 = sadd.s32 1, %s4557_s24  }
0x13d8   : > { %p16_p3 = scmp.ge.s32.totalorder %s19_s24, 4  }
0x13da   :  { %18 = sbr.rel (!%p16_p3) target bundleno = 2 (0x2), region = 90 }
0x13df   :  { %3565 = vsyncpa [#allocation3], 1 }
0x13e0   :  { %3567 = vsyncpa [#allocation3 + $0x1], 1 }
0x13e1   :  { %3568 = vsyncpa [#allocation5], 1 }

</bundles_post_ra>
